<compile_context>
chip_gen: v5e
topology: v5e:2x2
jax: 0.10.0
libtpu: 0.0.40
codegen_flags: <defaults>
</compile_context>

<pallas_src>
import math

import jax
import jax.numpy as jnp
from jax.experimental import pallas as pl
from jax.experimental.pallas import tpu as pltpu  # noqa: F401  (imported per template; not needed at this size)

# ---------------- model hyper-parameters (small, consistent with the module) --------------
VOCAB = 100
SEQ = 8
HIDDEN = 32
NUM_HEADS = 4
HEAD_DIM = HIDDEN // NUM_HEADS
FFN = 4 * HIDDEN
NUM_LAYERS = 2
BATCH = 2
EPS = 1e-12           # BERT LayerNorm eps
INIT_STD = 0.02       # auto_cfg.initializer_range

_SQRT1_2 = 0.7071067811865476


# --------------------------------- kernel helpers -----------------------------------------
def _layernorm(x, gamma, beta):
    mean = jnp.mean(x, axis=-1, keepdims=True)
    var = jnp.mean((x - mean) ** 2, axis=-1, keepdims=True)
    return (x - mean) * jax.lax.rsqrt(var + EPS) * gamma + beta


def _erf(x):
    # Abramowitz & Stegun 7.1.26 rational approximation of erf (max abs error ~1.5e-7).
    # Uses only exp / mul / add / where so it always lowers on Mosaic, while matching
    # torch's exact erf-based GELU to ~1e-7 (far closer than the tanh approximation).
    a1, a2, a3, a4, a5 = 0.254829592, -0.284496736, 1.421413741, -1.453152027, 1.061405429
    p = 0.3275911
    ax = jnp.abs(x)
    t = 1.0 / (1.0 + p * ax)
    poly = ((((a5 * t + a4) * t + a3) * t + a2) * t + a1) * t
    y = 1.0 - poly * jnp.exp(-ax * ax)
    return jnp.where(x < 0, -y, y)


def _gelu_exact(x):
    # erf-form GELU: matches torch.nn.GELU / HF BERT "gelu" (not jax.nn.gelu's tanh default).
    return 0.5 * x * (1.0 + _erf(x * _SQRT1_2))


# --------------------------------- the fused Pallas kernel --------------------------------
def fused_forward_kernel(ids_ref, word_emb_ref, pos_type_ref, emb_ln_ref,
                         wqkv_ref, bqkv_ref, wo_ref, vec_ref,
                         w1_ref, b1_ref, w2_ref,
                         fc_w_ref, fc_b_ref, o_ref):
    num_layers, g3, hidden, head_dim = wqkv_ref.shape     # (L, 3*nh, H, hd)
    num_heads = g3 // 3
    batch, seq, _ = o_ref.shape
    vocab = word_emb_ref.shape[0]
    bs = batch * seq
    scale = 1.0 / math.sqrt(head_dim)

    # ---- embeddings: in-VMEM gather via one-hot matmul (numerically exact selection) ----
    ids = ids_ref[...]                                                        # (bs, 1) int32
    onehot = (jax.lax.broadcasted_iota(jnp.int32, (bs, vocab), 1) == ids).astype(jnp.float32)
    emb = jnp.dot(onehot, word_emb_ref[...], preferred_element_type=jnp.float32)   # (bs, H)
    emb = emb + jnp.concatenate([pos_type_ref[...]] * batch, axis=0)          # + pos + type_0
    h = _layernorm(emb, emb_ln_ref[0:1, :], emb_ln_ref[1:2, :])               # (bs, H)

    # ---- encoder layers (statically unrolled); activations stay resident in VMEM/vregs ----
    for l in range(num_layers):
        wqkv = wqkv_ref[l]                      # (3*nh, H, hd)  head-major q|k|v projections
        bqkv = bqkv_ref[l]                      # (3*nh, 1, hd)
        wo = wo_ref[l]                          # (nh, hd, H)    head-major output projection
        vec = vec_ref[l]                        # (6, H): [bo, ln1_g, ln1_b, b2, ln2_g, ln2_b]
        bo, ln1_g, ln1_b = vec[0:1], vec[1:2], vec[2:3]
        b2, ln2_g, ln2_b = vec[3:4], vec[4:5], vec[5:6]
        w1 = w1_ref[l]                          # (H, FFN)
        b1 = b1_ref[l]                          # (1, FFN)
        w2 = w2_ref[l]                          # (FFN, H)

        # --- multi-head self-attention: heads live on the leading/batch axis of batched
        #     einsums (no lane-offset slicing, no lane-axis concatenate). ---
        attn_rows = []
        for b in range(batch):                                          # static loop, B=2
            xb = h[b * seq:(b + 1) * seq, :]                            # (S, H), tile-aligned
            xg = jnp.broadcast_to(xb, (g3, seq, hidden))                # (3*nh, S, H)
            qkv = jnp.einsum('gte,ged->gtd', xg, wqkv,
                             preferred_element_type=jnp.float32) + bqkv  # (3*nh, S, hd)
            q = qkv[0:num_heads]                                        # (nh, S, hd)
            k = qkv[num_heads:2 * num_heads]
            v = qkv[2 * num_heads:3 * num_heads]
            s = jnp.einsum('nqd,nkd->nqk', q, k,
                           preferred_element_type=jnp.float32) * scale  # (nh, S, S)
            s = s - jnp.max(s, axis=-1, keepdims=True)
            p = jnp.exp(s)
            p = p * pl.reciprocal(jnp.sum(p, axis=-1, keepdims=True), approx=True)
            ctx = jnp.einsum('nqk,nkd->nqd', p, v,
                             preferred_element_type=jnp.float32)        # (nh, S, hd)
            # Head merge folded into the output projection: concat(heads) @ Wo == sum_h ctx_h @ Wo_h
            attn_rows.append(jnp.sum(
                jnp.einsum('ntd,nde->nte', ctx, wo,
                           preferred_element_type=jnp.float32), axis=0))  # (S, H)
        attn = jnp.concatenate(attn_rows, axis=0) + bo                    # (bs, H)

        h = _layernorm(h + attn, ln1_g, ln1_b)                            # post-LN (BERT)

        ff = jnp.dot(h, w1, preferred_element_type=jnp.float32) + b1      # (bs, FFN)
        ff = _gelu_exact(ff)
        ff = jnp.dot(ff, w2, preferred_element_type=jnp.float32) + b2     # (bs, H)
        h = _layernorm(h + ff, ln2_g, ln2_b)

    # ---- per-token fc head, fused into the same kernel ----
    logits = jnp.dot(h, fc_w_ref[...], preferred_element_type=jnp.float32) + fc_b_ref[...]
    o_ref[...] = logits.reshape(batch, seq, 2)


# --------------------------------- parameter init + packing --------------------------------
def init_params(key):
    def nrm(k, shape):
        return jax.random.normal(k, shape, dtype=jnp.float32) * INIT_STD

    keys = iter(jax.random.split(key, 64))

    word_emb = nrm(next(keys), (VOCAB, HIDDEN))
    pos_emb = nrm(next(keys), (SEQ, HIDDEN))
    type_emb = nrm(next(keys), (2, HIDDEN))
    emb_ln = jnp.concatenate([jnp.ones((1, HIDDEN), jnp.float32),
                              jnp.zeros((1, HIDDEN), jnp.float32)], axis=0)   # [gamma; beta]

    # fc head: _init_weights -> normal(std=initializer_range), bias zeros
    fc_w = nrm(next(keys), (HIDDEN, 2))
    fc_b = jnp.zeros((1, 2), jnp.float32)

    def heads_in(w):   # (H, H) [in, out] -> (nh, H, hd): per-head output-column blocks
        return w.reshape(HIDDEN, NUM_HEADS, HEAD_DIM).transpose(1, 0, 2)

    wqkv_l, bqkv_l, wo_l, vec_l, w1_l, b1_l, w2_l = [], [], [], [], [], [], []
    for _ in range(NUM_LAYERS):
        wq, wk, wv = (nrm(next(keys), (HIDDEN, HIDDEN)) for _ in range(3))
        wo = nrm(next(keys), (HIDDEN, HIDDEN))
        w1 = nrm(next(keys), (HIDDEN, FFN))
        w2 = nrm(next(keys), (FFN, HIDDEN))
        bq = bk = bv = jnp.zeros((HIDDEN,), jnp.float32)
        bo = jnp.zeros((HIDDEN,), jnp.float32)
        b1 = jnp.zeros((FFN,), jnp.float32)
        b2 = jnp.zeros((HIDDEN,), jnp.float32)
        ln1_g = ln2_g = jnp.ones((HIDDEN,), jnp.float32)
        ln1_b = ln2_b = jnp.zeros((HIDDEN,), jnp.float32)

        wqkv_l.append(jnp.concatenate([heads_in(wq), heads_in(wk), heads_in(wv)], axis=0))
        bqkv_l.append(jnp.concatenate([bq, bk, bv]).reshape(3 * NUM_HEADS, 1, HEAD_DIM))
        wo_l.append(wo.reshape(NUM_HEADS, HEAD_DIM, HIDDEN))        # per-head input-row blocks
        vec_l.append(jnp.stack([bo, ln1_g, ln1_b, b2, ln2_g, ln2_b], axis=0))
        w1_l.append(w1)
        b1_l.append(b1.reshape(1, FFN))
        w2_l.append(w2)

    return {
        "word_emb": word_emb,
        "pos_type": pos_emb + type_emb[0][None, :],    # token_type_ids are all zero
        "emb_ln": emb_ln,
        "fc_w": fc_w, "fc_b": fc_b,
        "wqkv": jnp.stack(wqkv_l),   # (L, 3*nh, H, hd)
        "bqkv": jnp.stack(bqkv_l),   # (L, 3*nh, 1, hd)
        "wo":   jnp.stack(wo_l),     # (L, nh, hd, H)
        "vec":  jnp.stack(vec_l),    # (L, 6, H)
        "w1":   jnp.stack(w1_l),     # (L, H, FFN)
        "b1":   jnp.stack(b1_l),     # (L, 1, FFN)
        "w2":   jnp.stack(w2_l),     # (L, FFN, H)
    }


# --------------------------------- forward pass ---------------------------------------------
@jax.jit
def one_to_many_forward(params, input_ids):
    """Mirrors OneToManyModel.forward: encoder -> last_hidden_state -> fc -> squeeze(-1)."""
    B, S = input_ids.shape
    ids2 = input_ids.reshape(B * S, 1).astype(jnp.int32)
    # Single fused kernel: no grid, full (tiny) arrays resident in VMEM.
    logit = pl.pallas_call(
        fused_forward_kernel,
        out_shape=jax.ShapeDtypeStruct((B, S, 2), jnp.float32),
    )(ids2, params["word_emb"], params["pos_type"], params["emb_ln"],
      params["wqkv"], params["bqkv"], params["wo"], params["vec"],
      params["w1"], params["b1"], params["w2"],
      params["fc_w"], params["fc_b"])
    # .squeeze(-1) in the torch module is a no-op because the fc output dim is 2.
    return logit


if __name__ == "__main__":
    key = jax.random.PRNGKey(0)
    pkey, dkey = jax.random.split(key)
    params = init_params(pkey)
    input_ids = jax.random.randint(dkey, (BATCH, SEQ), 0, VOCAB, dtype=jnp.int32)

    logit = one_to_many_forward(params, input_ids)
    logit = jax.block_until_ready(logit)
    assert logit.shape == (BATCH, SEQ, 2), logit.shape
    assert bool(jnp.all(jnp.isfinite(logit)))
    print("KERNEL_OK")
</pallas_src>

<mosaic_0001>
module attributes {stable_mosaic.version = 11 : i64} {
  func.func @fused_forward_kernel(%arg0: memref<16x1xi32, #tpu.memory_space<vmem>>, %arg1: memref<100x32xf32, #tpu.memory_space<vmem>>, %arg2: memref<8x32xf32, #tpu.memory_space<vmem>>, %arg3: memref<2x32xf32, #tpu.memory_space<vmem>>, %arg4: memref<2x12x32x8xf32, #tpu.memory_space<vmem>>, %arg5: memref<2x12x1x8xf32, #tpu.memory_space<vmem>>, %arg6: memref<2x4x8x32xf32, #tpu.memory_space<vmem>>, %arg7: memref<2x6x32xf32, #tpu.memory_space<vmem>>, %arg8: memref<2x32x128xf32, #tpu.memory_space<vmem>>, %arg9: memref<2x1x128xf32, #tpu.memory_space<vmem>>, %arg10: memref<2x128x32xf32, #tpu.memory_space<vmem>>, %arg11: memref<32x2xf32, #tpu.memory_space<vmem>>, %arg12: memref<1x2xf32, #tpu.memory_space<vmem>>, %arg13: memref<2x8x2xf32, #tpu.memory_space<vmem>>) attributes {dimension_semantics = [], scalar_prefetch = 0 : i64, scratch_operands = 0 : i64, tpu.core_type = #tpu.core_type<tc>} {
    %c0 = arith.constant 0 : index
    %c0_0 = arith.constant 0 : index
    %0 = vector.load %arg0[%c0, %c0_0] : memref<16x1xi32, #tpu.memory_space<vmem>>, vector<16x1xi32>
    %1 = tpu.iota {dimensions = array<i32: 1>} : vector<16x100xi32>
    %2 = vector.broadcast %0 : vector<16x1xi32> to vector<16x100xi32>
    %3 = arith.cmpi eq, %1, %2 : vector<16x100xi32>
    %4 = arith.extui %3 : vector<16x100xi1> to vector<16x100xi32>
    %5 = arith.sitofp %4 : vector<16x100xi32> to vector<16x100xf32>
    %c0_1 = arith.constant 0 : index
    %c0_2 = arith.constant 0 : index
    %6 = vector.load %arg1[%c0_1, %c0_2] : memref<100x32xf32, #tpu.memory_space<vmem>>, vector<100x32xf32>
    %cst = arith.constant dense<0.000000e+00> : vector<16x32xf32>
    %7 = tpu.matmul %5, %6, %cst {dimension_numbers = #tpu.dot_dimension_numbers<[1], [0], [0], [1], [0, 0, 1, 1], [], []>} : vector<16x100xf32>, vector<100x32xf32>, vector<16x32xf32> -> vector<16x32xf32>
    %c0_3 = arith.constant 0 : index
    %c0_4 = arith.constant 0 : index
    %8 = vector.load %arg2[%c0_3, %c0_4] : memref<8x32xf32, #tpu.memory_space<vmem>>, vector<8x32xf32>
    %9 = tpu.concatenate %8, %8 in 0 : vector<8x32xf32>, vector<8x32xf32> -> vector<16x32xf32>
    %10 = arith.addf %7, %9 : vector<16x32xf32>
    %c0_5 = arith.constant 0 : index
    %c0_6 = arith.constant 0 : index
    %11 = vector.load %arg3[%c0_5, %c0_6] : memref<2x32xf32, #tpu.memory_space<vmem>>, vector<1x32xf32>
    %c1 = arith.constant 1 : index
    %c0_7 = arith.constant 0 : index
    %12 = vector.load %arg3[%c1, %c0_7] : memref<2x32xf32, #tpu.memory_space<vmem>>, vector<1x32xf32>
    %cst_8 = arith.constant dense<0.000000e+00> : vector<16xf32>
    %13 = vector.multi_reduction <add>, %10, %cst_8 [1] : vector<16x32xf32> to vector<16xf32>
    %14 = vector.shape_cast %13 : vector<16xf32> to vector<16x1xf32>
    %cst_9 = arith.constant 3.200000e+01 : f32
    %15 = vector.broadcast %cst_9 : f32 to vector<16x1xf32>
    %16 = arith.divf %14, %15 : vector<16x1xf32>
    %17 = vector.broadcast %16 : vector<16x1xf32> to vector<16x32xf32>
    %18 = arith.subf %10, %17 : vector<16x32xf32>
    %19 = arith.mulf %18, %18 : vector<16x32xf32>
    %cst_10 = arith.constant dense<0.000000e+00> : vector<16xf32>
    %20 = vector.multi_reduction <add>, %19, %cst_10 [1] : vector<16x32xf32> to vector<16xf32>
    %21 = vector.shape_cast %20 : vector<16xf32> to vector<16x1xf32>
    %cst_11 = arith.constant 3.200000e+01 : f32
    %22 = vector.broadcast %cst_11 : f32 to vector<16x1xf32>
    %23 = arith.divf %21, %22 : vector<16x1xf32>
    %24 = vector.broadcast %16 : vector<16x1xf32> to vector<16x32xf32>
    %25 = arith.subf %10, %24 : vector<16x32xf32>
    %cst_12 = arith.constant 9.99999996E-13 : f32
    %26 = vector.broadcast %cst_12 : f32 to vector<16x1xf32>
    %27 = arith.addf %23, %26 : vector<16x1xf32>
    %28 = math.rsqrt %27 : vector<16x1xf32>
    %29 = vector.broadcast %28 : vector<16x1xf32> to vector<16x32xf32>
    %30 = arith.mulf %25, %29 : vector<16x32xf32>
    %31 = vector.broadcast %11 : vector<1x32xf32> to vector<16x32xf32>
    %32 = arith.mulf %30, %31 : vector<16x32xf32>
    %33 = vector.broadcast %12 : vector<1x32xf32> to vector<16x32xf32>
    %34 = arith.addf %32, %33 : vector<16x32xf32>
    %c0_13 = arith.constant 0 : index
    %c0_14 = arith.constant 0 : index
    %c0_15 = arith.constant 0 : index
    %c0_16 = arith.constant 0 : index
    %35 = vector.load %arg4[%c0_13, %c0_14, %c0_15, %c0_16] : memref<2x12x32x8xf32, #tpu.memory_space<vmem>>, vector<1x12x32x8xf32>
    %36 = vector.shape_cast %35 : vector<1x12x32x8xf32> to vector<12x32x8xf32>
    %c0_17 = arith.constant 0 : index
    %c0_18 = arith.constant 0 : index
    %c0_19 = arith.constant 0 : index
    %c0_20 = arith.constant 0 : index
    %37 = vector.load %arg5[%c0_17, %c0_18, %c0_19, %c0_20] : memref<2x12x1x8xf32, #tpu.memory_space<vmem>>, vector<1x12x1x8xf32>
    %38 = vector.shape_cast %37 : vector<1x12x1x8xf32> to vector<12x1x8xf32>
    %c0_21 = arith.constant 0 : index
    %c0_22 = arith.constant 0 : index
    %c0_23 = arith.constant 0 : index
    %c0_24 = arith.constant 0 : index
    %39 = vector.load %arg6[%c0_21, %c0_22, %c0_23, %c0_24] : memref<2x4x8x32xf32, #tpu.memory_space<vmem>>, vector<1x4x8x32xf32>
    %40 = vector.shape_cast %39 : vector<1x4x8x32xf32> to vector<4x8x32xf32>
    %c0_25 = arith.constant 0 : index
    %c0_26 = arith.constant 0 : index
    %c0_27 = arith.constant 0 : index
    %41 = vector.load %arg7[%c0_25, %c0_26, %c0_27] : memref<2x6x32xf32, #tpu.memory_space<vmem>>, vector<1x6x32xf32>
    %42 = vector.shape_cast %41 : vector<1x6x32xf32> to vector<6x32xf32>
    %43 = vector.extract_strided_slice %42 {offsets = [0, 0], sizes = [1, 32], strides = [1, 1]} : vector<6x32xf32> to vector<1x32xf32>
    %44 = vector.extract_strided_slice %42 {offsets = [1, 0], sizes = [1, 32], strides = [1, 1]} : vector<6x32xf32> to vector<1x32xf32>
    %45 = vector.extract_strided_slice %42 {offsets = [2, 0], sizes = [1, 32], strides = [1, 1]} : vector<6x32xf32> to vector<1x32xf32>
    %46 = vector.extract_strided_slice %42 {offsets = [3, 0], sizes = [1, 32], strides = [1, 1]} : vector<6x32xf32> to vector<1x32xf32>
    %47 = vector.extract_strided_slice %42 {offsets = [4, 0], sizes = [1, 32], strides = [1, 1]} : vector<6x32xf32> to vector<1x32xf32>
    %48 = vector.extract_strided_slice %42 {offsets = [5, 0], sizes = [1, 32], strides = [1, 1]} : vector<6x32xf32> to vector<1x32xf32>
    %c0_28 = arith.constant 0 : index
    %c0_29 = arith.constant 0 : index
    %c0_30 = arith.constant 0 : index
    %49 = vector.load %arg8[%c0_28, %c0_29, %c0_30] : memref<2x32x128xf32, #tpu.memory_space<vmem>>, vector<1x32x128xf32>
    %50 = vector.shape_cast %49 : vector<1x32x128xf32> to vector<32x128xf32>
    %c0_31 = arith.constant 0 : index
    %c0_32 = arith.constant 0 : index
    %c0_33 = arith.constant 0 : index
    %51 = vector.load %arg9[%c0_31, %c0_32, %c0_33] : memref<2x1x128xf32, #tpu.memory_space<vmem>>, vector<1x1x128xf32>
    %52 = vector.shape_cast %51 : vector<1x1x128xf32> to vector<1x128xf32>
    %c0_34 = arith.constant 0 : index
    %c0_35 = arith.constant 0 : index
    %c0_36 = arith.constant 0 : index
    %53 = vector.load %arg10[%c0_34, %c0_35, %c0_36] : memref<2x128x32xf32, #tpu.memory_space<vmem>>, vector<1x128x32xf32>
    %54 = vector.shape_cast %53 : vector<1x128x32xf32> to vector<128x32xf32>
    %55 = vector.extract_strided_slice %34 {offsets = [0, 0], sizes = [8, 32], strides = [1, 1]} : vector<16x32xf32> to vector<8x32xf32>
    %56 = vector.shape_cast %55 : vector<8x32xf32> to vector<1x8x32xf32>
    %57 = vector.broadcast %56 : vector<1x8x32xf32> to vector<12x8x32xf32>
    "tpu.trace_start"() <{level = 10 : i32, message = "gte,ged->gtd"}> : () -> ()
    %cst_37 = arith.constant dense<0.000000e+00> : vector<12x8x8xf32>
    %58 = tpu.matmul %57, %36, %cst_37 {dimension_numbers = #tpu.dot_dimension_numbers<[2], [1], [1], [2], [0, 0, 0, 1, 1, 2], [0], [0]>} : vector<12x8x32xf32>, vector<12x32x8xf32>, vector<12x8x8xf32> -> vector<12x8x8xf32>
    "tpu.trace_stop"() : () -> ()
    %59 = vector.broadcast %38 : vector<12x1x8xf32> to vector<12x8x8xf32>
    %60 = arith.addf %58, %59 : vector<12x8x8xf32>
    %61 = vector.extract_strided_slice %60 {offsets = [0, 0, 0], sizes = [4, 8, 8], strides = [1, 1, 1]} : vector<12x8x8xf32> to vector<4x8x8xf32>
    %62 = vector.extract_strided_slice %60 {offsets = [4, 0, 0], sizes = [4, 8, 8], strides = [1, 1, 1]} : vector<12x8x8xf32> to vector<4x8x8xf32>
    %63 = vector.extract_strided_slice %60 {offsets = [8, 0, 0], sizes = [4, 8, 8], strides = [1, 1, 1]} : vector<12x8x8xf32> to vector<4x8x8xf32>
    "tpu.trace_start"() <{level = 10 : i32, message = "nqd,nkd->nqk"}> : () -> ()
    %cst_38 = arith.constant dense<0.000000e+00> : vector<4x8x8xf32>
    %64 = tpu.matmul %61, %62, %cst_38 {dimension_numbers = #tpu.dot_dimension_numbers<[2], [2], [1], [1], [0, 0, 0, 1, 1, 1], [0], [0]>} : vector<4x8x8xf32>, vector<4x8x8xf32>, vector<4x8x8xf32> -> vector<4x8x8xf32>
    "tpu.trace_stop"() : () -> ()
    %cst_39 = arith.constant 0.353553385 : f32
    %65 = vector.broadcast %cst_39 : f32 to vector<4x8x8xf32>
    %66 = arith.mulf %64, %65 : vector<4x8x8xf32>
    %cst_40 = arith.constant dense<0xFF800000> : vector<4x8xf32>
    %67 = vector.multi_reduction <maximumf>, %66, %cst_40 [2] : vector<4x8x8xf32> to vector<4x8xf32>
    %68 = vector.shape_cast %67 : vector<4x8xf32> to vector<4x8x1xf32>
    %69 = vector.broadcast %68 : vector<4x8x1xf32> to vector<4x8x8xf32>
    %70 = arith.subf %66, %69 : vector<4x8x8xf32>
    %71 = math.exp %70 : vector<4x8x8xf32>
    %cst_41 = arith.constant dense<0.000000e+00> : vector<4x8xf32>
    %72 = vector.multi_reduction <add>, %71, %cst_41 [2] : vector<4x8x8xf32> to vector<4x8xf32>
    %73 = vector.shape_cast %72 : vector<4x8xf32> to vector<4x8x1xf32>
    %74 = tpu.reciprocal %73 {approx = true} : vector<4x8x1xf32> -> vector<4x8x1xf32>
    %75 = vector.broadcast %74 : vector<4x8x1xf32> to vector<4x8x8xf32>
    %76 = arith.mulf %71, %75 : vector<4x8x8xf32>
    "tpu.trace_start"() <{level = 10 : i32, message = "nqk,nkd->nqd"}> : () -> ()
    %cst_42 = arith.constant dense<0.000000e+00> : vector<4x8x8xf32>
    %77 = tpu.matmul %76, %63, %cst_42 {dimension_numbers = #tpu.dot_dimension_numbers<[2], [1], [1], [2], [0, 0, 0, 1, 1, 2], [0], [0]>} : vector<4x8x8xf32>, vector<4x8x8xf32>, vector<4x8x8xf32> -> vector<4x8x8xf32>
    "tpu.trace_stop"() : () -> ()
    "tpu.trace_start"() <{level = 10 : i32, message = "ntd,nde->nte"}> : () -> ()
    %cst_43 = arith.constant dense<0.000000e+00> : vector<4x8x32xf32>
    %78 = tpu.matmul %77, %40, %cst_43 {dimension_numbers = #tpu.dot_dimension_numbers<[2], [1], [1], [2], [0, 0, 0, 1, 1, 2], [0], [0]>} : vector<4x8x8xf32>, vector<4x8x32xf32>, vector<4x8x32xf32> -> vector<4x8x32xf32>
    "tpu.trace_stop"() : () -> ()
    %cst_44 = arith.constant dense<0.000000e+00> : vector<8x32xf32>
    %79 = vector.multi_reduction <add>, %78, %cst_44 [0] : vector<4x8x32xf32> to vector<8x32xf32>
    %80 = vector.extract_strided_slice %34 {offsets = [8, 0], sizes = [8, 32], strides = [1, 1]} : vector<16x32xf32> to vector<8x32xf32>
    %81 = vector.shape_cast %80 : vector<8x32xf32> to vector<1x8x32xf32>
    %82 = vector.broadcast %81 : vector<1x8x32xf32> to vector<12x8x32xf32>
    "tpu.trace_start"() <{level = 10 : i32, message = "gte,ged->gtd"}> : () -> ()
    %cst_45 = arith.constant dense<0.000000e+00> : vector<12x8x8xf32>
    %83 = tpu.matmul %82, %36, %cst_45 {dimension_numbers = #tpu.dot_dimension_numbers<[2], [1], [1], [2], [0, 0, 0, 1, 1, 2], [0], [0]>} : vector<12x8x32xf32>, vector<12x32x8xf32>, vector<12x8x8xf32> -> vector<12x8x8xf32>
    "tpu.trace_stop"() : () -> ()
    %84 = vector.broadcast %38 : vector<12x1x8xf32> to vector<12x8x8xf32>
    %85 = arith.addf %83, %84 : vector<12x8x8xf32>
    %86 = vector.extract_strided_slice %85 {offsets = [0, 0, 0], sizes = [4, 8, 8], strides = [1, 1, 1]} : vector<12x8x8xf32> to vector<4x8x8xf32>
    %87 = vector.extract_strided_slice %85 {offsets = [4, 0, 0], sizes = [4, 8, 8], strides = [1, 1, 1]} : vector<12x8x8xf32> to vector<4x8x8xf32>
    %88 = vector.extract_strided_slice %85 {offsets = [8, 0, 0], sizes = [4, 8, 8], strides = [1, 1, 1]} : vector<12x8x8xf32> to vector<4x8x8xf32>
    "tpu.trace_start"() <{level = 10 : i32, message = "nqd,nkd->nqk"}> : () -> ()
    %cst_46 = arith.constant dense<0.000000e+00> : vector<4x8x8xf32>
    %89 = tpu.matmul %86, %87, %cst_46 {dimension_numbers = #tpu.dot_dimension_numbers<[2], [2], [1], [1], [0, 0, 0, 1, 1, 1], [0], [0]>} : vector<4x8x8xf32>, vector<4x8x8xf32>, vector<4x8x8xf32> -> vector<4x8x8xf32>
    "tpu.trace_stop"() : () -> ()
    %cst_47 = arith.constant 0.353553385 : f32
    %90 = vector.broadcast %cst_47 : f32 to vector<4x8x8xf32>
    %91 = arith.mulf %89, %90 : vector<4x8x8xf32>
    %cst_48 = arith.constant dense<0xFF800000> : vector<4x8xf32>
    %92 = vector.multi_reduction <maximumf>, %91, %cst_48 [2] : vector<4x8x8xf32> to vector<4x8xf32>
    %93 = vector.shape_cast %92 : vector<4x8xf32> to vector<4x8x1xf32>
    %94 = vector.broadcast %93 : vector<4x8x1xf32> to vector<4x8x8xf32>
    %95 = arith.subf %91, %94 : vector<4x8x8xf32>
    %96 = math.exp %95 : vector<4x8x8xf32>
    %cst_49 = arith.constant dense<0.000000e+00> : vector<4x8xf32>
    %97 = vector.multi_reduction <add>, %96, %cst_49 [2] : vector<4x8x8xf32> to vector<4x8xf32>
    %98 = vector.shape_cast %97 : vector<4x8xf32> to vector<4x8x1xf32>
    %99 = tpu.reciprocal %98 {approx = true} : vector<4x8x1xf32> -> vector<4x8x1xf32>
    %100 = vector.broadcast %99 : vector<4x8x1xf32> to vector<4x8x8xf32>
    %101 = arith.mulf %96, %100 : vector<4x8x8xf32>
    "tpu.trace_start"() <{level = 10 : i32, message = "nqk,nkd->nqd"}> : () -> ()
    %cst_50 = arith.constant dense<0.000000e+00> : vector<4x8x8xf32>
    %102 = tpu.matmul %101, %88, %cst_50 {dimension_numbers = #tpu.dot_dimension_numbers<[2], [1], [1], [2], [0, 0, 0, 1, 1, 2], [0], [0]>} : vector<4x8x8xf32>, vector<4x8x8xf32>, vector<4x8x8xf32> -> vector<4x8x8xf32>
    "tpu.trace_stop"() : () -> ()
    "tpu.trace_start"() <{level = 10 : i32, message = "ntd,nde->nte"}> : () -> ()
    %cst_51 = arith.constant dense<0.000000e+00> : vector<4x8x32xf32>
    %103 = tpu.matmul %102, %40, %cst_51 {dimension_numbers = #tpu.dot_dimension_numbers<[2], [1], [1], [2], [0, 0, 0, 1, 1, 2], [0], [0]>} : vector<4x8x8xf32>, vector<4x8x32xf32>, vector<4x8x32xf32> -> vector<4x8x32xf32>
    "tpu.trace_stop"() : () -> ()
    %cst_52 = arith.constant dense<0.000000e+00> : vector<8x32xf32>
    %104 = vector.multi_reduction <add>, %103, %cst_52 [0] : vector<4x8x32xf32> to vector<8x32xf32>
    %105 = tpu.concatenate %79, %104 in 0 : vector<8x32xf32>, vector<8x32xf32> -> vector<16x32xf32>
    %106 = vector.broadcast %43 : vector<1x32xf32> to vector<16x32xf32>
    %107 = arith.addf %105, %106 : vector<16x32xf32>
    %108 = arith.addf %34, %107 : vector<16x32xf32>
    %cst_53 = arith.constant dense<0.000000e+00> : vector<16xf32>
    %109 = vector.multi_reduction <add>, %108, %cst_53 [1] : vector<16x32xf32> to vector<16xf32>
    %110 = vector.shape_cast %109 : vector<16xf32> to vector<16x1xf32>
    %cst_54 = arith.constant 3.200000e+01 : f32
    %111 = vector.broadcast %cst_54 : f32 to vector<16x1xf32>
    %112 = arith.divf %110, %111 : vector<16x1xf32>
    %113 = vector.broadcast %112 : vector<16x1xf32> to vector<16x32xf32>
    %114 = arith.subf %108, %113 : vector<16x32xf32>
    %115 = arith.mulf %114, %114 : vector<16x32xf32>
    %cst_55 = arith.constant dense<0.000000e+00> : vector<16xf32>
    %116 = vector.multi_reduction <add>, %115, %cst_55 [1] : vector<16x32xf32> to vector<16xf32>
    %117 = vector.shape_cast %116 : vector<16xf32> to vector<16x1xf32>
    %cst_56 = arith.constant 3.200000e+01 : f32
    %118 = vector.broadcast %cst_56 : f32 to vector<16x1xf32>
    %119 = arith.divf %117, %118 : vector<16x1xf32>
    %120 = vector.broadcast %112 : vector<16x1xf32> to vector<16x32xf32>
    %121 = arith.subf %108, %120 : vector<16x32xf32>
    %cst_57 = arith.constant 9.99999996E-13 : f32
    %122 = vector.broadcast %cst_57 : f32 to vector<16x1xf32>
    %123 = arith.addf %119, %122 : vector<16x1xf32>
    %124 = math.rsqrt %123 : vector<16x1xf32>
    %125 = vector.broadcast %124 : vector<16x1xf32> to vector<16x32xf32>
    %126 = arith.mulf %121, %125 : vector<16x32xf32>
    %127 = vector.broadcast %44 : vector<1x32xf32> to vector<16x32xf32>
    %128 = arith.mulf %126, %127 : vector<16x32xf32>
    %129 = vector.broadcast %45 : vector<1x32xf32> to vector<16x32xf32>
    %130 = arith.addf %128, %129 : vector<16x32xf32>
    %cst_58 = arith.constant dense<0.000000e+00> : vector<16x128xf32>
    %131 = tpu.matmul %130, %50, %cst_58 {dimension_numbers = #tpu.dot_dimension_numbers<[1], [0], [0], [1], [0, 0, 1, 1], [], []>} : vector<16x32xf32>, vector<32x128xf32>, vector<16x128xf32> -> vector<16x128xf32>
    %132 = vector.broadcast %52 : vector<1x128xf32> to vector<16x128xf32>
    %133 = arith.addf %131, %132 : vector<16x128xf32>
    %cst_59 = arith.constant 5.000000e-01 : f32
    %134 = vector.broadcast %cst_59 : f32 to vector<16x128xf32>
    %135 = arith.mulf %134, %133 : vector<16x128xf32>
    %cst_60 = arith.constant 0.707106769 : f32
    %136 = vector.broadcast %cst_60 : f32 to vector<16x128xf32>
    %137 = arith.mulf %133, %136 : vector<16x128xf32>
    %138 = math.absf %137 : vector<16x128xf32>
    %cst_61 = arith.constant 0.327591091 : f32
    %139 = vector.broadcast %cst_61 : f32 to vector<16x128xf32>
    %140 = arith.mulf %139, %138 : vector<16x128xf32>
    %cst_62 = arith.constant 1.000000e+00 : f32
    %141 = vector.broadcast %cst_62 : f32 to vector<16x128xf32>
    %142 = arith.addf %141, %140 : vector<16x128xf32>
    %cst_63 = arith.constant 1.000000e+00 : f32
    %143 = vector.broadcast %cst_63 : f32 to vector<16x128xf32>
    %144 = arith.divf %143, %142 : vector<16x128xf32>
    %cst_64 = arith.constant 1.06140542 : f32
    %145 = vector.broadcast %cst_64 : f32 to vector<16x128xf32>
    %146 = arith.mulf %145, %144 : vector<16x128xf32>
    %cst_65 = arith.constant -1.45315206 : f32
    %147 = vector.broadcast %cst_65 : f32 to vector<16x128xf32>
    %148 = arith.addf %146, %147 : vector<16x128xf32>
    %149 = arith.mulf %148, %144 : vector<16x128xf32>
    %cst_66 = arith.constant 1.42141378 : f32
    %150 = vector.broadcast %cst_66 : f32 to vector<16x128xf32>
    %151 = arith.addf %149, %150 : vector<16x128xf32>
    %152 = arith.mulf %151, %144 : vector<16x128xf32>
    %cst_67 = arith.constant -0.284496725 : f32
    %153 = vector.broadcast %cst_67 : f32 to vector<16x128xf32>
    %154 = arith.addf %152, %153 : vector<16x128xf32>
    %155 = arith.mulf %154, %144 : vector<16x128xf32>
    %cst_68 = arith.constant 0.254829586 : f32
    %156 = vector.broadcast %cst_68 : f32 to vector<16x128xf32>
    %157 = arith.addf %155, %156 : vector<16x128xf32>
    %158 = arith.mulf %157, %144 : vector<16x128xf32>
    %cst_69 = arith.constant 0.000000e+00 : f32
    %159 = vector.broadcast %cst_69 : f32 to vector<16x128xf32>
    %160 = arith.subf %159, %138 : vector<16x128xf32>
    %161 = arith.mulf %160, %138 : vector<16x128xf32>
    %162 = math.exp %161 : vector<16x128xf32>
    %163 = arith.mulf %158, %162 : vector<16x128xf32>
    %cst_70 = arith.constant 1.000000e+00 : f32
    %164 = vector.broadcast %cst_70 : f32 to vector<16x128xf32>
    %165 = arith.subf %164, %163 : vector<16x128xf32>
    %cst_71 = arith.constant 0.000000e+00 : f32
    %166 = vector.broadcast %cst_71 : f32 to vector<16x128xf32>
    %167 = arith.cmpf olt, %137, %166 : vector<16x128xf32>
    %cst_72 = arith.constant 0.000000e+00 : f32
    %168 = vector.broadcast %cst_72 : f32 to vector<16x128xf32>
    %169 = arith.subf %168, %165 : vector<16x128xf32>
    %170 = arith.select %167, %169, %165 : vector<16x128xi1>, vector<16x128xf32>
    %cst_73 = arith.constant 1.000000e+00 : f32
    %171 = vector.broadcast %cst_73 : f32 to vector<16x128xf32>
    %172 = arith.addf %171, %170 : vector<16x128xf32>
    %173 = arith.mulf %135, %172 : vector<16x128xf32>
    %cst_74 = arith.constant dense<0.000000e+00> : vector<16x32xf32>
    %174 = tpu.matmul %173, %54, %cst_74 {dimension_numbers = #tpu.dot_dimension_numbers<[1], [0], [0], [1], [0, 0, 1, 1], [], []>} : vector<16x128xf32>, vector<128x32xf32>, vector<16x32xf32> -> vector<16x32xf32>
    %175 = vector.broadcast %46 : vector<1x32xf32> to vector<16x32xf32>
    %176 = arith.addf %174, %175 : vector<16x32xf32>
    %177 = arith.addf %130, %176 : vector<16x32xf32>
    %cst_75 = arith.constant dense<0.000000e+00> : vector<16xf32>
    %178 = vector.multi_reduction <add>, %177, %cst_75 [1] : vector<16x32xf32> to vector<16xf32>
    %179 = vector.shape_cast %178 : vector<16xf32> to vector<16x1xf32>
    %cst_76 = arith.constant 3.200000e+01 : f32
    %180 = vector.broadcast %cst_76 : f32 to vector<16x1xf32>
    %181 = arith.divf %179, %180 : vector<16x1xf32>
    %182 = vector.broadcast %181 : vector<16x1xf32> to vector<16x32xf32>
    %183 = arith.subf %177, %182 : vector<16x32xf32>
    %184 = arith.mulf %183, %183 : vector<16x32xf32>
    %cst_77 = arith.constant dense<0.000000e+00> : vector<16xf32>
    %185 = vector.multi_reduction <add>, %184, %cst_77 [1] : vector<16x32xf32> to vector<16xf32>
    %186 = vector.shape_cast %185 : vector<16xf32> to vector<16x1xf32>
    %cst_78 = arith.constant 3.200000e+01 : f32
    %187 = vector.broadcast %cst_78 : f32 to vector<16x1xf32>
    %188 = arith.divf %186, %187 : vector<16x1xf32>
    %189 = vector.broadcast %181 : vector<16x1xf32> to vector<16x32xf32>
    %190 = arith.subf %177, %189 : vector<16x32xf32>
    %cst_79 = arith.constant 9.99999996E-13 : f32
    %191 = vector.broadcast %cst_79 : f32 to vector<16x1xf32>
    %192 = arith.addf %188, %191 : vector<16x1xf32>
    %193 = math.rsqrt %192 : vector<16x1xf32>
    %194 = vector.broadcast %193 : vector<16x1xf32> to vector<16x32xf32>
    %195 = arith.mulf %190, %194 : vector<16x32xf32>
    %196 = vector.broadcast %47 : vector<1x32xf32> to vector<16x32xf32>
    %197 = arith.mulf %195, %196 : vector<16x32xf32>
    %198 = vector.broadcast %48 : vector<1x32xf32> to vector<16x32xf32>
    %199 = arith.addf %197, %198 : vector<16x32xf32>
    %c1_80 = arith.constant 1 : index
    %c0_81 = arith.constant 0 : index
    %c0_82 = arith.constant 0 : index
    %c0_83 = arith.constant 0 : index
    %200 = vector.load %arg4[%c1_80, %c0_81, %c0_82, %c0_83] : memref<2x12x32x8xf32, #tpu.memory_space<vmem>>, vector<1x12x32x8xf32>
    %201 = vector.shape_cast %200 : vector<1x12x32x8xf32> to vector<12x32x8xf32>
    %c1_84 = arith.constant 1 : index
    %c0_85 = arith.constant 0 : index
    %c0_86 = arith.constant 0 : index
    %c0_87 = arith.constant 0 : index
    %202 = vector.load %arg5[%c1_84, %c0_85, %c0_86, %c0_87] : memref<2x12x1x8xf32, #tpu.memory_space<vmem>>, vector<1x12x1x8xf32>
    %203 = vector.shape_cast %202 : vector<1x12x1x8xf32> to vector<12x1x8xf32>
    %c1_88 = arith.constant 1 : index
    %c0_89 = arith.constant 0 : index
    %c0_90 = arith.constant 0 : index
    %c0_91 = arith.constant 0 : index
    %204 = vector.load %arg6[%c1_88, %c0_89, %c0_90, %c0_91] : memref<2x4x8x32xf32, #tpu.memory_space<vmem>>, vector<1x4x8x32xf32>
    %205 = vector.shape_cast %204 : vector<1x4x8x32xf32> to vector<4x8x32xf32>
    %c1_92 = arith.constant 1 : index
    %c0_93 = arith.constant 0 : index
    %c0_94 = arith.constant 0 : index
    %206 = vector.load %arg7[%c1_92, %c0_93, %c0_94] : memref<2x6x32xf32, #tpu.memory_space<vmem>>, vector<1x6x32xf32>
    %207 = vector.shape_cast %206 : vector<1x6x32xf32> to vector<6x32xf32>
    %208 = vector.extract_strided_slice %207 {offsets = [0, 0], sizes = [1, 32], strides = [1, 1]} : vector<6x32xf32> to vector<1x32xf32>
    %209 = vector.extract_strided_slice %207 {offsets = [1, 0], sizes = [1, 32], strides = [1, 1]} : vector<6x32xf32> to vector<1x32xf32>
    %210 = vector.extract_strided_slice %207 {offsets = [2, 0], sizes = [1, 32], strides = [1, 1]} : vector<6x32xf32> to vector<1x32xf32>
    %211 = vector.extract_strided_slice %207 {offsets = [3, 0], sizes = [1, 32], strides = [1, 1]} : vector<6x32xf32> to vector<1x32xf32>
    %212 = vector.extract_strided_slice %207 {offsets = [4, 0], sizes = [1, 32], strides = [1, 1]} : vector<6x32xf32> to vector<1x32xf32>
    %213 = vector.extract_strided_slice %207 {offsets = [5, 0], sizes = [1, 32], strides = [1, 1]} : vector<6x32xf32> to vector<1x32xf32>
    %c1_95 = arith.constant 1 : index
    %c0_96 = arith.constant 0 : index
    %c0_97 = arith.constant 0 : index
    %214 = vector.load %arg8[%c1_95, %c0_96, %c0_97] : memref<2x32x128xf32, #tpu.memory_space<vmem>>, vector<1x32x128xf32>
    %215 = vector.shape_cast %214 : vector<1x32x128xf32> to vector<32x128xf32>
    %c1_98 = arith.constant 1 : index
    %c0_99 = arith.constant 0 : index
    %c0_100 = arith.constant 0 : index
    %216 = vector.load %arg9[%c1_98, %c0_99, %c0_100] : memref<2x1x128xf32, #tpu.memory_space<vmem>>, vector<1x1x128xf32>
    %217 = vector.shape_cast %216 : vector<1x1x128xf32> to vector<1x128xf32>
    %c1_101 = arith.constant 1 : index
    %c0_102 = arith.constant 0 : index
    %c0_103 = arith.constant 0 : index
    %218 = vector.load %arg10[%c1_101, %c0_102, %c0_103] : memref<2x128x32xf32, #tpu.memory_space<vmem>>, vector<1x128x32xf32>
    %219 = vector.shape_cast %218 : vector<1x128x32xf32> to vector<128x32xf32>
    %220 = vector.extract_strided_slice %199 {offsets = [0, 0], sizes = [8, 32], strides = [1, 1]} : vector<16x32xf32> to vector<8x32xf32>
    %221 = vector.shape_cast %220 : vector<8x32xf32> to vector<1x8x32xf32>
    %222 = vector.broadcast %221 : vector<1x8x32xf32> to vector<12x8x32xf32>
    "tpu.trace_start"() <{level = 10 : i32, message = "gte,ged->gtd"}> : () -> ()
    %cst_104 = arith.constant dense<0.000000e+00> : vector<12x8x8xf32>
    %223 = tpu.matmul %222, %201, %cst_104 {dimension_numbers = #tpu.dot_dimension_numbers<[2], [1], [1], [2], [0, 0, 0, 1, 1, 2], [0], [0]>} : vector<12x8x32xf32>, vector<12x32x8xf32>, vector<12x8x8xf32> -> vector<12x8x8xf32>
    "tpu.trace_stop"() : () -> ()
    %224 = vector.broadcast %203 : vector<12x1x8xf32> to vector<12x8x8xf32>
    %225 = arith.addf %223, %224 : vector<12x8x8xf32>
    %226 = vector.extract_strided_slice %225 {offsets = [0, 0, 0], sizes = [4, 8, 8], strides = [1, 1, 1]} : vector<12x8x8xf32> to vector<4x8x8xf32>
    %227 = vector.extract_strided_slice %225 {offsets = [4, 0, 0], sizes = [4, 8, 8], strides = [1, 1, 1]} : vector<12x8x8xf32> to vector<4x8x8xf32>
    %228 = vector.extract_strided_slice %225 {offsets = [8, 0, 0], sizes = [4, 8, 8], strides = [1, 1, 1]} : vector<12x8x8xf32> to vector<4x8x8xf32>
    "tpu.trace_start"() <{level = 10 : i32, message = "nqd,nkd->nqk"}> : () -> ()
    %cst_105 = arith.constant dense<0.000000e+00> : vector<4x8x8xf32>
    %229 = tpu.matmul %226, %227, %cst_105 {dimension_numbers = #tpu.dot_dimension_numbers<[2], [2], [1], [1], [0, 0, 0, 1, 1, 1], [0], [0]>} : vector<4x8x8xf32>, vector<4x8x8xf32>, vector<4x8x8xf32> -> vector<4x8x8xf32>
    "tpu.trace_stop"() : () -> ()
    %cst_106 = arith.constant 0.353553385 : f32
    %230 = vector.broadcast %cst_106 : f32 to vector<4x8x8xf32>
    %231 = arith.mulf %229, %230 : vector<4x8x8xf32>
    %cst_107 = arith.constant dense<0xFF800000> : vector<4x8xf32>
    %232 = vector.multi_reduction <maximumf>, %231, %cst_107 [2] : vector<4x8x8xf32> to vector<4x8xf32>
    %233 = vector.shape_cast %232 : vector<4x8xf32> to vector<4x8x1xf32>
    %234 = vector.broadcast %233 : vector<4x8x1xf32> to vector<4x8x8xf32>
    %235 = arith.subf %231, %234 : vector<4x8x8xf32>
    %236 = math.exp %235 : vector<4x8x8xf32>
    %cst_108 = arith.constant dense<0.000000e+00> : vector<4x8xf32>
    %237 = vector.multi_reduction <add>, %236, %cst_108 [2] : vector<4x8x8xf32> to vector<4x8xf32>
    %238 = vector.shape_cast %237 : vector<4x8xf32> to vector<4x8x1xf32>
    %239 = tpu.reciprocal %238 {approx = true} : vector<4x8x1xf32> -> vector<4x8x1xf32>
    %240 = vector.broadcast %239 : vector<4x8x1xf32> to vector<4x8x8xf32>
    %241 = arith.mulf %236, %240 : vector<4x8x8xf32>
    "tpu.trace_start"() <{level = 10 : i32, message = "nqk,nkd->nqd"}> : () -> ()
    %cst_109 = arith.constant dense<0.000000e+00> : vector<4x8x8xf32>
    %242 = tpu.matmul %241, %228, %cst_109 {dimension_numbers = #tpu.dot_dimension_numbers<[2], [1], [1], [2], [0, 0, 0, 1, 1, 2], [0], [0]>} : vector<4x8x8xf32>, vector<4x8x8xf32>, vector<4x8x8xf32> -> vector<4x8x8xf32>
    "tpu.trace_stop"() : () -> ()
    "tpu.trace_start"() <{level = 10 : i32, message = "ntd,nde->nte"}> : () -> ()
    %cst_110 = arith.constant dense<0.000000e+00> : vector<4x8x32xf32>
    %243 = tpu.matmul %242, %205, %cst_110 {dimension_numbers = #tpu.dot_dimension_numbers<[2], [1], [1], [2], [0, 0, 0, 1, 1, 2], [0], [0]>} : vector<4x8x8xf32>, vector<4x8x32xf32>, vector<4x8x32xf32> -> vector<4x8x32xf32>
    "tpu.trace_stop"() : () -> ()
    %cst_111 = arith.constant dense<0.000000e+00> : vector<8x32xf32>
    %244 = vector.multi_reduction <add>, %243, %cst_111 [0] : vector<4x8x32xf32> to vector<8x32xf32>
    %245 = vector.extract_strided_slice %199 {offsets = [8, 0], sizes = [8, 32], strides = [1, 1]} : vector<16x32xf32> to vector<8x32xf32>
    %246 = vector.shape_cast %245 : vector<8x32xf32> to vector<1x8x32xf32>
    %247 = vector.broadcast %246 : vector<1x8x32xf32> to vector<12x8x32xf32>
    "tpu.trace_start"() <{level = 10 : i32, message = "gte,ged->gtd"}> : () -> ()
    %cst_112 = arith.constant dense<0.000000e+00> : vector<12x8x8xf32>
    %248 = tpu.matmul %247, %201, %cst_112 {dimension_numbers = #tpu.dot_dimension_numbers<[2], [1], [1], [2], [0, 0, 0, 1, 1, 2], [0], [0]>} : vector<12x8x32xf32>, vector<12x32x8xf32>, vector<12x8x8xf32> -> vector<12x8x8xf32>
    "tpu.trace_stop"() : () -> ()
    %249 = vector.broadcast %203 : vector<12x1x8xf32> to vector<12x8x8xf32>
    %250 = arith.addf %248, %249 : vector<12x8x8xf32>
    %251 = vector.extract_strided_slice %250 {offsets = [0, 0, 0], sizes = [4, 8, 8], strides = [1, 1, 1]} : vector<12x8x8xf32> to vector<4x8x8xf32>
    %252 = vector.extract_strided_slice %250 {offsets = [4, 0, 0], sizes = [4, 8, 8], strides = [1, 1, 1]} : vector<12x8x8xf32> to vector<4x8x8xf32>
    %253 = vector.extract_strided_slice %250 {offsets = [8, 0, 0], sizes = [4, 8, 8], strides = [1, 1, 1]} : vector<12x8x8xf32> to vector<4x8x8xf32>
    "tpu.trace_start"() <{level = 10 : i32, message = "nqd,nkd->nqk"}> : () -> ()
    %cst_113 = arith.constant dense<0.000000e+00> : vector<4x8x8xf32>
    %254 = tpu.matmul %251, %252, %cst_113 {dimension_numbers = #tpu.dot_dimension_numbers<[2], [2], [1], [1], [0, 0, 0, 1, 1, 1], [0], [0]>} : vector<4x8x8xf32>, vector<4x8x8xf32>, vector<4x8x8xf32> -> vector<4x8x8xf32>
    "tpu.trace_stop"() : () -> ()
    %cst_114 = arith.constant 0.353553385 : f32
    %255 = vector.broadcast %cst_114 : f32 to vector<4x8x8xf32>
    %256 = arith.mulf %254, %255 : vector<4x8x8xf32>
    %cst_115 = arith.constant dense<0xFF800000> : vector<4x8xf32>
    %257 = vector.multi_reduction <maximumf>, %256, %cst_115 [2] : vector<4x8x8xf32> to vector<4x8xf32>
    %258 = vector.shape_cast %257 : vector<4x8xf32> to vector<4x8x1xf32>
    %259 = vector.broadcast %258 : vector<4x8x1xf32> to vector<4x8x8xf32>
    %260 = arith.subf %256, %259 : vector<4x8x8xf32>
    %261 = math.exp %260 : vector<4x8x8xf32>
    %cst_116 = arith.constant dense<0.000000e+00> : vector<4x8xf32>
    %262 = vector.multi_reduction <add>, %261, %cst_116 [2] : vector<4x8x8xf32> to vector<4x8xf32>
    %263 = vector.shape_cast %262 : vector<4x8xf32> to vector<4x8x1xf32>
    %264 = tpu.reciprocal %263 {approx = true} : vector<4x8x1xf32> -> vector<4x8x1xf32>
    %265 = vector.broadcast %264 : vector<4x8x1xf32> to vector<4x8x8xf32>
    %266 = arith.mulf %261, %265 : vector<4x8x8xf32>
    "tpu.trace_start"() <{level = 10 : i32, message = "nqk,nkd->nqd"}> : () -> ()
    %cst_117 = arith.constant dense<0.000000e+00> : vector<4x8x8xf32>
    %267 = tpu.matmul %266, %253, %cst_117 {dimension_numbers = #tpu.dot_dimension_numbers<[2], [1], [1], [2], [0, 0, 0, 1, 1, 2], [0], [0]>} : vector<4x8x8xf32>, vector<4x8x8xf32>, vector<4x8x8xf32> -> vector<4x8x8xf32>
    "tpu.trace_stop"() : () -> ()
    "tpu.trace_start"() <{level = 10 : i32, message = "ntd,nde->nte"}> : () -> ()
    %cst_118 = arith.constant dense<0.000000e+00> : vector<4x8x32xf32>
    %268 = tpu.matmul %267, %205, %cst_118 {dimension_numbers = #tpu.dot_dimension_numbers<[2], [1], [1], [2], [0, 0, 0, 1, 1, 2], [0], [0]>} : vector<4x8x8xf32>, vector<4x8x32xf32>, vector<4x8x32xf32> -> vector<4x8x32xf32>
    "tpu.trace_stop"() : () -> ()
    %cst_119 = arith.constant dense<0.000000e+00> : vector<8x32xf32>
    %269 = vector.multi_reduction <add>, %268, %cst_119 [0] : vector<4x8x32xf32> to vector<8x32xf32>
    %270 = tpu.concatenate %244, %269 in 0 : vector<8x32xf32>, vector<8x32xf32> -> vector<16x32xf32>
    %271 = vector.broadcast %208 : vector<1x32xf32> to vector<16x32xf32>
    %272 = arith.addf %270, %271 : vector<16x32xf32>
    %273 = arith.addf %199, %272 : vector<16x32xf32>
    %cst_120 = arith.constant dense<0.000000e+00> : vector<16xf32>
    %274 = vector.multi_reduction <add>, %273, %cst_120 [1] : vector<16x32xf32> to vector<16xf32>
    %275 = vector.shape_cast %274 : vector<16xf32> to vector<16x1xf32>
    %cst_121 = arith.constant 3.200000e+01 : f32
    %276 = vector.broadcast %cst_121 : f32 to vector<16x1xf32>
    %277 = arith.divf %275, %276 : vector<16x1xf32>
    %278 = vector.broadcast %277 : vector<16x1xf32> to vector<16x32xf32>
    %279 = arith.subf %273, %278 : vector<16x32xf32>
    %280 = arith.mulf %279, %279 : vector<16x32xf32>
    %cst_122 = arith.constant dense<0.000000e+00> : vector<16xf32>
    %281 = vector.multi_reduction <add>, %280, %cst_122 [1] : vector<16x32xf32> to vector<16xf32>
    %282 = vector.shape_cast %281 : vector<16xf32> to vector<16x1xf32>
    %cst_123 = arith.constant 3.200000e+01 : f32
    %283 = vector.broadcast %cst_123 : f32 to vector<16x1xf32>
    %284 = arith.divf %282, %283 : vector<16x1xf32>
    %285 = vector.broadcast %277 : vector<16x1xf32> to vector<16x32xf32>
    %286 = arith.subf %273, %285 : vector<16x32xf32>
    %cst_124 = arith.constant 9.99999996E-13 : f32
    %287 = vector.broadcast %cst_124 : f32 to vector<16x1xf32>
    %288 = arith.addf %284, %287 : vector<16x1xf32>
    %289 = math.rsqrt %288 : vector<16x1xf32>
    %290 = vector.broadcast %289 : vector<16x1xf32> to vector<16x32xf32>
    %291 = arith.mulf %286, %290 : vector<16x32xf32>
    %292 = vector.broadcast %209 : vector<1x32xf32> to vector<16x32xf32>
    %293 = arith.mulf %291, %292 : vector<16x32xf32>
    %294 = vector.broadcast %210 : vector<1x32xf32> to vector<16x32xf32>
    %295 = arith.addf %293, %294 : vector<16x32xf32>
    %cst_125 = arith.constant dense<0.000000e+00> : vector<16x128xf32>
    %296 = tpu.matmul %295, %215, %cst_125 {dimension_numbers = #tpu.dot_dimension_numbers<[1], [0], [0], [1], [0, 0, 1, 1], [], []>} : vector<16x32xf32>, vector<32x128xf32>, vector<16x128xf32> -> vector<16x128xf32>
    %297 = vector.broadcast %217 : vector<1x128xf32> to vector<16x128xf32>
    %298 = arith.addf %296, %297 : vector<16x128xf32>
    %cst_126 = arith.constant 5.000000e-01 : f32
    %299 = vector.broadcast %cst_126 : f32 to vector<16x128xf32>
    %300 = arith.mulf %299, %298 : vector<16x128xf32>
    %cst_127 = arith.constant 0.707106769 : f32
    %301 = vector.broadcast %cst_127 : f32 to vector<16x128xf32>
    %302 = arith.mulf %298, %301 : vector<16x128xf32>
    %303 = math.absf %302 : vector<16x128xf32>
    %cst_128 = arith.constant 0.327591091 : f32
    %304 = vector.broadcast %cst_128 : f32 to vector<16x128xf32>
    %305 = arith.mulf %304, %303 : vector<16x128xf32>
    %cst_129 = arith.constant 1.000000e+00 : f32
    %306 = vector.broadcast %cst_129 : f32 to vector<16x128xf32>
    %307 = arith.addf %306, %305 : vector<16x128xf32>
    %cst_130 = arith.constant 1.000000e+00 : f32
    %308 = vector.broadcast %cst_130 : f32 to vector<16x128xf32>
    %309 = arith.divf %308, %307 : vector<16x128xf32>
    %cst_131 = arith.constant 1.06140542 : f32
    %310 = vector.broadcast %cst_131 : f32 to vector<16x128xf32>
    %311 = arith.mulf %310, %309 : vector<16x128xf32>
    %cst_132 = arith.constant -1.45315206 : f32
    %312 = vector.broadcast %cst_132 : f32 to vector<16x128xf32>
    %313 = arith.addf %311, %312 : vector<16x128xf32>
    %314 = arith.mulf %313, %309 : vector<16x128xf32>
    %cst_133 = arith.constant 1.42141378 : f32
    %315 = vector.broadcast %cst_133 : f32 to vector<16x128xf32>
    %316 = arith.addf %314, %315 : vector<16x128xf32>
    %317 = arith.mulf %316, %309 : vector<16x128xf32>
    %cst_134 = arith.constant -0.284496725 : f32
    %318 = vector.broadcast %cst_134 : f32 to vector<16x128xf32>
    %319 = arith.addf %317, %318 : vector<16x128xf32>
    %320 = arith.mulf %319, %309 : vector<16x128xf32>
    %cst_135 = arith.constant 0.254829586 : f32
    %321 = vector.broadcast %cst_135 : f32 to vector<16x128xf32>
    %322 = arith.addf %320, %321 : vector<16x128xf32>
    %323 = arith.mulf %322, %309 : vector<16x128xf32>
    %cst_136 = arith.constant 0.000000e+00 : f32
    %324 = vector.broadcast %cst_136 : f32 to vector<16x128xf32>
    %325 = arith.subf %324, %303 : vector<16x128xf32>
    %326 = arith.mulf %325, %303 : vector<16x128xf32>
    %327 = math.exp %326 : vector<16x128xf32>
    %328 = arith.mulf %323, %327 : vector<16x128xf32>
    %cst_137 = arith.constant 1.000000e+00 : f32
    %329 = vector.broadcast %cst_137 : f32 to vector<16x128xf32>
    %330 = arith.subf %329, %328 : vector<16x128xf32>
    %cst_138 = arith.constant 0.000000e+00 : f32
    %331 = vector.broadcast %cst_138 : f32 to vector<16x128xf32>
    %332 = arith.cmpf olt, %302, %331 : vector<16x128xf32>
    %cst_139 = arith.constant 0.000000e+00 : f32
    %333 = vector.broadcast %cst_139 : f32 to vector<16x128xf32>
    %334 = arith.subf %333, %330 : vector<16x128xf32>
    %335 = arith.select %332, %334, %330 : vector<16x128xi1>, vector<16x128xf32>
    %cst_140 = arith.constant 1.000000e+00 : f32
    %336 = vector.broadcast %cst_140 : f32 to vector<16x128xf32>
    %337 = arith.addf %336, %335 : vector<16x128xf32>
    %338 = arith.mulf %300, %337 : vector<16x128xf32>
    %cst_141 = arith.constant dense<0.000000e+00> : vector<16x32xf32>
    %339 = tpu.matmul %338, %219, %cst_141 {dimension_numbers = #tpu.dot_dimension_numbers<[1], [0], [0], [1], [0, 0, 1, 1], [], []>} : vector<16x128xf32>, vector<128x32xf32>, vector<16x32xf32> -> vector<16x32xf32>
    %340 = vector.broadcast %211 : vector<1x32xf32> to vector<16x32xf32>
    %341 = arith.addf %339, %340 : vector<16x32xf32>
    %342 = arith.addf %295, %341 : vector<16x32xf32>
    %cst_142 = arith.constant dense<0.000000e+00> : vector<16xf32>
    %343 = vector.multi_reduction <add>, %342, %cst_142 [1] : vector<16x32xf32> to vector<16xf32>
    %344 = vector.shape_cast %343 : vector<16xf32> to vector<16x1xf32>
    %cst_143 = arith.constant 3.200000e+01 : f32
    %345 = vector.broadcast %cst_143 : f32 to vector<16x1xf32>
    %346 = arith.divf %344, %345 : vector<16x1xf32>
    %347 = vector.broadcast %346 : vector<16x1xf32> to vector<16x32xf32>
    %348 = arith.subf %342, %347 : vector<16x32xf32>
    %349 = arith.mulf %348, %348 : vector<16x32xf32>
    %cst_144 = arith.constant dense<0.000000e+00> : vector<16xf32>
    %350 = vector.multi_reduction <add>, %349, %cst_144 [1] : vector<16x32xf32> to vector<16xf32>
    %351 = vector.shape_cast %350 : vector<16xf32> to vector<16x1xf32>
    %cst_145 = arith.constant 3.200000e+01 : f32
    %352 = vector.broadcast %cst_145 : f32 to vector<16x1xf32>
    %353 = arith.divf %351, %352 : vector<16x1xf32>
    %354 = vector.broadcast %346 : vector<16x1xf32> to vector<16x32xf32>
    %355 = arith.subf %342, %354 : vector<16x32xf32>
    %cst_146 = arith.constant 9.99999996E-13 : f32
    %356 = vector.broadcast %cst_146 : f32 to vector<16x1xf32>
    %357 = arith.addf %353, %356 : vector<16x1xf32>
    %358 = math.rsqrt %357 : vector<16x1xf32>
    %359 = vector.broadcast %358 : vector<16x1xf32> to vector<16x32xf32>
    %360 = arith.mulf %355, %359 : vector<16x32xf32>
    %361 = vector.broadcast %212 : vector<1x32xf32> to vector<16x32xf32>
    %362 = arith.mulf %360, %361 : vector<16x32xf32>
    %363 = vector.broadcast %213 : vector<1x32xf32> to vector<16x32xf32>
    %364 = arith.addf %362, %363 : vector<16x32xf32>
    %c0_147 = arith.constant 0 : index
    %c0_148 = arith.constant 0 : index
    %365 = vector.load %arg11[%c0_147, %c0_148] : memref<32x2xf32, #tpu.memory_space<vmem>>, vector<32x2xf32>
    %cst_149 = arith.constant dense<0.000000e+00> : vector<16x2xf32>
    %366 = tpu.matmul %364, %365, %cst_149 {dimension_numbers = #tpu.dot_dimension_numbers<[1], [0], [0], [1], [0, 0, 1, 1], [], []>} : vector<16x32xf32>, vector<32x2xf32>, vector<16x2xf32> -> vector<16x2xf32>
    %c0_150 = arith.constant 0 : index
    %c0_151 = arith.constant 0 : index
    %367 = vector.load %arg12[%c0_150, %c0_151] : memref<1x2xf32, #tpu.memory_space<vmem>>, vector<1x2xf32>
    %368 = vector.broadcast %367 : vector<1x2xf32> to vector<16x2xf32>
    %369 = arith.addf %366, %368 : vector<16x2xf32>
    %370 = vector.shape_cast %369 : vector<16x2xf32> to vector<2x8x2xf32>
    %c0_152 = arith.constant 0 : index
    %c0_153 = arith.constant 0 : index
    %c0_154 = arith.constant 0 : index
    %371 = vector.load %arg13[%c0_152, %c0_153, %c0_154] : memref<2x8x2xf32, #tpu.memory_space<vmem>>, vector<2x8x2xf32>
    tpu.vector_store %arg13[%c0_152, %c0_153, %c0_154], %370 {strides = array<i32>} : memref<2x8x2xf32, #tpu.memory_space<vmem>>, vector<2x8x2xf32>,
    return
  }
}

</mosaic_0001>

<bundles_post_ra>
// kernel: one_to_many_forward.1
= control target key start
LH: loop header
LB: loop body
LE: loop exit
PB: predicated region body
PF: predicated region fallthrough
CT: control target
= control target key end

     0   :  { %vm81_vm0 = vcmask 1043456   ;;  %v3639_v0 = vmov 0   ;;  %v46_v15 = vlaneseq  ;;  %vm74_vm1 = vcmask 818176   ;;  %s5228_s0 = inlined_call_operand.vmem [shape: s32[16,1], index: 0, kind: input, shape index: {}]   ;;  %s5229_s1 = inlined_call_operand.vmem [shape: f32[100,32], index: 1, kind: input, shape index: {}]   ;;  %s5230_s2 = inlined_call_operand.vmem [shape: f32[8,32], index: 2, kind: input, shape index: {}]   ;;  %s5231_s3 = inlined_call_operand.vmem [shape: f32[2,32], index: 3, kind: input, shape index: {}]   ;;  %s5232_s4 = inlined_call_operand.vmem [shape: f32[2,12,32,8], index: 4, kind: input, shape index: {}]   ;;  %s5233_s5 = inlined_call_operand.vmem [shape: f32[2,12,1,8], index: 5, kind: input, shape index: {}]   ;;  %s5234_s6 = inlined_call_operand.vmem [shape: f32[2,4,8,32], index: 6, kind: input, shape index: {}]   ;;  %s5235_s7 = inlined_call_operand.vmem [shape: f32[2,6,32], index: 7, kind: input, shape index: {}]   ;;  %s5236_s8 = inlined_call_operand.vmem [shape: f32[2,32,128], index: 8, kind: input, shape index: {}]   ;;  %s5237_s9 = inlined_call_operand.vmem [shape: f32[2,1,128], index: 9, kind: input, shape index: {}]   ;;  %s5238_s10 = inlined_call_operand.vmem [shape: f32[2,128,32], index: 10, kind: input, shape index: {}]   ;;  %s5239_s11 = inlined_call_operand.vmem [shape: f32[32,2], index: 11, kind: input, shape index: {}]   ;;  %s5240_s12 = inlined_call_operand.vmem [shape: f32[1,2], index: 12, kind: input, shape index: {}]   ;;  %s5241_s13 = inlined_call_operand.vmem [shape: f32[2,8,2], index: 13, kind: output, shape index: {}]  }
   0x1   :  { %3506 = vset.pattern.permute.xlu0 %v3639_v0  ;;  %v44_v1 = vld [vmem:[%s5228_s0] sm:$0xff]  ;;  %v71_v3 = vld [vmem:[%s5229_s1 + $0x58] sm:$0xff]  ;;  %3507 = vset.pattern.permute.xlu1 %v3639_v0  ;;  %v70_v4 = vld [vmem:[%s5229_s1 + $0x50] sm:$0xff]  ;;  %v3640_v18 = vmov 0.0   ;;  %vm110_vm3 = vcmask 261120   ;;  %v3641_v24 = vmov 32.0  }
   0x2   :  { %v72_v2 = vld [vmem:[%s5229_s1 + $0x60] sm:$0xf]  ;;  %49 = vperm.xlu0 %3506, %v44_v1   ;;  %v69_v5 = vld [vmem:[%s5229_s1 + $0x48] sm:$0xff]  ;;  %v67_v7 = vld [vmem:[%s5229_s1 + $0x38] sm:$0xff]  ;;  %v3754_v16 = vand.u32 127, %v46_v15  ;;  %3537 = vrcp.f32 %v3641_v24  ;;  %vm533_vm9 = vcmask 64512  }
   0x3   :  { %3296 = vmatpush.msk.msra.mxu0 %vm81_vm0, %v72_v2  ;;  %v68_v6 = vld [vmem:[%s5229_s1 + $0x40] sm:$0xff]  ;;  %v66_v8 = vld [vmem:[%s5229_s1 + $0x30] sm:$0xff]  ;;  %v65_v9 = vld [vmem:[%s5229_s1 + $0x28] sm:$0xff] }
   0x4   :  { %v64_v10 = vld [vmem:[%s5229_s1 + $0x20] sm:$0xff]  ;;  %v63_v11 = vld [vmem:[%s5229_s1 + $0x18] sm:$0xff]  ;;  %v62_v12 = vld [vmem:[%s5229_s1 + $0x10] sm:$0xff] }
   0x5   :  { %89 = vmatpush.msra.mxu0 %v71_v3  ;;  %v61_v13 = vld [vmem:[%s5229_s1 + $0x8] sm:$0xff]  ;;  %v60_v14 = vld [vmem:[%s5229_s1] sm:$0xff]  ;;  %v3780_v37 = vld [vmem:[%s5232_s4 + $0x38] sm:$0xff] }
   0x6   :  { %v3762_v20 = vld [vmem:[%s5230_s2] sm:$0xff]  ;;  %v45_v36 = vld [vmem:[%s5228_s0 + $0x8] sm:$0xff]  ;;  %v3785_v38 = vld [vmem:[%s5232_s4 + $0x58] sm:$0xff]  ;;  %325 = vmatpush.msra.mxu2 %v3780_v37 }
   0x7   :  { %90 = vmatpush.msra.mxu0 %v70_v4  ;;  %v3790_v39 = vld [vmem:[%s5232_s4 + $0x78] sm:$0xff]  ;;  %345 = vmatpush.msra.mxu3 %v3785_v38  ;;  %v3798_v40 = vld [vmem:[%s5232_s4 + $0x30] sm:$0xff]  ;;  %v3816_v43 = vld [vmem:[%s5232_s4 + $0x28] sm:$0xff] }
   0x8   :  { %v3538_v25 = vpop.eup %3537  ;;  %365 = vmatpush.msra.mxu1 %v3790_v39  ;;  %v3803_v41 = vld [vmem:[%s5232_s4 + $0x50] sm:$0xff]  ;;  %326 = vmatpush.msra.mxu2 %v3798_v40  ;;  %v3821_v44 = vld [vmem:[%s5232_s4 + $0x48] sm:$0xff]  ;;  %v3834_v46 = vld [vmem:[%s5232_s4 + $0x18] sm:$0xff] }
   0x9   :  { %91 = vmatpush.msra.mxu0 %v69_v5  ;;  %v118_v26 = vmul.f32 32.0, %v3538_v25  ;;  %vm122_vm4 = vweird.f32 %v3538_v25  ;;  %v3808_v42 = vld [vmem:[%s5232_s4 + $0x70] sm:$0xff]  ;;  %346 = vmatpush.msra.mxu3 %v3803_v41  ;;  %v3826_v45 = vld [vmem:[%s5232_s4 + $0x68] sm:$0xff]  ;;  %v3839_v47 = vld [vmem:[%s5232_s4 + $0x20] sm:$0xff] }
   0xa   :  { %366 = vmatpush.msra.mxu1 %v3808_v42  ;;  %327 = vmatpush.msra.mxu2 %v3816_v43  ;;  %v3844_v48 = vld [vmem:[%s5232_s4 + $0x40] sm:$0xff]  ;;  %v3858_v50 = vld [vmem:[%s5232_s4 + $0x10] sm:$0xff]  ;;  %v3863_v51 = vld [vmem:[%s5232_s4 + $0x98] sm:$0xff] }
   0xb   :  { %92 = vmatpush.msra.mxu0 %v68_v6  ;;  %v119_v27 = vsub.f32 1.0, %v118_v26  ;;  %347 = vmatpush.msra.mxu3 %v3821_v44  ;;  %v3851_v49 = vld [vmem:[%s5232_s4 + $0x60] sm:$0xff]  ;;  %v3868_v52 = vld [vmem:[%s5232_s4 + $0xb8] sm:$0xff]  ;;  %v3880_v54 = vld [vmem:[%s5232_s4 + $0x8] sm:$0xff] }
   0xc   :  { %367 = vmatpush.msra.mxu1 %v3826_v45  ;;  %328 = vmatpush.msra.mxu2 %v3839_v47  ;;  %v3875_v53 = vld [vmem:[%s5232_s4 + $0xd8] sm:$0xff]  ;;  %v3885_v55 = vld [vmem:[%s5232_s4 + $0x90] sm:$0xff]  ;;  %v3902_v59 = vld [vmem:[%s5232_s4] sm:$0xff] }
   0xd   :  { %93 = vmatpush.msra.mxu0 %v67_v7  ;;  %v120_v28 = vmul.f32 %v3538_v25, %v119_v27  ;;  %348 = vmatpush.msra.mxu3 %v3844_v48  ;;  %v3892_v57 = vld [vmem:[%s5232_s4 + $0xb0] sm:$0xff]  ;;  %v3910_v61 = vld [vmem:[%s5232_s4 + $0x88] sm:$0xff]  ;;  %v3929_v1 = vld [vmem:[%s5232_s4 + $0x80] sm:$0xff] }
   0xe   :  { %368 = vmatpush.msra.mxu1 %v3851_v49  ;;  %385 = vmatpush.msrb.mxu2 %v3863_v51  ;;  %v3897_v58 = vld [vmem:[%s5232_s4 + $0xd0] sm:$0xff]  ;;  %v3915_v62 = vld [vmem:[%s5232_s4 + $0xa8] sm:$0xff]  ;;  %v3934_v2 = vld [vmem:[%s5232_s4 + $0xa0] sm:$0xff] }
   0xf   :  { %94 = vmatpush.msra.mxu0 %v66_v8  ;;  %v121_v29 = vadd.f32 %v3538_v25, %v120_v28  ;;  %405 = vmatpush.msrb.mxu3 %v3868_v52  ;;  %v3920_v63 = vld [vmem:[%s5232_s4 + $0xc8] sm:$0xff]  ;;  %v3939_v3 = vld [vmem:[%s5232_s4 + $0xc0] sm:$0xff]  ;;  %v3992_v24 = vld [vmem:[%s5232_s4 + $0x130] sm:$0xff] }
  0x10   :  { %425 = vmatpush.msrb.mxu1 %v3875_v53  ;;  %386 = vmatpush.msrb.mxu2 %v3885_v55  ;;  %v4009_v26 = vld [vmem:[%s5232_s4 + $0x108] sm:$0xff]  ;;  %v4021_v28 = vld [vmem:[%s5232_s4 + $0xe0] sm:$0xff] }
  0x11   :  { %95 = vmatpush.msra.mxu0 %v65_v9  ;;  %v3766_v30 = vsel %vm122_vm4, %v3538_v25, %v121_v29  ;;  %406 = vmatpush.msrb.mxu3 %v3892_v57  ;;  %v4001_v25 = vld [vmem:[%s5232_s4 + $0xe8] sm:$0xff]  ;;  %5285 = vst [vmem:[#allocation3_spill] sm:$0xff] %v4021_v28  ;;  %v4033_v29 = vld [vmem:[%s5232_s4 + $0x100] sm:$0xff] }
  0x12   :  { %426 = vmatpush.msrb.mxu1 %v3897_v58  ;;  %387 = vmatpush.msrb.mxu2 %v3910_v61  ;;  %v4016_v27 = vld [vmem:[%s5232_s4 + $0x128] sm:$0xff]  ;;  %5286 = vst [vmem:[#allocation4_spill] sm:$0xff] %v4033_v29 }
  0x13   :  { %96 = vmatpush.msra.mxu0 %v64_v10  ;;  %407 = vmatpush.msrb.mxu3 %v3915_v62  ;;  %v3949_v10 = vld [vmem:[%s5231_s3] ss:$0 sm:$0xff] }
  0x14   :  { %427 = vmatpush.msrb.mxu1 %v3920_v63  ;;  %388 = vmatpush.msrb.mxu2 %v3929_v1 }
  0x15   :  { %97 = vmatpush.msra.mxu0 %v63_v11  ;;  %408 = vmatpush.msrb.mxu3 %v3934_v2 }
  0x16   :  { %428 = vmatpush.msrb.mxu1 %v3939_v3 }
  0x17   :  { %98 = vmatpush.msra.mxu0 %v62_v12  ;;  %v3954_v12 = vld [vmem:[%s5231_s3 + $0x1] ss:$0 sm:$0xff] }
  0x19   :  { %99 = vmatpush.msra.mxu0 %v61_v13 }
  0x1b   :  { %100 = vmatpush.msra.mxu0 %v60_v14 }
  0x1d   :  { %305 = vmatpush.msrb.mxu0 %v3834_v46 }
  0x1f   :  { %306 = vmatpush.msrb.mxu0 %v3858_v50 }
  0x21   :  { %307 = vmatpush.msrb.mxu0 %v3880_v54 }
  0x23   :  { %308 = vmatpush.msrb.mxu0 %v3902_v59 }
  0x74   :  { %v50_v17 = vpop.permute.xlu0 %49 }
  0x75   :  { %vm54_vm2 = vcmp.eq.s32.totalorder %v3754_v16, %v50_v17  ;;  %v3962_v17 = vld [vmem:[%s5232_s4 + $0xf8] sm:$0xff] }
  0x76   :  { %v3294_v19 = vsel %vm54_vm2, 1.0, %v3640_v18 }
  0x77   :  { %3297 = vmatmul.msk.f32.vlgmr.msra.gmra.mxu0 %vm74_vm1, %v3294_v19 }
  0xf4   :  { %v102_v21 = vpop.f32.mrf.mxu0 }
  0xf5   :  { %v103_v22 = vadd.f32 %v102_v21, %v3762_v20  ;;  %v3968_v21 = vld [vmem:[%s5232_s4 + $0x118] sm:$0xff] }
  0xf7   :  { %v111_v23 = vsel %vm110_vm3, %v103_v22, 0.0 }
  0xf8   :  { %112 = vadd.xlane.f32.xlu0 %v111_v23 }
 0x16b   :  { %v113_v31 = vpop.xlane.xlu0 %112 }
 0x16c   :  { %v124_v32 = vmul.f32 %v3766_v30, %v113_v31  ;;  %v4040_v31 = vld [vmem:[%s5232_s4 + $0x120] sm:$0xff] }
 0x16d   :  { %5287 = vst [vmem:[#allocation5_spill] sm:$0xff] %v4040_v31 }
 0x16e   :  { %v3769_v33 = vsub.f32 %v103_v22, %v124_v32  ;;  %v3973_v22 = vld [vmem:[%s5232_s4 + $0x138] sm:$0xff] }
 0x16f   :  { %v4045_v32 = vld [vmem:[%s5232_s4 + $0x158] sm:$0xff] }
 0x170   :  { %v128_v34 = vmul.f32 %v3769_v33, %v3769_v33 }
 0x172   :  { %v130_v35 = vsel %vm110_vm3, %v128_v34, 0.0  ;;  %v4062_v34 = vld [vmem:[%s5232_s4 + $0x150] sm:$0xff] }
 0x173   :  { %131 = vadd.xlane.f32.xlu1 %v130_v35  ;;  %v4069_v35 = vld [vmem:[%s5232_s4 + $0x170] sm:$0xff] }
 0x174   :  { %5289 = vst [vmem:[#allocation7_spill] sm:$0xff] %v4069_v35 }
 0x18c   :  { %52 = vperm.xlu1 %3507, %v45_v36   ;;  %v4075_v36 = vld [vmem:[%s5232_s4 + $0x148] sm:$0xff] }
 0x1e6   :  { %v132_v56 = vpop.xlane.xlu1 %131 }
 0x1e7   :  { %v136_v60 = vmul.f32 %v132_v56, %v3766_v30  ;;  %v4081_v56 = vld [vmem:[%s5232_s4 + $0x168] sm:$0xff] }
 0x1e8   :  { %5290 = vst [vmem:[#allocation8_spill] sm:$0xff] %v4081_v56 }
 0x1e9   :  { %v138_v0 = vadd.f32 1e-12, %v136_v60  ;;  %v4088_v60 = vld [vmem:[%s5232_s4 + $0x140] sm:$0xff] }
 0x1eb   :  { %3539 = vrsqrt.f32 %v138_v0  ;;  %vm146_vm6 = vweird.f32 %v138_v0 }
 0x1f1   :  { %v3540_v4 = vpop.eup %3539 }
 0x1f2   :  { %v141_v5 = vmul.f32 %v3540_v4, %v138_v0  ;;  %vm147_vm5 = vweird.f32 %v3540_v4  ;;  %v4094_v0 = vld [vmem:[%s5232_s4 + $0x160] sm:$0xff] }
 0x1f3   :  { %vm148_vm7 = vmor %vm146_vm6, %vm147_vm5  ;;  %5291 = vst [vmem:[#allocation9_spill] sm:$0xff] %v4094_v0 }
 0x1f4   :  { %v142_v6 = vmul.f32 %v3540_v4, %v141_v5 }
 0x1f6   :  { %v143_v7 = vmul.f32 0.5, %v142_v6 }
 0x1f8   :  { %v144_v8 = vsub.f32 1.5, %v143_v7  ;;  %v4111_v7 = vld [vmem:[%s5233_s5 + $0x6] ss:$0 sm:$0xff] }
 0x1fa   :  { %v145_v9 = vmul.f32 %v3540_v4, %v144_v8 }
 0x1fc   :  { %v149_v11 = vsel %vm148_vm7, %v3540_v4, %v145_v9  ;;  %v4116_v9 = vld [vmem:[%s5233_s5 + $0x2] ss:$0 sm:$0xff] }
 0x1fd   :  { %v160_v13 = vmul.f32 %v149_v11, %v3769_v33  ;;  %v4054_v33 = vld [vmem:[%s5232_s4 + $0x178] sm:$0xff]  ;;  %5292 = vst [vmem:[#allocation10_spill] sm:$0xff] %v4116_v9 }
 0x1fe   :  { %v53_v14 = vpop.permute.xlu1 %52  ;;  %5288 = vst [vmem:[#allocation6_spill] sm:$0xff] %v4054_v33 }
 0x1ff   :  { %v163_v15 = vmul.f32 %v3949_v10, %v160_v13  ;;  %vm55_vm8 = vcmp.eq.s32.totalorder %v3754_v16, %v53_v14  ;;  %v3982_v16 = vld [vmem:[%s5232_s4 + $0xf0] sm:$0xff]  ;;  %v4122_v14 = vld [vmem:[%s5233_s5 + $0x4] ss:$0 sm:$0xff] }
 0x200   :  { %v3295_v19 = vsel %vm55_vm8, 1.0, %v3640_v18  ;;  %v3987_v18 = vld [vmem:[%s5232_s4 + $0x110] sm:$0xff]  ;;  %5293 = vst [vmem:[#allocation11_spill] sm:$0xff] %v4122_v14 }
 0x201   :  { %v3976_v23 = vadd.f32 %v3954_v12, %v163_v15  ;;  %3298 = vmatmul.msk.f32.gmra.mxu0 %vm74_vm1, %v3295_v19  ;;  %v4128_v15 = vld [vmem:[%s5233_s5 + $0x5] ss:$0 sm:$0xff] }
 0x202   :  { %5294 = vst [vmem:[#allocation12_spill] sm:$0xff] %v4128_v15 }
 0x203   :  { %5284 = vst [vmem:[#allocation2_spill] sm:$0xff] %v3976_v23  ;;  %3300 = vmatmul.msk.f32.vlgmr.msra.gmra.mxu2 %vm110_vm3, %v3976_v23  ;;  %3301 = vmatmul.msk.f32.vlgmr.msra.gmra.mxu3 %vm110_vm3, %v3976_v23 }
 0x204   :  { %3302 = vmatmul.msk.f32.vlgmr.msra.gmra.mxu1 %vm110_vm3, %v3976_v23  ;;  %445 = vmatpush.msra.mxu2 %v3962_v17 }
 0x205   :  { %465 = vmatpush.msra.mxu3 %v3968_v21  ;;  %485 = vmatpush.msra.mxu1 %v3973_v22 }
 0x206   :  { %446 = vmatpush.msra.mxu2 %v3982_v16 }
 0x207   :  { %466 = vmatpush.msra.mxu3 %v3987_v18  ;;  %486 = vmatpush.msra.mxu1 %v3992_v24 }
 0x208   :  { %447 = vmatpush.msra.mxu2 %v4001_v25 }
 0x209   :  { %3299 = vmatmul.msk.f32.vlgmr.msrb.gmra.mxu0 %vm110_vm3, %v3976_v23  ;;  %467 = vmatpush.msra.mxu3 %v4009_v26 }
 0x20a   :  { %487 = vmatpush.msra.mxu1 %v4016_v27  ;;  %448 = vmatpush.msra.mxu2 %v4021_v28 }
 0x20b   :  { %3303 = vmatmul.msk.f32.vlgmr.msrb.gmra.mxu2 %vm110_vm3, %v3976_v23  ;;  %3304 = vmatmul.msk.f32.vlgmr.msrb.gmra.mxu3 %vm110_vm3, %v3976_v23 }
 0x20c   :  { %3305 = vmatmul.msk.f32.vlgmr.msrb.gmra.mxu1 %vm110_vm3, %v3976_v23  ;;  %468 = vmatpush.msra.mxu3 %v4033_v29 }
 0x20d   :  { %488 = vmatpush.msra.mxu1 %v4040_v31  ;;  %505 = vmatpush.msrb.mxu2 %v4045_v32 }
 0x20e   :  { %525 = vmatpush.msrb.mxu3 %v4054_v33 }
 0x20f   :  { %506 = vmatpush.msrb.mxu2 %v4062_v34 }
 0x210   :  { %526 = vmatpush.msrb.mxu3 %v4069_v35 }
 0x211   :  { %507 = vmatpush.msrb.mxu2 %v4075_v36 }
 0x212   :  { %527 = vmatpush.msrb.mxu3 %v4081_v56 }
 0x213   :  { %3306 = vmatmul.msk.f32.vlgmr.msra.gmra.mxu2 %vm110_vm3, %v3976_v23  ;;  %3307 = vmatmul.msk.f32.vlgmr.msra.gmra.mxu3 %vm110_vm3, %v3976_v23 }
 0x214   :  { %3308 = vmatmul.msk.f32.vlgmr.msra.gmra.mxu1 %vm110_vm3, %v3976_v23  ;;  %508 = vmatpush.msrb.mxu2 %v4088_v60 }
 0x215   :  { %528 = vmatpush.msrb.mxu3 %v4094_v0  ;;  %v4139_v0 = vld [vmem:[%s5233_s5 + $0x9] ss:$0 sm:$0xff] }
 0x216   :  { %5296 = vst [vmem:[#allocation14_spill] sm:$0xff] %v4139_v0 }
 0x21b   :  { %3309 = vmatmul.msk.f32.vlgmr.msrb.gmra.mxu2 %vm110_vm3, %v3976_v23  ;;  %3310 = vmatmul.msk.f32.vlgmr.msrb.gmra.mxu3 %vm110_vm3, %v3976_v23  ;;  %v4134_v23 = vld [vmem:[%s5233_s5] ss:$0 sm:$0xff] }
 0x21c   :  { %5295 = vst [vmem:[#allocation13_spill] sm:$0xff] %v4134_v23 }
 0x27e   :  { %v105_v5 = vpop.f32.mrf.mxu0 }
 0x281   :  { %v370_v4 = vpop.f32.mrf.mxu1 }
 0x286   :  { %v330_v6 = vpop.f32.mrf.mxu2  ;;  %v350_v8 = vpop.f32.mrf.mxu3 }
 0x287   :  { %v351_v19 = vadd.f32 %v4116_v9, %v350_v8  ;;  %v310_v56 = vpop.f32.mrf.mxu0 }
 0x288   :  { %v311_v28 = vadd.f32 %v4134_v23, %v310_v56 }
 0x289   :  { %v430_v11 = vpop.f32.mrf.mxu1 }
 0x28a   :  { %v431_v13 = vadd.f32 %v4111_v7, %v430_v11 }
 0x28c   :  { %3315 = vmatpush.xpose.msk.msra.mxu3 %vm533_vm9, %v431_v13  ;;  %v4144_v13 = vld [vmem:[%s5233_s5 + $0x1] ss:$0 sm:$0xff] }
 0x28d   :  { %5297 = vst [vmem:[#allocation15_spill] sm:$0xff] %v4144_v13  ;;  %v331_v9 = vadd.f32 %v4144_v13, %v330_v6 }
 0x28e   :  { %v390_v11 = vpop.f32.mrf.mxu2  ;;  %v410_v8 = vpop.f32.mrf.mxu3 }
 0x28f   :  { %v391_v35 = vadd.f32 %v4122_v14, %v390_v11  ;;  %3316 = vmatmul.msk.f32.vlgmr.msra.gmra.mxu3 %vm533_vm9, %v351_v19  ;;  %v411_v33 = vadd.f32 %v4128_v15, %v410_v8  ;;  %v4157_v11 = vld [vmem:[%s5233_s5 + $0x7] ss:$0 sm:$0xff]  ;;  %v4184_v19 = vld [vmem:[%s5233_s5 + $0xb] ss:$0 sm:$0xff] }
 0x290   :  { %5298 = vst [vmem:[#allocation16_spill] sm:$0xff] %v4157_v11 }
 0x291   :  { %v490_v29 = vpop.f32.mrf.mxu1  ;;  %3311 = vmatpush.xpose.msk.msrb.mxu1 %vm533_vm9, %v391_v35  ;;  %3313 = vmatpush.xpose.msk.msra.mxu2 %vm533_vm9, %v411_v33  ;;  %v4163_v35 = vld [vmem:[%s5233_s5 + $0x8] ss:$0 sm:$0xff]  ;;  %5302 = vst [vmem:[#allocation20_spill] sm:$0xff] %v4184_v19 }
 0x292   :  { %v491_v31 = vadd.f32 %v4139_v0, %v490_v29  ;;  %5299 = vst [vmem:[#allocation17_spill] sm:$0xff] %v4163_v35  ;;  %v4169_v29 = vld [vmem:[%s5233_s5 + $0x3] ss:$0 sm:$0xff] }
 0x293   :  { %5300 = vst [vmem:[#allocation18_spill] sm:$0xff] %v4169_v29 }
 0x294   :  { %3312 = vmatmul.msk.f32.vlgmr.msrb.gmra.mxu1 %vm533_vm9, %v311_v28  ;;  %3314 = vmatmul.msk.f32.vlgmr.msra.gmra.mxu2 %vm533_vm9, %v331_v9  ;;  %v371_v28 = vadd.f32 %v4169_v29, %v370_v4  ;;  %v4178_v9 = vld [vmem:[%s5233_s5 + $0xa] ss:$0 sm:$0xff] }
 0x295   :  { %727 = vmatpush.msrb.mxu2 %v491_v31  ;;  %5301 = vst [vmem:[#allocation19_spill] sm:$0xff] %v4178_v9 }
 0x296   :  { %v450_v33 = vpop.f32.mrf.mxu2  ;;  %v470_v6 = vpop.f32.mrf.mxu3 }
 0x297   :  { %v451_v56 = vadd.f32 %v4157_v11, %v450_v33  ;;  %v471_v31 = vadd.f32 %v4163_v35, %v470_v6 }
 0x299   :  { %3317 = vmatpush.xpose.msk.msra.mxu0 %vm533_vm9, %v451_v56  ;;  %704 = vmatpush.msra.mxu1 %v471_v31 }
 0x29c   :  { %3318 = vmatmul.msk.f32.vlgmr.msra.gmra.mxu0 %vm533_vm9, %v371_v28 }
 0x29e   :  { %v510_v8 = vpop.f32.mrf.mxu2  ;;  %v530_v6 = vpop.f32.mrf.mxu3 }
 0x29f   :  { %v511_v33 = vadd.f32 %v4178_v9, %v510_v8  ;;  %v531_v56 = vadd.f32 %v4184_v19, %v530_v6  ;;  %v106_v8 = vadd.f32 %v105_v5, %v3762_v20 }
 0x2a1   :  { %750 = vmatpush.msrb.mxu3 %v511_v33  ;;  %773 = vmatpush.msrb.mxu0 %v531_v56  ;;  %v114_v15 = vsel %vm110_vm3, %v106_v8, 0.0 }
 0x312   :  { %v609_v4 = vpop.f32.mrf.mxu3 }
 0x313   :  { %v640_v31 = vmul.f32 0.35355338, %v609_v4  ;;  %v557_v4 = vpop.f32.mrf.mxu1 }
 0x315   :  { %v648_v0 = vsel %vm533_vm9, %v640_v31, -inf }
 0x316   :  { %649 = vmax.xlane.f32.xlu2 %v648_v0  ;;  %v638_v0 = vmul.f32 0.35355338, %v557_v4 }
 0x317   :  { %v583_v6 = vpop.f32.mrf.mxu2 }
 0x318   :  { %v639_v33 = vmul.f32 0.35355338, %v583_v6 }
 0x31a   :  { %v645_v56 = vsel %vm533_vm9, %v639_v33, -inf }
 0x389   :  { %v650_v29 = vpop.xlane.xlu2 %649 }
 0x38a   :  { %v656_v28 = vsub.f32 %v640_v31, %v650_v29  ;;  %v642_v29 = vsel %vm533_vm9, %v638_v0, -inf  ;;  %v635_v31 = vpop.f32.mrf.mxu0 }
 0x38c   :  { %v662_v35 = vmul.f32 1.442695, %v656_v28 }
 0x38e   :  { %3541 = vpow2.f32 %v662_v35  ;;  %v641_v35 = vmul.f32 0.35355338, %v635_v31 }
 0x390   :  { %v651_v28 = vsel %vm533_vm9, %v641_v35, -inf }
 0x394   :  { %v3542_v11 = vpop.eup %3541 }
 0x395   :  { %v672_v13 = vsel %vm533_vm9, %v3542_v11, 0.0 }
 0x396   :  { %673 = vadd.xlane.f32.xlu2 %v672_v13 }
 0x39e   :  { %115 = vadd.xlane.f32.xlu2 %v114_v15 }
 0x3a6   :  { %646 = vmax.xlane.f32.xlu2 %v645_v56 }
 0x3ae   :  { %643 = vmax.xlane.f32.xlu2 %v642_v29 }
 0x3b6   :  { %652 = vmax.xlane.f32.xlu2 %v651_v28 }
 0x409   :  { %v674_v13 = vpop.xlane.xlu2 %673 }
 0x40a   :  { %3543 = vrcp.f32 %v674_v13 }
 0x410   :  { %v3544_v20 = vpop.eup %3543 }
 0x411   :  { %v684_v5 = vmul.f32 %v3544_v20, %v3542_v11  ;;  %v116_v19 = vpop.xlane.xlu2 %115 }
 0x412   :  { %v125_v15 = vmul.f32 %v3766_v30, %v116_v19 }
 0x413   :  { %3321 = vmatmul.msk.f32.vlgmr.msrb.gmra.mxu3 %vm533_vm9, %v684_v5 }
 0x414   :  { %v127_v6 = vsub.f32 %v106_v8, %v125_v15 }
 0x416   :  { %v129_v56 = vmul.f32 %v127_v6, %v127_v6 }
 0x418   :  { %v133_v4 = vsel %vm110_vm3, %v129_v56, 0.0 }
 0x419   :  { %134 = vadd.xlane.f32.xlu1 %v133_v4  ;;  %v647_v23 = vpop.xlane.xlu2 %646 }
 0x41a   :  { %v655_v29 = vsub.f32 %v639_v33, %v647_v23 }
 0x41c   :  { %v660_v31 = vmul.f32 1.442695, %v655_v29 }
 0x41e   :  { %3545 = vpow2.f32 %v660_v31 }
 0x421   :  { %v644_v14 = vpop.xlane.xlu2 %643 }
 0x422   :  { %v654_v28 = vsub.f32 %v638_v0, %v644_v14  ;;  %v4204_v14 = vld [vmem:[%s5234_s6 + $0x10] sm:$0xff] }
 0x423   :  { %842 = vmatpush.msra.mxu3 %v4204_v14 }
 0x424   :  { %v3546_v9 = vpop.eup %3545  ;;  %v658_v13 = vmul.f32 1.442695, %v654_v28 }
 0x425   :  { %v669_v11 = vsel %vm533_vm9, %v3546_v9, 0.0  ;;  %932 = vmatpush.msrb.mxu3 %v3785_v38 }
 0x426   :  { %3547 = vpow2.f32 %v658_v13  ;;  %670 = vadd.xlane.f32.xlu2 %v669_v11 }
 0x427   :  { %933 = vmatpush.msrb.mxu3 %v3803_v41 }
 0x429   :  { %v653_v19 = vpop.xlane.xlu2 %652  ;;  %934 = vmatpush.msrb.mxu3 %v3821_v44 }
 0x42a   :  { %v657_v20 = vsub.f32 %v641_v35, %v653_v19 }
 0x42b   :  { %935 = vmatpush.msrb.mxu3 %v3844_v48 }
 0x42c   :  { %v3548_v5 = vpop.eup %3547  ;;  %v664_v8 = vmul.f32 1.442695, %v657_v20 }
 0x42d   :  { %v666_v15 = vsel %vm533_vm9, %v3548_v5, 0.0 }
 0x42e   :  { %3549 = vpow2.f32 %v664_v8  ;;  %667 = vadd.xlane.f32.xlu0 %v666_v15 }
 0x434   :  { %v3550_v56 = vpop.eup %3549 }
 0x435   :  { %v675_v23 = vsel %vm533_vm9, %v3550_v56, 0.0 }
 0x436   :  { %676 = vadd.xlane.f32.xlu2 %v675_v23  ;;  %v5313_v23 = vld [vmem:[#allocation13_spill] sm:$0xff] }
 0x48c   :  { %v135_v33 = vpop.xlane.xlu1 %134 }
 0x48d   :  { %v137_v0 = vmul.f32 %v135_v33, %v3766_v30 }
 0x48f   :  { %v139_v35 = vadd.f32 1e-12, %v137_v0  ;;  %v5314_v0 = vld [vmem:[#allocation12_spill] sm:$0xff] }
 0x491   :  { %3551 = vrsqrt.f32 %v139_v35  ;;  %vm156_vm11 = vweird.f32 %v139_v35 }
 0x496   :  { %v752_v4 = vpop.f32.mrf.mxu3 }
 0x497   :  { %v3552_v29 = vpop.eup %3551  ;;  %3325 = vmatmul.msk.f32.vlgmr.msra.gmra.mxu3 %vm533_vm9, %v752_v4 }
 0x498   :  { %v151_v31 = vmul.f32 %v3552_v29, %v139_v35  ;;  %1012 = vmatpush.msra.mxu3 %v3875_v53  ;;  %vm157_vm10 = vweird.f32 %v3552_v29 }
 0x499   :  { %v671_v28 = vpop.xlane.xlu2 %670  ;;  %vm158_vm12 = vmor %vm156_vm11, %vm157_vm10 }
 0x49a   :  { %v152_v38 = vmul.f32 %v3552_v29, %v151_v31  ;;  %3553 = vrcp.f32 %v671_v28  ;;  %1013 = vmatpush.msra.mxu3 %v3897_v58  ;;  %v5315_v28 = vld [vmem:[#allocation15_spill] sm:$0xff] }
 0x49c   :  { %v153_v41 = vmul.f32 0.5, %v152_v38  ;;  %1014 = vmatpush.msra.mxu3 %v3920_v63 }
 0x49e   :  { %v154_v44 = vsub.f32 1.5, %v153_v41  ;;  %1015 = vmatpush.msra.mxu3 %v3939_v3 }
 0x4a0   :  { %v3554_v48 = vpop.eup %3553  ;;  %v155_v13 = vmul.f32 %v3552_v29, %v154_v44 }
 0x4a1   :  { %v683_v11 = vmul.f32 %v3554_v48, %v3546_v9  ;;  %v668_v19 = vpop.xlane.xlu0 %667 }
 0x4a2   :  { %v159_v20 = vsel %vm158_vm12, %v3552_v29, %v155_v13  ;;  %3555 = vrcp.f32 %v668_v19  ;;  %v5316_v13 = vld [vmem:[#allocation16_spill] sm:$0xff]  ;;  %v5317_v19 = vld [vmem:[#allocation17_spill] sm:$0xff] }
 0x4a3   :  { %v161_v53 = vmul.f32 %v159_v20, %v127_v6  ;;  %3320 = vmatmul.msk.f32.vlgmr.msrb.gmra.mxu2 %vm533_vm9, %v683_v11 }
 0x4a5   :  { %v164_v58 = vmul.f32 %v3949_v10, %v161_v53 }
 0x4a7   :  { %v4220_v8 = vadd.f32 %v3954_v12, %v164_v58  ;;  %v4237_v12 = vld [vmem:[%s5234_s6 + $0x8] sm:$0xff] }
 0x4a8   :  { %v3556_v63 = vpop.eup %3555  ;;  %819 = vmatpush.msra.mxu2 %v4237_v12 }
 0x4a9   :  { %v682_v15 = vmul.f32 %v3556_v63, %v3548_v5  ;;  %3329 = vmatmul.msk.f32.vlgmr.msrb.gmra.mxu3 %vm110_vm3, %v4220_v8  ;;  %v677_v3 = vpop.xlane.xlu2 %676  ;;  %v4322_v5 = vld [vmem:[%s5235_s7] sm:$0x3f] }
 0x4aa   :  { %3557 = vrcp.f32 %v677_v3  ;;  %1092 = vmatpush.msrb.mxu3 %v4045_v32  ;;  %v4243_v32 = vld [vmem:[%s5234_s6] sm:$0xff]  ;;  %912 = vmatpush.msrb.mxu2 %v3780_v37  ;;  %v1463_v29 = vperm.slane %v4322_v5, 0 }
 0x4ab   :  { %3319 = vmatmul.msk.f32.vlgmr.msra.gmra.mxu1 %vm533_vm9, %v682_v15  ;;  %v5318_v63 = vld [vmem:[#allocation18_spill] sm:$0xff] }
 0x4ac   :  { %1093 = vmatpush.msrb.mxu3 %v4062_v34  ;;  %796 = vmatpush.msrb.mxu1 %v4243_v32  ;;  %v4256_v34 = vld [vmem:[%s5234_s6 + $0x18] sm:$0xff] }
 0x4ad   :  { %913 = vmatpush.msrb.mxu2 %v3798_v40  ;;  %865 = vmatpush.msra.mxu0 %v4256_v34 }
 0x4ae   :  { %1094 = vmatpush.msrb.mxu3 %v4075_v36  ;;  %892 = vmatpush.msra.mxu1 %v3834_v46 }
 0x4af   :  { %914 = vmatpush.msrb.mxu2 %v3816_v43 }
 0x4b0   :  { %v3558_v9 = vpop.eup %3557  ;;  %1095 = vmatpush.msrb.mxu3 %v4088_v60  ;;  %893 = vmatpush.msra.mxu1 %v3858_v50  ;;  %v5304_v50 = vld [vmem:[#allocation5_spill] sm:$0xff]  ;;  %v5312_v60 = vld [vmem:[#allocation11_spill] sm:$0xff] }
 0x4b1   :  { %v685_v10 = vmul.f32 %v3558_v9, %v3550_v56  ;;  %3333 = vmatmul.msk.f32.vlgmr.msra.gmra.mxu3 %vm110_vm3, %v4220_v8  ;;  %915 = vmatpush.msrb.mxu2 %v3839_v47  ;;  %v5303_v47 = vld [vmem:[#allocation10_spill] sm:$0xff] }
 0x4b2   :  { %894 = vmatpush.msra.mxu1 %v3880_v54  ;;  %v5307_v54 = vld [vmem:[#allocation6_spill] sm:$0xff] }
 0x4b3   :  { %3322 = vmatmul.msk.f32.vlgmr.msrb.gmra.mxu0 %vm533_vm9, %v685_v10  ;;  %v5319_v9 = vld [vmem:[#allocation14_spill] sm:$0xff] }
 0x4b4   :  { %895 = vmatpush.msra.mxu1 %v3902_v59  ;;  %952 = vmatpush.msrb.mxu0 %v3790_v39 }
 0x4b6   :  { %953 = vmatpush.msrb.mxu0 %v3808_v42 }
 0x4b8   :  { %954 = vmatpush.msrb.mxu0 %v3826_v45 }
 0x4b9   :  { %3337 = vmatmul.msk.f32.vlgmr.msrb.gmra.mxu3 %vm110_vm3, %v4220_v8 }
 0x4ba   :  { %955 = vmatpush.msrb.mxu0 %v3851_v49 }
 0x51a   :  { %v844_v37 = vpop.f32.mrf.mxu3 }
 0x51b   :  { %v873_v36 = vsel %vm110_vm3, %v844_v37, 0.0  ;;  %v5320_v37 = vld [vmem:[#allocation2_spill] sm:$0xff] }
 0x526   :  { %v729_v40 = vpop.f32.mrf.mxu2 }
 0x527   :  { %3324 = vmatmul.msk.f32.vlgmr.msra.gmra.mxu2 %vm533_vm9, %v729_v40 }
 0x528   :  { %v706_v43 = vpop.f32.mrf.mxu1  ;;  %992 = vmatpush.msra.mxu2 %v3868_v52  ;;  %v5306_v52 = vld [vmem:[#allocation4_spill] sm:$0xff] }
 0x529   :  { %3323 = vmatmul.msk.f32.vlgmr.msrb.gmra.mxu1 %vm533_vm9, %v706_v43 }
 0x52a   :  { %972 = vmatpush.msrb.mxu1 %v3863_v51  ;;  %993 = vmatpush.msra.mxu2 %v3892_v57  ;;  %v5305_v51 = vld [vmem:[#allocation3_spill] sm:$0xff] }
 0x52b   :  { %v5308_v57 = vld [vmem:[#allocation19_spill] sm:$0xff] }
 0x52c   :  { %v937_v39 = vpop.f32.mrf.mxu3  ;;  %973 = vmatpush.msrb.mxu1 %v3885_v55  ;;  %994 = vmatpush.msra.mxu2 %v3915_v62  ;;  %v5310_v62 = vld [vmem:[#allocation8_spill] sm:$0xff] }
 0x52d   :  { %v938_v49 = vadd.f32 %v5303_v47, %v937_v39  ;;  %v5321_v39 = vld [vmem:[#allocation20_spill] sm:$0xff] }
 0x52e   :  { %974 = vmatpush.msrb.mxu1 %v3910_v61  ;;  %995 = vmatpush.msra.mxu2 %v3934_v2  ;;  %v5309_v61 = vld [vmem:[#allocation7_spill] sm:$0xff] }
 0x52f   :  { %3328 = vmatmul.msk.f32.vlgmr.msrb.gmra.mxu2 %vm110_vm3, %v4220_v8 }
 0x530   :  { %v775_v42 = vpop.f32.mrf.mxu0  ;;  %975 = vmatpush.msrb.mxu1 %v3929_v1  ;;  %1072 = vmatpush.msrb.mxu2 %v3973_v22  ;;  %v5311_v1 = vld [vmem:[#allocation9_spill] sm:$0xff] }
 0x531   :  { %3326 = vmatmul.msk.f32.vlgmr.msra.gmra.mxu0 %vm533_vm9, %v775_v42  ;;  %3327 = vmatmul.msk.f32.vlgmr.msra.gmra.mxu1 %vm110_vm3, %v4220_v8 }
 0x532   :  { %1032 = vmatpush.msra.mxu0 %v3962_v17  ;;  %1052 = vmatpush.msra.mxu1 %v3968_v21 }
 0x533   :  { %1073 = vmatpush.msrb.mxu2 %v3992_v24 }
 0x534   :  { %v1017_v45 = vpop.f32.mrf.mxu3  ;;  %1033 = vmatpush.msra.mxu0 %v3982_v16  ;;  %1053 = vmatpush.msra.mxu1 %v3987_v18 }
 0x535   :  { %v1018_v46 = vadd.f32 %v4111_v7, %v1017_v45  ;;  %1074 = vmatpush.msrb.mxu2 %v4016_v27 }
 0x536   :  { %1034 = vmatpush.msra.mxu0 %v4001_v25  ;;  %1054 = vmatpush.msra.mxu1 %v4009_v26 }
 0x537   :  { %3332 = vmatmul.msk.f32.vlgmr.msra.gmra.mxu2 %vm110_vm3, %v4220_v8  ;;  %3343 = vmatpush.xpose.msk.msra.mxu3 %vm533_vm9, %v1018_v46 }
 0x538   :  { %1075 = vmatpush.msrb.mxu2 %v5304_v50  ;;  %1035 = vmatpush.msra.mxu0 %v5305_v51 }
 0x539   :  { %3330 = vmatmul.msk.f32.vlgmr.msrb.gmra.mxu0 %vm110_vm3, %v4220_v8  ;;  %3331 = vmatmul.msk.f32.vlgmr.msrb.gmra.mxu1 %vm110_vm3, %v4220_v8 }
 0x53a   :  { %3344 = vmatmul.msk.f32.vlgmr.msra.gmra.mxu3 %vm533_vm9, %v938_v49  ;;  %1055 = vmatpush.msra.mxu1 %v5306_v52 }
 0x53b   :  { %1112 = vmatpush.msrb.mxu0 %v5307_v54 }
 0x53c   :  { %v1097_v55 = vpop.f32.mrf.mxu3 }
 0x53d   :  { %v1098_v59 = vadd.f32 %v5308_v57, %v1097_v55  ;;  %1113 = vmatpush.msrb.mxu0 %v5309_v61 }
 0x53f   :  { %3336 = vmatmul.msk.f32.vlgmr.msrb.gmra.mxu2 %vm110_vm3, %v4220_v8  ;;  %1336 = vmatpush.msrb.mxu3 %v1098_v59 }
 0x540   :  { %1114 = vmatpush.msrb.mxu0 %v5310_v62 }
 0x541   :  { %1428 = vmatpush.msra.mxu3 %v4204_v14  ;;  %3334 = vmatmul.msk.f32.vlgmr.msra.gmra.mxu0 %vm110_vm3, %v4220_v8 }
 0x542   :  { %3335 = vmatmul.msk.f32.vlgmr.msra.gmra.mxu1 %vm110_vm3, %v4220_v8  ;;  %1115 = vmatpush.msrb.mxu0 %v5311_v1 }
 0x549   :  { %3338 = vmatmul.msk.f32.vlgmr.msrb.gmra.mxu0 %vm110_vm3, %v4220_v8 }
 0x5a6   :  { %v798_v2 = vpop.f32.mrf.mxu1 }
 0x5a7   :  { %v870_v24 = vsel %vm110_vm3, %v798_v2, 0.0 }
 0x5aa   :  { %v821_v17 = vpop.f32.mrf.mxu2 }
 0x5ab   :  { %v871_v16 = vsel %vm110_vm3, %v821_v17, 0.0 }
 0x5ac   :  { %v872_v25 = vadd.f32 %v871_v16, %v870_v24 }
 0x5ae   :  { %v867_v21 = vpop.f32.mrf.mxu0  ;;  %v897_v22 = vpop.f32.mrf.mxu1  ;;  %v874_v6 = vadd.f32 %v873_v36, %v872_v25 }
 0x5af   :  { %v875_v56 = vsel %vm110_vm3, %v867_v21, 0.0  ;;  %v898_v14 = vadd.f32 %v5313_v23, %v897_v22 }
 0x5b0   :  { %v876_v4 = vadd.f32 %v875_v56, %v874_v6 }
 0x5b2   :  { %v917_v18 = vpop.f32.mrf.mxu2  ;;  %v1464_v53 = vadd.f32 %v1463_v29, %v876_v4 }
 0x5b3   :  { %v918_v38 = vadd.f32 %v5315_v28, %v917_v18 }
 0x5b4   :  { %v1466_v40 = vadd.f32 %v1464_v53, %v5320_v37 }
 0x5b6   :  { %v957_v26 = vpop.f32.mrf.mxu0  ;;  %v977_v27 = vpop.f32.mrf.mxu1  ;;  %v1468_v45 = vsel %vm110_vm3, %v1466_v40, 0.0 }
 0x5b7   :  { %v978_v7 = vadd.f32 %v5312_v60, %v977_v27  ;;  %v958_v15 = vadd.f32 %v5318_v63, %v957_v26 }
 0x5b9   :  { %3339 = vmatpush.xpose.msk.msrb.mxu1 %vm533_vm9, %v978_v7 }
 0x5ba   :  { %v997_v33 = vpop.f32.mrf.mxu2 }
 0x5bb   :  { %v998_v35 = vadd.f32 %v5314_v0, %v997_v33 }
 0x5bc   :  { %3340 = vmatmul.msk.f32.vlgmr.msrb.gmra.mxu1 %vm533_vm9, %v898_v14 }
 0x5bd   :  { %3341 = vmatpush.xpose.msk.msra.mxu2 %vm533_vm9, %v998_v35  ;;  %v1195_v31 = vpop.f32.mrf.mxu3 }
 0x5be   :  { %v1226_v41 = vmul.f32 0.35355338, %v1195_v31  ;;  %v1037_v44 = vpop.f32.mrf.mxu0 }
 0x5bf   :  { %v1057_v48 = vpop.f32.mrf.mxu1  ;;  %v1038_v11 = vadd.f32 %v5316_v13, %v1037_v44  ;;  %v235_v44 = vld [vmem:[%s5236_s8 + $0x10] sm:$0xff] }
 0x5c0   :  { %v1058_v20 = vadd.f32 %v5317_v19, %v1057_v48  ;;  %3342 = vmatmul.msk.f32.vlgmr.msra.gmra.mxu2 %vm533_vm9, %v918_v38  ;;  %v1234_v58 = vsel %vm533_vm9, %v1226_v41, -inf  ;;  %v234_v48 = vld [vmem:[%s5236_s8 + $0x8] sm:$0xff] }
 0x5c1   :  { %1235 = vmax.xlane.f32.xlu0 %v1234_v58  ;;  %3345 = vmatpush.xpose.msk.msra.mxu0 %vm533_vm9, %v1038_v11  ;;  %v233_v11 = vld [vmem:[%s5236_s8] sm:$0xff] }
 0x5c2   :  { %1290 = vmatpush.msra.mxu1 %v1058_v20  ;;  %v1077_v3 = vpop.f32.mrf.mxu2 }
 0x5c3   :  { %v1078_v10 = vadd.f32 %v5319_v9, %v1077_v3 }
 0x5c4   :  { %1382 = vmatpush.msrb.mxu1 %v4243_v32  ;;  %3346 = vmatmul.msk.f32.vlgmr.msra.gmra.mxu0 %vm533_vm9, %v958_v15 }
 0x5c5   :  { %1313 = vmatpush.msrb.mxu2 %v1078_v10 }
 0x5c6   :  { %v1117_v43 = vpop.f32.mrf.mxu0 }
 0x5c7   :  { %1405 = vmatpush.msra.mxu2 %v4237_v12  ;;  %v1118_v42 = vadd.f32 %v5321_v39, %v1117_v43 }
 0x5c9   :  { %1359 = vmatpush.msrb.mxu0 %v1118_v42  ;;  %1469 = vadd.xlane.f32.xlu0 %v1468_v45  ;;  %v1512_v42 = vperm.slane %v4322_v5, 1 }
 0x5cb   :  { %1451 = vmatpush.msra.mxu0 %v4256_v34 }
 0x634   :  { %v1236_v46 = vpop.xlane.xlu0 %1235 }
 0x635   :  { %v1242_v47 = vsub.f32 %v1226_v41, %v1236_v46  ;;  %v236_v41 = vld [vmem:[%s5236_s8 + $0x18] sm:$0xff] }
 0x637   :  { %v1248_v49 = vmul.f32 1.442695, %v1242_v47 }
 0x639   :  { %3559 = vpow2.f32 %v1248_v49  ;;  %v1143_v32 = vpop.f32.mrf.mxu1 }
 0x63a   :  { %v1224_v50 = vmul.f32 0.35355338, %v1143_v32 }
 0x63c   :  { %v1228_v51 = vsel %vm533_vm9, %v1224_v50, -inf  ;;  %v1470_v54 = vpop.xlane.xlu0 %1469 }
 0x63d   :  { %1229 = vmax.xlane.f32.xlu0 %v1228_v51  ;;  %v1474_v61 = vmul.f32 %v1470_v54, %v3766_v30 }
 0x63f   :  { %v3560_v52 = vpop.eup %3559  ;;  %v4352_v1 = vsub.f32 %v1466_v40, %v1474_v61  ;;  %v4404_v61 = vld [vmem:[%s5237_s9] ss:$0 sm:$0xff] }
 0x640   :  { %v1258_v12 = vsel %vm533_vm9, %v3560_v52, 0.0 }
 0x641   :  { %1259 = vadd.xlane.f32.xlu2 %v1258_v12  ;;  %v1221_v55 = vpop.f32.mrf.mxu0  ;;  %v1478_v17 = vmul.f32 %v4352_v1, %v4352_v1 }
 0x642   :  { %v1227_v57 = vmul.f32 0.35355338, %v1221_v55  ;;  %v253_v55 = vld [vmem:[%s5238_s10 + $0x78] sm:$0xff] }
 0x643   :  { %v1169_v59 = vpop.f32.mrf.mxu2  ;;  %v1480_v21 = vsel %vm110_vm3, %v1478_v17, 0.0  ;;  %v249_v17 = vld [vmem:[%s5238_s10 + $0x58] sm:$0xff] }
 0x644   :  { %v1225_v34 = vmul.f32 0.35355338, %v1169_v59  ;;  %v1237_v62 = vsel %vm533_vm9, %v1227_v57, -inf  ;;  %v252_v59 = vld [vmem:[%s5238_s10 + $0x70] sm:$0xff] }
 0x645   :  { %1238 = vmax.xlane.f32.xlu1 %v1237_v62 }
 0x646   :  { %v1231_v2 = vsel %vm533_vm9, %v1225_v34, -inf }
 0x649   :  { %1232 = vmax.xlane.f32.xlu2 %v1231_v2 }
 0x651   :  { %1481 = vadd.xlane.f32.xlu2 %v1480_v21 }
 0x6b0   :  { %v1230_v22 = vpop.xlane.xlu0 %1229 }
 0x6b1   :  { %v1240_v16 = vsub.f32 %v1224_v50, %v1230_v22  ;;  %v1515_v50 = vperm.slane %v4322_v5, 2  ;;  %v248_v22 = vld [vmem:[%s5238_s10 + $0x50] sm:$0xff] }
 0x6b3   :  { %v1244_v18 = vmul.f32 1.442695, %v1240_v16 }
 0x6b4   :  { %v1260_v24 = vpop.xlane.xlu2 %1259 }
 0x6b5   :  { %3561 = vpow2.f32 %v1244_v18  ;;  %v247_v18 = vld [vmem:[%s5238_s10 + $0x48] sm:$0xff] }
 0x6b6   :  { %3563 = vrcp.f32 %v1260_v24 }
 0x6b8   :  { %v1239_v25 = vpop.xlane.xlu1 %1238 }
 0x6b9   :  { %v1243_v26 = vsub.f32 %v1227_v57, %v1239_v25  ;;  %v246_v25 = vld [vmem:[%s5238_s10 + $0x40] sm:$0xff] }
 0x6bb   :  { %v3562_v27 = vpop.eup %3561  ;;  %v1250_v36 = vmul.f32 1.442695, %v1243_v26 }
 0x6bc   :  { %v3564_v60 = vpop.eup %3563  ;;  %v1233_v7 = vpop.xlane.xlu2 %1232  ;;  %v1252_v6 = vsel %vm533_vm9, %v3562_v27, 0.0 }
 0x6bd   :  { %v1270_v56 = vmul.f32 %v3564_v60, %v3560_v52  ;;  %3565 = vpow2.f32 %v1250_v36  ;;  %v1241_v23 = vsub.f32 %v1225_v34, %v1233_v7  ;;  %1253 = vadd.xlane.f32.xlu1 %v1252_v6  ;;  %v251_v34 = vld [vmem:[%s5238_s10 + $0x68] sm:$0xff]  ;;  %v244_v36 = vld [vmem:[%s5238_s10 + $0x30] sm:$0xff]  ;;  %v242_v7 = vld [vmem:[%s5238_s10 + $0x20] sm:$0xff] }
 0x6be   :  { %v243_v60 = vld [vmem:[%s5238_s10 + $0x28] sm:$0xff] }
 0x6bf   :  { %v1246_v14 = vmul.f32 1.442695, %v1241_v23  ;;  %3349 = vmatmul.msk.f32.vlgmr.msrb.gmra.mxu3 %vm533_vm9, %v1270_v56  ;;  %v241_v23 = vld [vmem:[%s5238_s10 + $0x18] sm:$0xff] }
 0x6c0   :  { %1539 = vmatpush.msrb.mxu3 %v236_v41 }
 0x6c1   :  { %3567 = vpow2.f32 %v1246_v14 }
 0x6c2   :  { %1540 = vmatpush.msrb.mxu3 %v235_v44 }
 0x6c3   :  { %v3566_v33 = vpop.eup %3565 }
 0x6c4   :  { %v1261_v0 = vsel %vm533_vm9, %v3566_v33, 0.0  ;;  %v1482_v31 = vpop.xlane.xlu2 %1481  ;;  %1541 = vmatpush.msrb.mxu3 %v234_v48 }
 0x6c5   :  { %1262 = vadd.xlane.f32.xlu2 %v1261_v0  ;;  %v1486_v28 = vmul.f32 %v1482_v31, %v3766_v30  ;;  %v239_v31 = vld [vmem:[%s5238_s10 + $0x8] sm:$0xff] }
 0x6c6   :  { %1542 = vmatpush.msrb.mxu3 %v233_v11 }
 0x6c7   :  { %v3568_v35 = vpop.eup %3567  ;;  %v1488_v38 = vadd.f32 1e-12, %v1486_v28  ;;  %v238_v28 = vld [vmem:[%s5238_s10] sm:$0xff] }
 0x6c8   :  { %v1255_v4 = vsel %vm533_vm9, %v3568_v35, 0.0 }
 0x6c9   :  { %1256 = vadd.xlane.f32.xlu0 %v1255_v4  ;;  %3569 = vrsqrt.f32 %v1488_v38  ;;  %vm1496_vm14 = vweird.f32 %v1488_v38 }
 0x6cf   :  { %v3570_v13 = vpop.eup %3569 }
 0x6d0   :  { %v1491_v19 = vmul.f32 %v3570_v13, %v1488_v38  ;;  %vm1497_vm13 = vweird.f32 %v3570_v13 }
 0x6d1   :  { %vm1498_vm15 = vmor %vm1496_vm14, %vm1497_vm13 }
 0x6d2   :  { %v1492_v20 = vmul.f32 %v3570_v13, %v1491_v19 }
 0x6d4   :  { %v1493_v58 = vmul.f32 0.5, %v1492_v20 }
 0x6d6   :  { %v1494_v63 = vsub.f32 1.5, %v1493_v58 }
 0x6d8   :  { %v1495_v10 = vmul.f32 %v3570_v13, %v1494_v63 }
 0x6da   :  { %v1499_v40 = vsel %vm1498_vm15, %v3570_v13, %v1495_v10 }
 0x6db   :  { %v1510_v45 = vmul.f32 %v1499_v40, %v4352_v1  ;;  %v250_v1 = vld [vmem:[%s5238_s10 + $0x60] sm:$0xff] }
 0x6dd   :  { %v1513_v32 = vmul.f32 %v1512_v42, %v1510_v45 }
 0x6df   :  { %v4386_v51 = vadd.f32 %v1515_v50, %v1513_v32 }
 0x730   :  { %v1254_v53 = vpop.xlane.xlu1 %1253 }
 0x731   :  { %3571 = vrcp.f32 %v1254_v53 }
 0x737   :  { %v3572_v15 = vpop.eup %3571 }
 0x738   :  { %v1268_v3 = vmul.f32 %v3572_v15, %v3562_v27  ;;  %v1263_v9 = vpop.xlane.xlu2 %1262  ;;  %v245_v27 = vld [vmem:[%s5238_s10 + $0x38] sm:$0xff] }
 0x739   :  { %3573 = vrcp.f32 %v1263_v9 }
 0x73a   :  { %3347 = vmatmul.msk.f32.vlgmr.msra.gmra.mxu1 %vm533_vm9, %v1268_v3 }
 0x73c   :  { %v1257_v37 = vpop.xlane.xlu0 %1256 }
 0x73d   :  { %3575 = vrcp.f32 %v1257_v37 }
 0x73f   :  { %v3574_v43 = vpop.eup %3573 }
 0x740   :  { %v1271_v39 = vmul.f32 %v3574_v43, %v3566_v33  ;;  %v240_v33 = vld [vmem:[%s5238_s10 + $0x10] sm:$0xff] }
 0x742   :  { %v1338_v46 = vpop.f32.mrf.mxu3  ;;  %3350 = vmatmul.msk.f32.vlgmr.msrb.gmra.mxu0 %vm533_vm9, %v1271_v39 }
 0x743   :  { %v3576_v47 = vpop.eup %3575  ;;  %3353 = vmatmul.msk.f32.vlgmr.msra.gmra.mxu3 %vm533_vm9, %v1338_v46 }
 0x744   :  { %v1269_v49 = vmul.f32 %v3576_v47, %v3568_v35 }
 0x746   :  { %3348 = vmatmul.msk.f32.vlgmr.msrb.gmra.mxu2 %vm533_vm9, %v1269_v49 }
 0x747   :  { %1631 = vmatpush.msrb.mxu2 %v253_v55 }
 0x749   :  { %1632 = vmatpush.msrb.mxu2 %v252_v59 }
 0x74b   :  { %3355 = vmatmul.msk.f32.vlgmr.msrb.gmra.mxu3 %vm110_vm3, %v4386_v51  ;;  %1633 = vmatpush.msrb.mxu2 %v251_v34 }
 0x74d   :  { %1634 = vmatpush.msrb.mxu2 %v250_v1 }
 0x74f   :  { %1635 = vmatpush.msrb.mxu2 %v249_v17 }
 0x751   :  { %1636 = vmatpush.msrb.mxu2 %v248_v22 }
 0x753   :  { %1637 = vmatpush.msrb.mxu2 %v247_v18  ;;  %v5263_v18 = vperm.slane %v4322_v5, 3 }
 0x755   :  { %1638 = vmatpush.msrb.mxu2 %v246_v25 }
 0x757   :  { %1639 = vmatpush.msrb.mxu2 %v245_v27 }
 0x759   :  { %1640 = vmatpush.msrb.mxu2 %v244_v36 }
 0x75b   :  { %1641 = vmatpush.msrb.mxu2 %v243_v60 }
 0x75d   :  { %1642 = vmatpush.msrb.mxu2 %v242_v7 }
 0x75f   :  { %1643 = vmatpush.msrb.mxu2 %v241_v23 }
 0x761   :  { %1644 = vmatpush.msrb.mxu2 %v240_v33 }
 0x763   :  { %1645 = vmatpush.msrb.mxu2 %v239_v31 }
 0x765   :  { %1646 = vmatpush.msrb.mxu2 %v238_v28 }
 0x7b7   :  { %v1292_v52 = vpop.f32.mrf.mxu1 }
 0x7b8   :  { %3351 = vmatmul.msk.f32.vlgmr.msrb.gmra.mxu1 %vm533_vm9, %v1292_v52 }
 0x7bf   :  { %v1361_v12 = vpop.f32.mrf.mxu0 }
 0x7c0   :  { %3354 = vmatmul.msk.f32.vlgmr.msra.gmra.mxu0 %vm533_vm9, %v1361_v12 }
 0x7c6   :  { %v4392_v54 = vpop.f32.mrf.mxu3 }
 0x7c9   :  { %v1315_v57 = vpop.f32.mrf.mxu2 }
 0x7ca   :  { %3352 = vmatmul.msk.f32.vlgmr.msra.gmra.mxu2 %vm533_vm9, %v1315_v57 }
 0x7ce   :  { %v1544_v62 = vpop.f32.mrf.mxu3 }
 0x7cf   :  { %v4413_v2 = vadd.f32 %v4404_v61, %v1544_v62  ;;  %v1459_v62 = vsel %vm110_vm3, %v4392_v54, 0.0 }
 0x7d1   :  { %v1552_v21 = vmul.f32 0.70710677, %v4413_v2  ;;  %v1550_v47 = vmul.f32 0.5, %v4413_v2 }
 0x7d3   :  { %v1554_v16 = vand.u32 2147483647, %v1552_v21  ;;  %vm1620_vm5 = vcmp.lt.f32.partialorder %v1552_v21, 0.0 }
 0x7d5   :  { %v1556_v24 = vmul.f32 0.3275911, %v1554_v16  ;;  %v1608_v13 = vsub.f32 0.0, %v1554_v16 }
 0x7d7   :  { %v1558_v26 = vadd.f32 1.0, %v1556_v24  ;;  %v1610_v20 = vmul.f32 %v1608_v13, %v1554_v16 }
 0x7d9   :  { %3577 = vrcp.f32 %v1558_v26  ;;  %v1571_v0 = vand.u32 2147483648, %v1558_v26  ;;  %v1569_v4 = vand.u32 2147483647, %v1558_v26  ;;  %vm1565_vm1 = vweird.f32 %v1558_v26 }
 0x7da   :  { %v1612_v63 = vmul.f32 1.442695, %v1610_v20  ;;  %v4492_v20 = vld [vmem:[%s5232_s4 + $0x1b8] sm:$0xff] }
 0x7db   :  { %v1572_v41 = vor.u32 1.1754944e-38, %v1571_v0  ;;  %vm1570_vm4 = vcmp.eq.f32.partialorder %v1569_v4, 8.507059e+37  ;;  %1870 = vmatpush.msrb.mxu0 %v4492_v20 }
 0x7dc   :  { %3579 = vpow2.f32 %v1612_v63  ;;  %v4523_v63 = vld [vmem:[%s5232_s4 + $0x188] sm:$0xff] }
 0x7df   :  { %v3578_v6 = vpop.eup %3577 }
 0x7e0   :  { %v1561_v56 = vmul.f32 %v3578_v6, %v1558_v26  ;;  %vm1566_vm0 = vweird.f32 %v3578_v6 }
 0x7e1   :  { %vm1567_vm2 = vmor %vm1565_vm1, %vm1566_vm0 }
 0x7e2   :  { %v1562_v14 = vsub.f32 1.0, %v1561_v56  ;;  %v3580_v40 = vpop.eup %3579 }
 0x7e4   :  { %v1563_v35 = vmul.f32 %v3578_v6, %v1562_v14 }
 0x7e6   :  { %v1564_v38 = vadd.f32 %v3578_v6, %v1563_v35 }
 0x7e8   :  { %v1568_v44 = vsel %vm1567_vm2, %v3578_v6, %v1564_v38 }
 0x7e9   :  { %v1573_v48 = vsel %vm1570_vm4, %v1572_v41, %v1568_v44 }
 0x7ea   :  { %v1590_v11 = vmul.f32 1.0614054, %v1573_v48 }
 0x7ec   :  { %v1592_v19 = vadd.f32 -1.4531521, %v1590_v11 }
 0x7ee   :  { %v1594_v53 = vmul.f32 %v1592_v19, %v1573_v48  ;;  %v4487_v19 = vld [vmem:[%s5232_s4 + $0x198] sm:$0xff] }
 0x7ef   :  { %1850 = vmatpush.msra.mxu3 %v4487_v19 }
 0x7f0   :  { %v1596_v58 = vadd.f32 1.4214138, %v1594_v53  ;;  %v4510_v53 = vld [vmem:[%s5232_s4 + $0x1b0] sm:$0xff] }
 0x7f1   :  { %1871 = vmatpush.msrb.mxu0 %v4510_v53 }
 0x7f2   :  { %v1598_v15 = vmul.f32 %v1596_v58, %v1573_v48  ;;  %v4515_v58 = vld [vmem:[%s5232_s4 + $0x210] sm:$0xff] }
 0x7f4   :  { %v1600_v3 = vadd.f32 -0.28449672, %v1598_v15  ;;  %v4528_v15 = vld [vmem:[%s5232_s4 + $0x1a8] sm:$0xff] }
 0x7f5   :  { %1872 = vmatpush.msrb.mxu0 %v4528_v15 }
 0x7f6   :  { %v1602_v9 = vmul.f32 %v1600_v3, %v1573_v48  ;;  %v4533_v3 = vld [vmem:[%s5232_s4 + $0x208] sm:$0xff] }
 0x7f8   :  { %v1604_v10 = vadd.f32 0.2548296, %v1602_v9  ;;  %v4540_v9 = vld [vmem:[%s5232_s4 + $0x180] sm:$0xff] }
 0x7fa   :  { %v1606_v37 = vmul.f32 %v1604_v10, %v1573_v48  ;;  %v4545_v10 = vld [vmem:[%s5232_s4 + $0x1a0] sm:$0xff] }
 0x7fb   :  { %1873 = vmatpush.msrb.mxu0 %v4545_v10 }
 0x7fc   :  { %v1616_v43 = vmul.f32 %v3580_v40, %v1606_v37  ;;  %v4550_v37 = vld [vmem:[%s5232_s4 + $0x200] sm:$0xff]  ;;  %v4559_v40 = vld [vmem:[%s5232_s4 + $0x1d8] sm:$0xff] }
 0x7fe   :  { %v1618_v39 = vsub.f32 1.0, %v1616_v43  ;;  %v4564_v43 = vld [vmem:[%s5232_s4 + $0x1f8] sm:$0xff] }
 0x7ff   :  { %1910 = vmatpush.msra.mxu0 %v4564_v43 }
 0x800   :  { %v1622_v45 = vsub.f32 0.0, %v1618_v39 }
 0x802   :  { %v1624_v46 = vsel %vm1620_vm5, %v1622_v45, %v1618_v39  ;;  %v4569_v39 = vld [vmem:[%s5232_s4 + $0x278] sm:$0xff]  ;;  %v4576_v45 = vld [vmem:[%s5232_s4 + $0x1d0] sm:$0xff] }
 0x803   :  { %v1626_v49 = vadd.f32 1.0, %v1624_v46  ;;  %v4581_v46 = vld [vmem:[%s5232_s4 + $0x1f0] sm:$0xff] }
 0x804   :  { %1911 = vmatpush.msra.mxu0 %v4581_v46 }
 0x805   :  { %v1628_v32 = vmul.f32 %v1626_v49, %v1550_v47  ;;  %v4586_v47 = vld [vmem:[%s5232_s4 + $0x270] sm:$0xff] }
 0x807   :  { %1647 = vmatmul.f32.vlgmr.msrb.gmra.mxu2 %v1628_v32  ;;  %v4592_v32 = vld [vmem:[%s5232_s4 + $0x1c8] sm:$0xff] }
 0x835   :  { %v1384_v52 = vpop.f32.mrf.mxu1 }
 0x836   :  { %v1456_v55 = vsel %vm110_vm3, %v1384_v52, 0.0  ;;  %v4597_v52 = vld [vmem:[%s5232_s4 + $0x1e8] sm:$0xff] }
 0x837   :  { %1912 = vmatpush.msra.mxu0 %v4597_v52 }
 0x83d   :  { %v1453_v59 = vpop.f32.mrf.mxu0 }
 0x83e   :  { %v1461_v17 = vsel %vm110_vm3, %v1453_v59, 0.0  ;;  %v4616_v59 = vld [vmem:[%s5232_s4 + $0x1e0] sm:$0xff] }
 0x83f   :  { %1913 = vmatpush.msra.mxu0 %v4616_v59 }
 0x84d   :  { %v1407_v12 = vpop.f32.mrf.mxu2 }
 0x84e   :  { %v1457_v57 = vsel %vm110_vm3, %v1407_v12, 0.0 }
 0x84f   :  { %v1458_v34 = vadd.f32 %v1457_v57, %v1456_v55  ;;  %v4605_v55 = vld [vmem:[%s5232_s4 + $0x268] sm:$0xff]  ;;  %v4611_v57 = vld [vmem:[%s5232_s4 + $0x1c0] sm:$0xff] }
 0x851   :  { %v1460_v1 = vadd.f32 %v1459_v62, %v1458_v34  ;;  %v4623_v62 = vld [vmem:[%s5232_s4 + $0x260] sm:$0xff] }
 0x853   :  { %v1462_v21 = vadd.f32 %v1461_v17, %v1460_v1 }
 0x855   :  { %v1465_v2 = vadd.f32 %v1463_v29, %v1462_v21 }
 0x857   :  { %v1467_v22 = vadd.f32 %v1465_v2, %v4220_v8 }
 0x859   :  { %v1471_v16 = vsel %vm110_vm3, %v1467_v22, 0.0 }
 0x85a   :  { %1472 = vadd.xlane.f32.xlu0 %v1471_v16 }
 0x88a   :  { %v1648_v24 = vpop.f32.mrf.mxu2 }
 0x88b   :  { %v1649_v25 = vadd.f32 %v1648_v24, %v5263_v18  ;;  %v5262_v24 = vperm.slane %v4322_v5, 4 }
 0x88d   :  { %v1654_v54 = vadd.f32 %v1649_v25, %v4386_v51 }
 0x88f   :  { %v1656_v26 = vsel %vm110_vm3, %v1654_v54, 0.0 }
 0x890   :  { %1657 = vadd.xlane.f32.xlu2 %v1656_v26 }
 0x8cd   :  { %v1473_v27 = vpop.xlane.xlu0 %1472 }
 0x8ce   :  { %v1475_v36 = vmul.f32 %v1473_v27, %v3766_v30 }
 0x8d0   :  { %v1477_v29 = vsub.f32 %v1467_v22, %v1475_v36 }
 0x8d2   :  { %v1479_v60 = vmul.f32 %v1477_v29, %v1477_v29 }
 0x8d4   :  { %v1483_v8 = vsel %vm110_vm3, %v1479_v60, 0.0  ;;  %v4646_v60 = vld [vmem:[%s5232_s4 + $0x258] sm:$0xff] }
 0x8d5   :  { %1484 = vadd.xlane.f32.xlu1 %v1483_v8  ;;  %v4651_v8 = vld [vmem:[%s5232_s4 + $0x2d8] sm:$0xff] }
 0x903   :  { %v1658_v7 = vpop.xlane.xlu2 %1657 }
 0x904   :  { %v1662_v6 = vmul.f32 %v1658_v7, %v3766_v30  ;;  %v4660_v7 = vld [vmem:[%s5232_s4 + $0x230] sm:$0xff] }
 0x906   :  { %v4470_v56 = vsub.f32 %v1654_v54, %v1662_v6  ;;  %v5261_v54 = vperm.slane %v4322_v5, 5  ;;  %v4668_v6 = vld [vmem:[%s5232_s4 + $0x250] sm:$0xff] }
 0x908   :  { %v1666_v23 = vmul.f32 %v4470_v56, %v4470_v56 }
 0x90a   :  { %v1668_v51 = vsel %vm110_vm3, %v1666_v23, 0.0  ;;  %v4680_v23 = vld [vmem:[%s5232_s4 + $0x228] sm:$0xff] }
 0x90b   :  { %1669 = vadd.xlane.f32.xlu0 %v1668_v51  ;;  %v4686_v51 = vld [vmem:[%s5232_s4 + $0x248] sm:$0xff] }
 0x948   :  { %v1485_v14 = vpop.xlane.xlu1 %1484 }
 0x949   :  { %v1487_v33 = vmul.f32 %v1485_v14, %v3766_v30  ;;  %v4691_v14 = vld [vmem:[%s5232_s4 + $0x2c8] sm:$0xff] }
 0x94a   :  { %5324 = vst [vmem:[#allocation3_spill] sm:$0xff] %v4691_v14 }
 0x94b   :  { %v1489_v0 = vadd.f32 1e-12, %v1487_v33  ;;  %v4698_v33 = vld [vmem:[%s5232_s4 + $0x220] sm:$0xff] }
 0x94d   :  { %3581 = vrsqrt.f32 %v1489_v0  ;;  %vm1506_vm7 = vweird.f32 %v1489_v0 }
 0x953   :  { %v3582_v35 = vpop.eup %3581 }
 0x954   :  { %v1501_v4 = vmul.f32 %v3582_v35, %v1489_v0  ;;  %vm1507_vm6 = vweird.f32 %v3582_v35  ;;  %v4706_v0 = vld [vmem:[%s5232_s4 + $0x240] sm:$0xff] }
 0x955   :  { %vm1508_vm8 = vmor %vm1506_vm7, %vm1507_vm6 }
 0x956   :  { %v1502_v31 = vmul.f32 %v3582_v35, %v1501_v4  ;;  %v4717_v4 = vld [vmem:[%s5232_s4 + $0x298] sm:$0xff] }
 0x958   :  { %v1503_v28 = vmul.f32 0.5, %v1502_v31  ;;  %v4726_v31 = vld [vmem:[%s5232_s4 + $0x2b8] sm:$0xff] }
 0x95a   :  { %v1504_v38 = vsub.f32 1.5, %v1503_v28  ;;  %v4734_v28 = vld [vmem:[%s5232_s4 + $0x290] sm:$0xff] }
 0x95c   :  { %v1505_v41 = vmul.f32 %v3582_v35, %v1504_v38  ;;  %v4741_v38 = vld [vmem:[%s5232_s4 + $0x2b0] sm:$0xff] }
 0x95d   :  { %5326 = vst [vmem:[#allocation6_spill] sm:$0xff] %v4741_v38 }
 0x95e   :  { %v1509_v44 = vsel %vm1508_vm8, %v3582_v35, %v1505_v41  ;;  %v4712_v35 = vld [vmem:[%s5232_s4 + $0x2c0] sm:$0xff]  ;;  %v4747_v41 = vld [vmem:[%s5232_s4 + $0x288] sm:$0xff] }
 0x95f   :  { %v1511_v48 = vmul.f32 %v1509_v44, %v1477_v29  ;;  %v4641_v29 = vld [vmem:[%s5232_s4 + $0x238] sm:$0xff]  ;;  %5325 = vst [vmem:[#allocation4_spill] sm:$0xff] %v4712_v35  ;;  %v4753_v44 = vld [vmem:[%s5232_s4 + $0x2a8] sm:$0xff] }
 0x960   :  { %5327 = vst [vmem:[#allocation19_spill] sm:$0xff] %v4747_v41 }
 0x961   :  { %v1514_v13 = vmul.f32 %v1512_v42, %v1511_v48  ;;  %v4497_v42 = vld [vmem:[%s5232_s4 + $0x218] sm:$0xff]  ;;  %5328 = vst [vmem:[#allocation7_spill] sm:$0xff] %v4753_v44  ;;  %v4760_v48 = vld [vmem:[%s5232_s4 + $0x280] sm:$0xff] }
 0x962   :  { %1930 = vmatpush.msra.mxu1 %v4497_v42  ;;  %5329 = vst [vmem:[#allocation8_spill] sm:$0xff] %v4760_v48 }
 0x963   :  { %v4480_v11 = vadd.f32 %v1515_v50, %v1514_v13  ;;  %v4505_v50 = vld [vmem:[%s5232_s4 + $0x190] sm:$0xff]  ;;  %v4766_v13 = vld [vmem:[%s5232_s4 + $0x2a0] sm:$0xff] }
 0x964   :  { %1851 = vmatpush.msra.mxu3 %v4505_v50  ;;  %1931 = vmatpush.msra.mxu1 %v4515_v58  ;;  %5330 = vst [vmem:[#allocation9_spill] sm:$0xff] %v4766_v13 }
 0x965   :  { %3356 = vmatmul.msk.f32.gmra.mxu3 %vm110_vm3, %v4480_v11 }
 0x966   :  { %1852 = vmatpush.msra.mxu3 %v4523_v63  ;;  %1932 = vmatpush.msra.mxu1 %v4533_v3 }
 0x968   :  { %1853 = vmatpush.msra.mxu3 %v4540_v9  ;;  %1933 = vmatpush.msra.mxu1 %v4550_v37 }
 0x96a   :  { %1890 = vmatpush.msrb.mxu3 %v4559_v40  ;;  %1990 = vmatpush.msrb.mxu1 %v4569_v39 }
 0x96c   :  { %1891 = vmatpush.msrb.mxu3 %v4576_v45  ;;  %1991 = vmatpush.msrb.mxu1 %v4586_v47 }
 0x96e   :  { %1892 = vmatpush.msrb.mxu3 %v4592_v32  ;;  %1992 = vmatpush.msrb.mxu1 %v4605_v55 }
 0x970   :  { %1893 = vmatpush.msrb.mxu3 %v4611_v57  ;;  %1993 = vmatpush.msrb.mxu1 %v4623_v62 }
 0x97e   :  { %v1670_v49 = vpop.xlane.xlu0 %1669 }
 0x97f   :  { %v1674_v12 = vmul.f32 %v1670_v49, %v3766_v30  ;;  %v4771_v49 = vld [vmem:[%s5232_s4 + $0x2f8] sm:$0xff] }
 0x981   :  { %v1676_v34 = vadd.f32 1e-12, %v1674_v12  ;;  %v4783_v12 = vld [vmem:[%s5232_s4 + $0x2f0] sm:$0xff] }
 0x982   :  { %5331 = vst [vmem:[#allocation11_spill] sm:$0xff] %v4783_v12 }
 0x983   :  { %3583 = vrsqrt.f32 %v1676_v34  ;;  %vm1684_vm11 = vweird.f32 %v1676_v34 }
 0x989   :  { %v3584_v1 = vpop.eup %3583 }
 0x98a   :  { %v1679_v17 = vmul.f32 %v3584_v1, %v1676_v34  ;;  %vm1685_vm10 = vweird.f32 %v3584_v1  ;;  %v4790_v34 = vld [vmem:[%s5232_s4 + $0x2e8] sm:$0xff] }
 0x98b   :  { %vm1686_vm12 = vmor %vm1684_vm11, %vm1685_vm10  ;;  %5332 = vst [vmem:[#allocation13_spill] sm:$0xff] %v4790_v34 }
 0x98c   :  { %v1680_v21 = vmul.f32 %v3584_v1, %v1679_v17 }
 0x98e   :  { %v1681_v2 = vmul.f32 0.5, %v1680_v21 }
 0x990   :  { %v1682_v22 = vsub.f32 1.5, %v1681_v2 }
 0x992   :  { %v1683_v16 = vmul.f32 %v3584_v1, %v1682_v22 }
 0x994   :  { %v1687_v25 = vsel %vm1686_vm12, %v3584_v1, %v1683_v16  ;;  %v4797_v1 = vld [vmem:[%s5232_s4 + $0x2e0] sm:$0xff] }
 0x995   :  { %v1698_v26 = vmul.f32 %v1687_v25, %v4470_v56  ;;  %v4673_v56 = vld [vmem:[%s5232_s4 + $0x2d0] sm:$0xff]  ;;  %5333 = vst [vmem:[#allocation12_spill] sm:$0xff] %v4797_v1 }
 0x996   :  { %5323 = vst [vmem:[#allocation5_spill] sm:$0xff] %v4673_v56 }
 0x997   :  { %v1701_v27 = vmul.f32 %v5262_v24, %v1698_v26 }
 0x999   :  { %v4636_v36 = vadd.f32 %v5261_v54, %v1701_v27 }
 0x99b   :  { %5322 = vst [vmem:[#allocation10_spill] sm:$0xff] %v4636_v36  ;;  %3443 = vmatmul.msk.f32.vlgmr.msra.gmra.mxu3 %vm110_vm3, %v4636_v36  ;;  %3444 = vmatmul.msk.f32.vlgmr.msrb.gmra.mxu0 %vm110_vm3, %v4636_v36 }
 0x99c   :  { %3447 = vmatmul.msk.f32.vlgmr.msra.gmra.mxu1 %vm110_vm3, %v4636_v36  ;;  %1950 = vmatpush.msra.mxu3 %v4641_v29 }
 0x99d   :  { %1970 = vmatpush.msrb.mxu0 %v4646_v60  ;;  %2050 = vmatpush.msra.mxu1 %v4651_v8 }
 0x99e   :  { %1951 = vmatpush.msra.mxu3 %v4660_v7 }
 0x99f   :  { %1971 = vmatpush.msrb.mxu0 %v4668_v6  ;;  %2051 = vmatpush.msra.mxu1 %v4673_v56 }
 0x9a0   :  { %1952 = vmatpush.msra.mxu3 %v4680_v23 }
 0x9a1   :  { %1972 = vmatpush.msrb.mxu0 %v4686_v51  ;;  %2052 = vmatpush.msra.mxu1 %v4691_v14 }
 0x9a2   :  { %1953 = vmatpush.msra.mxu3 %v4698_v33 }
 0x9a3   :  { %3445 = vmatmul.msk.f32.vlgmr.msrb.gmra.mxu3 %vm110_vm3, %v4636_v36  ;;  %3446 = vmatmul.msk.f32.vlgmr.msra.gmra.mxu0 %vm110_vm3, %v4636_v36 }
 0x9a4   :  { %3450 = vmatmul.msk.f32.vlgmr.msrb.gmra.mxu1 %vm110_vm3, %v4636_v36  ;;  %1973 = vmatpush.msrb.mxu0 %v4706_v0 }
 0x9a5   :  { %2053 = vmatpush.msra.mxu1 %v4712_v35  ;;  %2010 = vmatpush.msrb.mxu3 %v4717_v4 }
 0x9a6   :  { %2030 = vmatpush.msra.mxu0 %v4726_v31 }
 0x9a7   :  { %2011 = vmatpush.msrb.mxu3 %v4734_v28 }
 0x9a8   :  { %2031 = vmatpush.msra.mxu0 %v4741_v38 }
 0x9a9   :  { %2012 = vmatpush.msrb.mxu3 %v4747_v41 }
 0x9aa   :  { %2032 = vmatpush.msra.mxu0 %v4753_v44 }
 0x9ab   :  { %3448 = vmatmul.msk.f32.vlgmr.msra.gmra.mxu3 %vm110_vm3, %v4636_v36  ;;  %3449 = vmatmul.msk.f32.vlgmr.msrb.gmra.mxu0 %vm110_vm3, %v4636_v36 }
 0x9ac   :  { %3453 = vmatmul.msk.f32.vlgmr.msra.gmra.mxu1 %vm110_vm3, %v4636_v36  ;;  %2013 = vmatpush.msrb.mxu3 %v4760_v48 }
 0x9ad   :  { %2033 = vmatpush.msra.mxu0 %v4766_v13 }
 0x9ae   :  { %2070 = vmatpush.msra.mxu3 %v4771_v49 }
 0x9b0   :  { %2071 = vmatpush.msra.mxu3 %v4783_v12 }
 0x9b2   :  { %2072 = vmatpush.msra.mxu3 %v4790_v34 }
 0x9b3   :  { %3451 = vmatmul.msk.f32.vlgmr.msrb.gmra.mxu3 %vm110_vm3, %v4636_v36  ;;  %3452 = vmatmul.msk.f32.vlgmr.msra.gmra.mxu0 %vm110_vm3, %v4636_v36 }
 0x9b4   :  { %2073 = vmatpush.msra.mxu3 %v4797_v1 }
 0x9bb   :  { %3454 = vmatmul.msk.f32.vlgmr.msra.gmra.mxu3 %vm110_vm3, %v4636_v36 }
 0x9e8   :  { %v1547_v17 = vpop.f32.mrf.mxu3 }
 0x9e9   :  { %v1548_v21 = vadd.f32 %v4404_v61, %v1547_v17 }
 0x9eb   :  { %v1553_v2 = vmul.f32 0.70710677, %v1548_v21 }
 0x9ed   :  { %v1555_v22 = vand.u32 2147483647, %v1553_v2  ;;  %vm1621_vm1 = vcmp.lt.f32.partialorder %v1553_v2, 0.0 }
 0x9ef   :  { %v1557_v16 = vmul.f32 0.3275911, %v1555_v22  ;;  %v1609_v48 = vsub.f32 0.0, %v1555_v22 }
 0x9f1   :  { %v1559_v25 = vadd.f32 1.0, %v1557_v16  ;;  %v1611_v14 = vmul.f32 %v1609_v48, %v1555_v22 }
 0x9f3   :  { %3585 = vrcp.f32 %v1559_v25  ;;  %v1586_v24 = vand.u32 2147483648, %v1559_v25  ;;  %v1584_v35 = vand.u32 2147483647, %v1559_v25  ;;  %vm1580_vm14 = vweird.f32 %v1559_v25 }
 0x9f4   :  { %v1614_v41 = vmul.f32 1.442695, %v1611_v14  ;;  %v4816_v14 = vld [vmem:[%s5233_s5 + $0xc] ss:$0 sm:$0xff] }
 0x9f5   :  { %v1587_v13 = vor.u32 1.1754944e-38, %v1586_v24  ;;  %vm1585_vm0 = vcmp.eq.f32.partialorder %v1584_v35, 8.507059e+37 }
 0x9f6   :  { %3587 = vpow2.f32 %v1614_v41  ;;  %v1551_v41 = vmul.f32 0.5, %v1548_v21 }
 0x9f9   :  { %v3586_v26 = vpop.eup %3585 }
 0x9fa   :  { %v1576_v27 = vmul.f32 %v3586_v26, %v1559_v25  ;;  %vm1581_vm13 = vweird.f32 %v3586_v26 }
 0x9fb   :  { %vm1582_vm15 = vmor %vm1580_vm14, %vm1581_vm13 }
 0x9fc   :  { %v1577_v54 = vsub.f32 1.0, %v1576_v27  ;;  %v3588_v25 = vpop.eup %3587 }
 0x9fe   :  { %v1578_v18 = vmul.f32 %v3586_v26, %v1577_v54 }
 0xa00   :  { %v1579_v1 = vadd.f32 %v3586_v26, %v1578_v18  ;;  %v4810_v18 = vld [vmem:[%s5233_s5 + $0x10] ss:$0 sm:$0xff] }
 0xa02   :  { %v1583_v36 = vsel %vm1582_vm15, %v3586_v26, %v1579_v1  ;;  %v4828_v26 = vld [vmem:[%s5233_s5 + $0xf] ss:$0 sm:$0xff] }
 0xa03   :  { %v1588_v61 = vsel %vm1585_vm0, %v1587_v13, %v1583_v36  ;;  %5335 = vst [vmem:[#allocation16_spill] sm:$0xff] %v4828_v26 }
 0xa04   :  { %v1591_v17 = vmul.f32 1.0614054, %v1588_v61 }
 0xa06   :  { %v1593_v34 = vadd.f32 -1.4531521, %v1591_v17 }
 0xa08   :  { %v1595_v16 = vmul.f32 %v1593_v34, %v1588_v61 }
 0xa0a   :  { %v1597_v44 = vadd.f32 1.4214138, %v1595_v16  ;;  %v4837_v16 = vld [vmem:[%s5233_s5 + $0x12] ss:$0 sm:$0xff] }
 0xa0b   :  { %5336 = vst [vmem:[#allocation17_spill] sm:$0xff] %v4837_v16 }
 0xa0c   :  { %v1599_v12 = vmul.f32 %v1597_v44, %v1588_v61 }
 0xa0e   :  { %v1601_v27 = vadd.f32 -0.28449672, %v1599_v12 }
 0xa10   :  { %v1603_v54 = vmul.f32 %v1601_v27, %v1588_v61 }
 0xa12   :  { %v1605_v56 = vadd.f32 0.2548296, %v1603_v54  ;;  %v4842_v54 = vld [vmem:[%s5233_s5 + $0x16] ss:$0 sm:$0xff] }
 0xa13   :  { %5337 = vst [vmem:[#allocation18_spill] sm:$0xff] %v4842_v54 }
 0xa14   :  { %v1607_v38 = vmul.f32 %v1605_v56, %v1588_v61 }
 0xa16   :  { %v1617_v24 = vmul.f32 %v3588_v25, %v1607_v38  ;;  %v4822_v38 = vld [vmem:[%s5233_s5 + $0x13] ss:$0 sm:$0xff]  ;;  %v4848_v25 = vld [vmem:[%s5233_s5 + $0xe] ss:$0 sm:$0xff] }
 0xa17   :  { %5334 = vst [vmem:[#allocation15_spill] sm:$0xff] %v4822_v38 }
 0xa18   :  { %v1875_v36 = vpop.f32.mrf.mxu0  ;;  %v1619_v35 = vsub.f32 1.0, %v1617_v24  ;;  %5338 = vst [vmem:[#allocation14_spill] sm:$0xff] %v4848_v25 }
 0xa19   :  { %v1935_v13 = vpop.f32.mrf.mxu1 }
 0xa1a   :  { %v1936_v48 = vadd.f32 %v4810_v18, %v1935_v13  ;;  %v1623_v34 = vsub.f32 0.0, %v1619_v35 }
 0xa1c   :  { %3455 = vmatpush.xpose.msk.msrb.mxu0 %vm533_vm9, %v1936_v48  ;;  %v1625_v56 = vsel %vm1621_vm1, %v1623_v34, %v1619_v35  ;;  %v4856_v34 = vld [vmem:[%s5233_s5 + $0x11] ss:$0 sm:$0xff] }
 0xa1d   :  { %v1627_v44 = vadd.f32 1.0, %v1625_v56 }
 0xa1e   :  { %v1855_v12 = vpop.f32.mrf.mxu3 }
 0xa1f   :  { %v1856_v1 = vadd.f32 %v4816_v14, %v1855_v12  ;;  %v1629_v22 = vmul.f32 %v1627_v44, %v1551_v41  ;;  %v4862_v41 = vld [vmem:[%s5233_s5 + $0x15] ss:$0 sm:$0xff]  ;;  %v4867_v44 = vld [vmem:[%s5233_s5 + $0xd] ss:$0 sm:$0xff] }
 0xa20   :  { %v1915_v2 = vpop.f32.mrf.mxu0  ;;  %5339 = vst [vmem:[#allocation2_spill] sm:$0xff] %v4862_v41 }
 0xa21   :  { %v1995_v61 = vpop.f32.mrf.mxu1  ;;  %3456 = vmatmul.msk.f32.vlgmr.msrb.gmra.mxu0 %vm533_vm9, %v1856_v1  ;;  %1650 = vmatmul.f32.gmra.mxu2 %v1629_v22  ;;  %v1916_v17 = vadd.f32 %v4828_v26, %v1915_v2 }
 0xa22   :  { %v1996_v21 = vadd.f32 %v4822_v38, %v1995_v61  ;;  %v1876_v61 = vadd.f32 %v4867_v44, %v1875_v36 }
 0xa24   :  { %3461 = vmatpush.xpose.msk.msrb.mxu3 %vm533_vm9, %v1996_v21  ;;  %v4877_v21 = vld [vmem:[%s5233_s5 + $0x14] ss:$0 sm:$0xff] }
 0xa25   :  { %5340 = vst [vmem:[#allocation20_spill] sm:$0xff] %v4877_v21 }
 0xa26   :  { %v1895_v27 = vpop.f32.mrf.mxu3 }
 0xa27   :  { %3462 = vmatmul.msk.f32.vlgmr.msrb.gmra.mxu3 %vm533_vm9, %v1916_v17  ;;  %v1896_v56 = vadd.f32 %v4848_v25, %v1895_v27 }
 0xa28   :  { %v1975_v24 = vpop.f32.mrf.mxu0 }
 0xa29   :  { %v1976_v35 = vadd.f32 %v4837_v16, %v1975_v24  ;;  %v2055_v13 = vpop.f32.mrf.mxu1  ;;  %v4884_v24 = vld [vmem:[%s5233_s5 + $0x17] ss:$0 sm:$0xff] }
 0xa2a   :  { %v2056_v48 = vadd.f32 %v4842_v54, %v2055_v13  ;;  %5341 = vst [vmem:[#allocation21_spill] sm:$0xff] %v4884_v24 }
 0xa2b   :  { %3459 = vmatpush.xpose.msk.msra.mxu2 %vm533_vm9, %v1976_v35 }
 0xa2e   :  { %v1955_v12 = vpop.f32.mrf.mxu3  ;;  %3460 = vmatmul.msk.f32.vlgmr.msra.gmra.mxu2 %vm533_vm9, %v1896_v56 }
 0xa2f   :  { %2294 = vmatpush.msrb.mxu2 %v2056_v48  ;;  %v1956_v1 = vadd.f32 %v4856_v34, %v1955_v12 }
 0xa30   :  { %v2035_v22 = vpop.f32.mrf.mxu0 }
 0xa31   :  { %v2036_v2 = vadd.f32 %v4862_v41, %v2035_v22  ;;  %3457 = vmatpush.xpose.msk.msrb.mxu1 %vm533_vm9, %v1956_v1 }
 0xa34   :  { %3458 = vmatmul.msk.f32.vlgmr.msrb.gmra.mxu1 %vm533_vm9, %v1876_v61 }
 0xa35   :  { %2271 = vmatpush.msra.mxu1 %v2036_v2 }
 0xa36   :  { %v2015_v17 = vpop.f32.mrf.mxu3 }
 0xa37   :  { %v2016_v27 = vadd.f32 %v4877_v21, %v2015_v17 }
 0xa39   :  { %2248 = vmatpush.msra.mxu0 %v2016_v27 }
 0xa3e   :  { %v2075_v35 = vpop.f32.mrf.mxu3 }
 0xa3f   :  { %v2076_v36 = vadd.f32 %v4884_v24, %v2075_v35 }
 0xa41   :  { %2317 = vmatpush.msra.mxu3 %v2076_v36 }
 0xa9e   :  { %v2101_v13 = vpop.f32.mrf.mxu0 }
 0xa9f   :  { %v2182_v48 = vmul.f32 0.35355338, %v2101_v13 }
 0xaa1   :  { %v2186_v56 = vsel %vm533_vm9, %v2182_v48, -inf }
 0xaa2   :  { %2187 = vmax.xlane.f32.xlu0 %v2186_v56 }
 0xaa4   :  { %v1651_v12 = vpop.f32.mrf.mxu2 }
 0xaaa   :  { %v2179_v1 = vpop.f32.mrf.mxu3 }
 0xaab   :  { %v2185_v22 = vmul.f32 0.35355338, %v2179_v1 }
 0xaad   :  { %v2195_v2 = vsel %vm533_vm9, %v2185_v22, -inf }
 0xaae   :  { %2196 = vmax.xlane.f32.xlu2 %v2195_v2 }
 0xab1   :  { %v2153_v61 = vpop.f32.mrf.mxu2  ;;  %v2127_v54 = vpop.f32.mrf.mxu1 }
 0xab2   :  { %v2184_v17 = vmul.f32 0.35355338, %v2153_v61  ;;  %v2183_v26 = vmul.f32 0.35355338, %v2127_v54  ;;  %v5342_v54 = vperm.slane %v4322_v5, 3 }
 0xab4   :  { %v2192_v27 = vsel %vm533_vm9, %v2184_v17, -inf  ;;  %v2189_v35 = vsel %vm533_vm9, %v2183_v26, -inf  ;;  %v1652_v16 = vadd.f32 %v1651_v12, %v5342_v54 }
 0xab5   :  { %2193 = vmax.xlane.f32.xlu1 %v2192_v27 }
 0xabd   :  { %2190 = vmax.xlane.f32.xlu1 %v2189_v35 }
 0xb15   :  { %v2188_v36 = vpop.xlane.xlu0 %2187 }
 0xb16   :  { %v2198_v13 = vsub.f32 %v2182_v48, %v2188_v36  ;;  %v1655_v36 = vadd.f32 %v1652_v16, %v4480_v11 }
 0xb18   :  { %v2202_v24 = vmul.f32 1.442695, %v2198_v13 }
 0xb1a   :  { %3589 = vpow2.f32 %v2202_v24 }
 0xb20   :  { %v3590_v56 = vpop.eup %3589 }
 0xb21   :  { %v2197_v25 = vpop.xlane.xlu2 %2196  ;;  %v2210_v1 = vsel %vm533_vm9, %v3590_v56, 0.0 }
 0xb22   :  { %v2201_v41 = vsub.f32 %v2185_v22, %v2197_v25  ;;  %2211 = vadd.xlane.f32.xlu1 %v2210_v1 }
 0xb24   :  { %v2208_v2 = vmul.f32 1.442695, %v2201_v41 }
 0xb26   :  { %3591 = vpow2.f32 %v2208_v2 }
 0xb28   :  { %v2194_v61 = vpop.xlane.xlu1 %2193 }
 0xb29   :  { %v2200_v21 = vsub.f32 %v2184_v17, %v2194_v61 }
 0xb2b   :  { %v2206_v38 = vmul.f32 1.442695, %v2200_v21  ;;  %v1659_v21 = vsel %vm110_vm3, %v1655_v36, 0.0 }
 0xb2c   :  { %v3592_v27 = vpop.eup %3591 }
 0xb2d   :  { %3593 = vpow2.f32 %v2206_v38  ;;  %v2219_v48 = vsel %vm533_vm9, %v3592_v27, 0.0 }
 0xb2e   :  { %2220 = vadd.xlane.f32.xlu0 %v2219_v48 }
 0xb30   :  { %v2191_v24 = vpop.xlane.xlu1 %2190 }
 0xb31   :  { %v2199_v35 = vsub.f32 %v2183_v26, %v2191_v24 }
 0xb33   :  { %v3594_v13 = vpop.eup %3593  ;;  %v2204_v25 = vmul.f32 1.442695, %v2199_v35 }
 0xb34   :  { %v2216_v41 = vsel %vm533_vm9, %v3594_v13, 0.0 }
 0xb35   :  { %3595 = vpow2.f32 %v2204_v25  ;;  %2217 = vadd.xlane.f32.xlu2 %v2216_v41 }
 0xb36   :  { %1660 = vadd.xlane.f32.xlu0 %v1659_v21 }
 0xb3b   :  { %v3596_v22 = vpop.eup %3595 }
 0xb3c   :  { %v2213_v12 = vsel %vm533_vm9, %v3596_v22, 0.0 }
 0xb3d   :  { %2214 = vadd.xlane.f32.xlu2 %v2213_v12 }
 0xb95   :  { %v2212_v38 = vpop.xlane.xlu1 %2211 }
 0xb96   :  { %3597 = vrcp.f32 %v2212_v38 }
 0xb9c   :  { %v3598_v17 = vpop.eup %3597 }
 0xb9d   :  { %v2226_v1 = vmul.f32 %v3598_v17, %v3590_v56 }
 0xb9f   :  { %3463 = vmatmul.msk.f32.vlgmr.msra.gmra.mxu0 %vm533_vm9, %v2226_v1 }
 0xba1   :  { %v2221_v11 = vpop.xlane.xlu0 %2220 }
 0xba2   :  { %3599 = vrcp.f32 %v2221_v11 }
 0xba8   :  { %v3600_v26 = vpop.eup %3599  ;;  %v2218_v16 = vpop.xlane.xlu2 %2217 }
 0xba9   :  { %v2229_v2 = vmul.f32 %v3600_v26, %v3592_v27  ;;  %3601 = vrcp.f32 %v2218_v16  ;;  %v1661_v61 = vpop.xlane.xlu0 %1660 }
 0xbaa   :  { %v1663_v54 = vmul.f32 %v1661_v61, %v3766_v30 }
 0xbab   :  { %3466 = vmatmul.msk.f32.vlgmr.msra.gmra.mxu3 %vm533_vm9, %v2229_v2 }
 0xbac   :  { %v4902_v48 = vsub.f32 %v1655_v36, %v1663_v54  ;;  %v4912_v36 = vld [vmem:[%s5234_s6 + $0x20] sm:$0xff] }
 0xbad   :  { %2340 = vmatpush.msrb.mxu0 %v4912_v36 }
 0xbae   :  { %v1667_v24 = vmul.f32 %v4902_v48, %v4902_v48 }
 0xbaf   :  { %v3602_v35 = vpop.eup %3601  ;;  %2436 = vmatpush.msra.mxu0 %v4487_v19  ;;  %v4931_v19 = vld [vmem:[%s5234_s6 + $0x30] sm:$0xff] }
 0xbb0   :  { %v2228_v56 = vmul.f32 %v3602_v35, %v3594_v13  ;;  %v2215_v25 = vpop.xlane.xlu2 %2214  ;;  %v1671_v41 = vsel %vm110_vm3, %v1667_v24, 0.0  ;;  %v4922_v13 = vld [vmem:[%s5234_s6 + $0x38] sm:$0xff]  ;;  %2386 = vmatpush.msra.mxu2 %v4931_v19 }
 0xbb1   :  { %3603 = vrcp.f32 %v2215_v25  ;;  %1672 = vadd.xlane.f32.xlu1 %v1671_v41  ;;  %2437 = vmatpush.msra.mxu0 %v4505_v50  ;;  %v4938_v50 = vld [vmem:[%s5234_s6 + $0x28] sm:$0xff] }
 0xbb2   :  { %3465 = vmatmul.msk.f32.vlgmr.msrb.gmra.mxu2 %vm533_vm9, %v2228_v56  ;;  %2409 = vmatpush.msrb.mxu3 %v4922_v13 }
 0xbb3   :  { %2438 = vmatpush.msra.mxu0 %v4523_v63  ;;  %2476 = vmatpush.msrb.mxu2 %v4559_v40 }
 0xbb4   :  { %2496 = vmatpush.msra.mxu3 %v4564_v43  ;;  %2363 = vmatpush.msrb.mxu1 %v4938_v50 }
 0xbb5   :  { %2439 = vmatpush.msra.mxu0 %v4540_v9  ;;  %2477 = vmatpush.msrb.mxu2 %v4576_v45 }
 0xbb6   :  { %2497 = vmatpush.msra.mxu3 %v4581_v46 }
 0xbb7   :  { %v3604_v27 = vpop.eup %3603  ;;  %2478 = vmatpush.msrb.mxu2 %v4592_v32 }
 0xbb8   :  { %v2227_v21 = vmul.f32 %v3604_v27, %v3596_v22  ;;  %2498 = vmatpush.msra.mxu3 %v4597_v52  ;;  %v5344_v52 = vperm.slane %v4322_v5, 5  ;;  %v5356_v27 = vld [vmem:[#allocation17_spill] sm:$0xff] }
 0xbb9   :  { %2479 = vmatpush.msrb.mxu2 %v4611_v57  ;;  %v5346_v57 = vld [vmem:[#allocation5_spill] sm:$0xff] }
 0xbba   :  { %3464 = vmatmul.msk.f32.vlgmr.msra.gmra.mxu1 %vm533_vm9, %v2227_v21  ;;  %2499 = vmatpush.msra.mxu3 %v4616_v59  ;;  %v5347_v59 = vld [vmem:[#allocation11_spill] sm:$0xff] }
 0xbbb   :  { %2456 = vmatpush.msra.mxu1 %v4492_v20 }
 0xbbd   :  { %2457 = vmatpush.msra.mxu1 %v4510_v53 }
 0xbbf   :  { %2458 = vmatpush.msra.mxu1 %v4528_v15 }
 0xbc1   :  { %2459 = vmatpush.msra.mxu1 %v4545_v10 }
 0xc1c   :  { %v2250_v63 = vpop.f32.mrf.mxu0 }
 0xc1d   :  { %3467 = vmatmul.msk.f32.vlgmr.msrb.gmra.mxu0 %vm533_vm9, %v2250_v63  ;;  %v5357_v63 = vld [vmem:[#allocation15_spill] sm:$0xff] }
 0xc1e   :  { %2516 = vmatpush.msrb.mxu0 %v4497_v42 }
 0xc20   :  { %2517 = vmatpush.msrb.mxu0 %v4515_v58 }
 0xc22   :  { %2518 = vmatpush.msrb.mxu0 %v4533_v3 }
 0xc24   :  { %v1673_v20 = vpop.xlane.xlu1 %1672  ;;  %2519 = vmatpush.msrb.mxu0 %v4550_v37 }
 0xc25   :  { %v1675_v53 = vmul.f32 %v1673_v20, %v3766_v30 }
 0xc27   :  { %v1677_v9 = vadd.f32 1e-12, %v1675_v53  ;;  %v5358_v53 = vld [vmem:[#allocation20_spill] sm:$0xff] }
 0xc29   :  { %3605 = vrsqrt.f32 %v1677_v9  ;;  %vm1694_vm4 = vweird.f32 %v1677_v9 }
 0xc2e   :  { %v2319_v40 = vpop.f32.mrf.mxu3 }
 0xc2f   :  { %v3606_v43 = vpop.eup %3605  ;;  %3470 = vmatmul.msk.f32.vlgmr.msrb.gmra.mxu3 %vm533_vm9, %v2319_v40  ;;  %v5359_v40 = vld [vmem:[#allocation2_spill] sm:$0xff] }
 0xc30   :  { %v1689_v15 = vmul.f32 %v3606_v43, %v1677_v9  ;;  %2576 = vmatpush.msrb.mxu3 %v4569_v39  ;;  %vm1695_vm2 = vweird.f32 %v3606_v43 }
 0xc31   :  { %vm1696_vm5 = vmor %vm1694_vm4, %vm1695_vm2 }
 0xc32   :  { %v1690_v42 = vmul.f32 %v3606_v43, %v1689_v15  ;;  %2577 = vmatpush.msrb.mxu3 %v4586_v47  ;;  %v5343_v47 = vperm.slane %v4322_v5, 4  ;;  %v5345_v5 = vld [vmem:[#allocation6_spill] sm:$0xff]  ;;  %v5361_v15 = vld [vmem:[#allocation16_spill] sm:$0xff] }
 0xc34   :  { %v1691_v58 = vmul.f32 0.5, %v1690_v42  ;;  %2578 = vmatpush.msrb.mxu3 %v4605_v55 }
 0xc35   :  { %v2296_v3 = vpop.f32.mrf.mxu2 }
 0xc36   :  { %v1692_v10 = vsub.f32 1.5, %v1691_v58  ;;  %3469 = vmatmul.msk.f32.vlgmr.msra.gmra.mxu2 %vm533_vm9, %v2296_v3  ;;  %2579 = vmatpush.msrb.mxu3 %v4623_v62  ;;  %v5348_v62 = vld [vmem:[#allocation19_spill] sm:$0xff] }
 0xc37   :  { %v2273_v37 = vpop.f32.mrf.mxu1  ;;  %2556 = vmatpush.msra.mxu2 %v4646_v60  ;;  %v5350_v60 = vld [vmem:[#allocation3_spill] sm:$0xff] }
 0xc38   :  { %v1693_v45 = vmul.f32 %v3606_v43, %v1692_v10  ;;  %3468 = vmatmul.msk.f32.vlgmr.msrb.gmra.mxu1 %vm533_vm9, %v2273_v37  ;;  %v5362_v10 = vld [vmem:[#allocation18_spill] sm:$0xff] }
 0xc39   :  { %2536 = vmatpush.msrb.mxu1 %v4641_v29  ;;  %2557 = vmatpush.msra.mxu2 %v4668_v6  ;;  %v5349_v29 = vld [vmem:[#allocation7_spill] sm:$0xff]  ;;  %v5353_v6 = vld [vmem:[#allocation9_spill] sm:$0xff] }
 0xc3a   :  { %v1697_v39 = vsel %vm1696_vm5, %v3606_v43, %v1693_v45  ;;  %v5363_v45 = vld [vmem:[#allocation21_spill] sm:$0xff] }
 0xc3b   :  { %v1699_v46 = vmul.f32 %v1697_v39, %v4902_v48  ;;  %2537 = vmatpush.msrb.mxu1 %v4660_v7  ;;  %2558 = vmatpush.msra.mxu2 %v4686_v51  ;;  %v5351_v7 = vld [vmem:[#allocation13_spill] sm:$0xff]  ;;  %v5355_v51 = vld [vmem:[#allocation12_spill] sm:$0xff] }
 0xc3d   :  { %v1702_v32 = vmul.f32 %v5343_v47, %v1699_v46  ;;  %2538 = vmatpush.msrb.mxu1 %v4680_v23  ;;  %2559 = vmatpush.msra.mxu2 %v4706_v0  ;;  %v5354_v23 = vld [vmem:[#allocation4_spill] sm:$0xff] }
 0xc3f   :  { %v4974_v55 = vadd.f32 %v5344_v52, %v1702_v32  ;;  %2539 = vmatpush.msrb.mxu1 %v4698_v33 }
 0xc41   :  { %3471 = vmatmul.msk.f32.vlgmr.msra.gmra.mxu0 %vm110_vm3, %v4974_v55  ;;  %3472 = vmatmul.msk.f32.vlgmr.msra.gmra.mxu1 %vm110_vm3, %v4974_v55 }
 0xc42   :  { %3473 = vmatmul.msk.f32.vlgmr.msrb.gmra.mxu2 %vm110_vm3, %v4974_v55  ;;  %3474 = vmatmul.msk.f32.vlgmr.msra.gmra.mxu3 %vm110_vm3, %v4974_v55 }
 0xc43   :  { %2596 = vmatpush.msra.mxu0 %v4717_v4  ;;  %2616 = vmatpush.msra.mxu1 %v4726_v31 }
 0xc44   :  { %2636 = vmatpush.msrb.mxu2 %v4651_v8  ;;  %2656 = vmatpush.msra.mxu3 %v4771_v49  ;;  %v5352_v8 = vld [vmem:[#allocation8_spill] sm:$0xff] }
 0xc45   :  { %2597 = vmatpush.msra.mxu0 %v4734_v28  ;;  %2617 = vmatpush.msra.mxu1 %v5345_v5 }
 0xc46   :  { %2637 = vmatpush.msrb.mxu2 %v5346_v57  ;;  %2657 = vmatpush.msra.mxu3 %v5347_v59 }
 0xc47   :  { %2598 = vmatpush.msra.mxu0 %v5348_v62  ;;  %2618 = vmatpush.msra.mxu1 %v5349_v29 }
 0xc48   :  { %2638 = vmatpush.msrb.mxu2 %v5350_v60  ;;  %2658 = vmatpush.msra.mxu3 %v5351_v7 }
 0xc49   :  { %3475 = vmatmul.msk.f32.vlgmr.msrb.gmra.mxu0 %vm110_vm3, %v4974_v55  ;;  %3476 = vmatmul.msk.f32.vlgmr.msrb.gmra.mxu1 %vm110_vm3, %v4974_v55 }
 0xc4a   :  { %3477 = vmatmul.msk.f32.vlgmr.msra.gmra.mxu2 %vm110_vm3, %v4974_v55  ;;  %3478 = vmatmul.msk.f32.vlgmr.msrb.gmra.mxu3 %vm110_vm3, %v4974_v55 }
 0xc4b   :  { %2599 = vmatpush.msra.mxu0 %v5352_v8  ;;  %2619 = vmatpush.msra.mxu1 %v5353_v6 }
 0xc4c   :  { %2639 = vmatpush.msrb.mxu2 %v5354_v23  ;;  %2659 = vmatpush.msra.mxu3 %v5355_v51 }
 0xc51   :  { %3479 = vmatmul.msk.f32.vlgmr.msra.gmra.mxu0 %vm110_vm3, %v4974_v55  ;;  %3480 = vmatmul.msk.f32.vlgmr.msra.gmra.mxu1 %vm110_vm3, %v4974_v55 }
 0xc52   :  { %3481 = vmatmul.msk.f32.vlgmr.msrb.gmra.mxu2 %vm110_vm3, %v4974_v55  ;;  %3482 = vmatmul.msk.f32.vlgmr.msra.gmra.mxu3 %vm110_vm3, %v4974_v55 }
 0xc9a   :  { %v2342_v33 = vpop.f32.mrf.mxu0 }
 0xc9b   :  { %v2414_v4 = vsel %vm110_vm3, %v2342_v33, 0.0 }
 0xcb2   :  { %v2411_v49 = vpop.f32.mrf.mxu3 }
 0xcb3   :  { %v2419_v17 = vsel %vm110_vm3, %v2411_v49, 0.0 }
 0xcb5   :  { %v2365_v0 = vpop.f32.mrf.mxu1 }
 0xcb6   :  { %v2415_v31 = vsel %vm110_vm3, %v2365_v0, 0.0 }
 0xcb7   :  { %v2416_v28 = vadd.f32 %v2415_v31, %v2414_v4 }
 0xcb9   :  { %v2388_v22 = vpop.f32.mrf.mxu2 }
 0xcba   :  { %v2417_v12 = vsel %vm110_vm3, %v2388_v22, 0.0 }
 0xcbb   :  { %v2418_v38 = vadd.f32 %v2417_v12, %v2416_v28  ;;  %v5055_v28 = vld [vmem:[%s5235_s7 + $0x8] sm:$0x3f] }
 0xcbc   :  { %v3007_v22 = vperm.slane %v5055_v28, 0 }
 0xcbd   :  { %v5021_v1 = vadd.f32 %v2419_v17, %v2418_v38 }
 0xcbe   :  { %v2441_v11 = vpop.f32.mrf.mxu0  ;;  %v2461_v26 = vpop.f32.mrf.mxu1 }
 0xcbf   :  { %v2442_v35 = vadd.f32 %v4816_v14, %v2441_v11  ;;  %v2462_v56 = vadd.f32 %v4867_v44, %v2461_v26  ;;  %v5360_v14 = vld [vmem:[#allocation14_spill] sm:$0xff] }
 0xcc5   :  { %v2481_v16 = vpop.f32.mrf.mxu2  ;;  %v2501_v2 = vpop.f32.mrf.mxu3 }
 0xcc6   :  { %v2521_v61 = vpop.f32.mrf.mxu0  ;;  %v2541_v54 = vpop.f32.mrf.mxu1  ;;  %v2482_v44 = vadd.f32 %v5360_v14, %v2481_v16  ;;  %v2502_v42 = vadd.f32 %v5361_v15, %v2501_v2  ;;  %v3008_v16 = vadd.f32 %v3007_v22, %v5021_v1 }
 0xcc7   :  { %v2522_v48 = vadd.f32 %v4810_v18, %v2521_v61  ;;  %v2542_v24 = vadd.f32 %v4856_v34, %v2541_v54  ;;  %v5364_v61 = vld [vmem:[#allocation10_spill] sm:$0xff] }
 0xcc8   :  { %v3010_v54 = vadd.f32 %v3008_v16, %v5364_v61  ;;  %v3441_v16 = vld [vmem:[%s5238_s10 + $0xf0] sm:$0xff]  ;;  %v5117_v61 = vld [vmem:[%s5237_s9 + $0x1] ss:$0 sm:$0xff] }
 0xcc9   :  { %3483 = vmatpush.xpose.msk.msrb.mxu0 %vm533_vm9, %v2522_v48  ;;  %3485 = vmatpush.xpose.msk.msrb.mxu1 %vm533_vm9, %v2542_v24 }
 0xccc   :  { %3484 = vmatmul.msk.f32.vlgmr.msrb.gmra.mxu0 %vm533_vm9, %v2442_v35  ;;  %3486 = vmatmul.msk.f32.vlgmr.msrb.gmra.mxu1 %vm533_vm9, %v2462_v56  ;;  %v3012_v35 = vsel %vm110_vm3, %v3010_v54, 0.0 }
 0xccd   :  { %v2561_v25 = vpop.f32.mrf.mxu2  ;;  %v2581_v41 = vpop.f32.mrf.mxu3 }
 0xcce   :  { %v2562_v21 = vadd.f32 %v5356_v27, %v2561_v25  ;;  %v2582_v18 = vadd.f32 %v5357_v63, %v2581_v41  ;;  %v2601_v20 = vpop.f32.mrf.mxu0  ;;  %v2621_v34 = vpop.f32.mrf.mxu1 }
 0xccf   :  { %v2602_v9 = vadd.f32 %v5358_v53, %v2601_v20  ;;  %v2622_v43 = vadd.f32 %v5359_v40, %v2621_v34 }
 0xcd0   :  { %3487 = vmatpush.xpose.msk.msra.mxu2 %vm533_vm9, %v2562_v21  ;;  %3489 = vmatpush.xpose.msk.msrb.mxu3 %vm533_vm9, %v2582_v18 }
 0xcd1   :  { %2834 = vmatpush.msra.mxu0 %v2602_v9  ;;  %2857 = vmatpush.msra.mxu1 %v2622_v43 }
 0xcd3   :  { %2926 = vmatpush.msrb.mxu0 %v4912_v36  ;;  %2949 = vmatpush.msrb.mxu1 %v4938_v50 }
 0xcd4   :  { %3488 = vmatmul.msk.f32.vlgmr.msra.gmra.mxu2 %vm533_vm9, %v2482_v44  ;;  %3490 = vmatmul.msk.f32.vlgmr.msrb.gmra.mxu3 %vm533_vm9, %v2502_v42  ;;  %v3425_v42 = vld [vmem:[%s5236_s8 + $0x38] sm:$0xff] }
 0xcd5   :  { %v2641_v58 = vpop.f32.mrf.mxu2  ;;  %v2661_v3 = vpop.f32.mrf.mxu3 }
 0xcd6   :  { %v2642_v37 = vadd.f32 %v5362_v10, %v2641_v58  ;;  %v2662_v39 = vadd.f32 %v5363_v45, %v2661_v3  ;;  %v3424_v3 = vld [vmem:[%s5236_s8 + $0x30] sm:$0xff]  ;;  %v3423_v10 = vld [vmem:[%s5236_s8 + $0x28] sm:$0xff] }
 0xcd8   :  { %2880 = vmatpush.msrb.mxu2 %v2642_v37  ;;  %2903 = vmatpush.msra.mxu3 %v2662_v39  ;;  %v3422_v37 = vld [vmem:[%s5236_s8 + $0x20] sm:$0xff] }
 0xcda   :  { %2972 = vmatpush.msra.mxu2 %v4931_v19  ;;  %2995 = vmatpush.msrb.mxu3 %v4922_v13 }
 0xd49   :  { %v2687_v46 = vpop.f32.mrf.mxu0  ;;  %v2713_v62 = vpop.f32.mrf.mxu1 }
 0xd4a   :  { %v2768_v36 = vmul.f32 0.35355338, %v2687_v46  ;;  %v2769_v29 = vmul.f32 0.35355338, %v2713_v62 }
 0xd4c   :  { %v2772_v50 = vsel %vm533_vm9, %v2768_v36, -inf  ;;  %v2775_v19 = vsel %vm533_vm9, %v2769_v29, -inf }
 0xd4d   :  { %2773 = vmax.xlane.f32.xlu1 %v2772_v50 }
 0xd57   :  { %v2739_v47 = vpop.f32.mrf.mxu2  ;;  %v2765_v32 = vpop.f32.mrf.mxu3 }
 0xd58   :  { %v2770_v52 = vmul.f32 0.35355338, %v2739_v47  ;;  %v2771_v5 = vmul.f32 0.35355338, %v2765_v32 }
 0xd5a   :  { %v2781_v57 = vsel %vm533_vm9, %v2771_v5, -inf  ;;  %v2778_v59 = vsel %vm533_vm9, %v2770_v52, -inf }
 0xd5b   :  { %2782 = vmax.xlane.f32.xlu0 %v2781_v57  ;;  %2779 = vmax.xlane.f32.xlu2 %v2778_v59 }
 0xd63   :  { %2776 = vmax.xlane.f32.xlu2 %v2775_v19 }
 0xdc0   :  { %v2774_v13 = vpop.xlane.xlu1 %2773 }
 0xdc1   :  { %v2784_v60 = vsub.f32 %v2768_v36, %v2774_v13  ;;  %v3059_v13 = vperm.slane %v5055_v28, 2 }
 0xdc3   :  { %v2788_v7 = vmul.f32 1.442695, %v2784_v60 }
 0xdc5   :  { %3607 = vpow2.f32 %v2788_v7 }
 0xdcb   :  { %v3608_v8 = vpop.eup %3607 }
 0xdcc   :  { %v2796_v6 = vsel %vm533_vm9, %v3608_v8, 0.0 }
 0xdcd   :  { %2797 = vadd.xlane.f32.xlu2 %v2796_v6 }
 0xdce   :  { %v2783_v23 = vpop.xlane.xlu0 %2782  ;;  %v2780_v51 = vpop.xlane.xlu2 %2779 }
 0xdcf   :  { %v2787_v33 = vsub.f32 %v2771_v5, %v2783_v23  ;;  %v2786_v0 = vsub.f32 %v2770_v52, %v2780_v51 }
 0xdd1   :  { %v2794_v4 = vmul.f32 1.442695, %v2787_v33  ;;  %v2792_v31 = vmul.f32 1.442695, %v2786_v0 }
 0xdd3   :  { %3609 = vpow2.f32 %v2794_v4 }
 0xdd4   :  { %3611 = vpow2.f32 %v2792_v31 }
 0xdd6   :  { %v2777_v49 = vpop.xlane.xlu2 %2776 }
 0xdd7   :  { %v2785_v12 = vsub.f32 %v2769_v29, %v2777_v49  ;;  %v3056_v29 = vperm.slane %v5055_v28, 1 }
 0xdd9   :  { %v3610_v38 = vpop.eup %3609  ;;  %v2790_v17 = vmul.f32 1.442695, %v2785_v12 }
 0xdda   :  { %v3612_v11 = vpop.eup %3611  ;;  %v2805_v26 = vsel %vm533_vm9, %v3610_v38, 0.0 }
 0xddb   :  { %3613 = vpow2.f32 %v2790_v17  ;;  %v2802_v2 = vsel %vm533_vm9, %v3612_v11, 0.0  ;;  %2806 = vadd.xlane.f32.xlu1 %v2805_v26 }
 0xddc   :  { %2803 = vadd.xlane.f32.xlu0 %v2802_v2 }
 0xde1   :  { %v3614_v48 = vpop.eup %3613 }
 0xde2   :  { %v2799_v24 = vsel %vm533_vm9, %v3614_v48, 0.0 }
 0xde3   :  { %3013 = vadd.xlane.f32.xlu1 %v3012_v35  ;;  %v3438_v35 = vld [vmem:[%s5238_s10 + $0xd8] sm:$0xff] }
 0xde4   :  { %2800 = vadd.xlane.f32.xlu0 %v2799_v24 }
 0xe40   :  { %v2798_v56 = vpop.xlane.xlu2 %2797 }
 0xe41   :  { %3615 = vrcp.f32 %v2798_v56 }
 0xe47   :  { %v3616_v25 = vpop.eup %3615 }
 0xe48   :  { %v2812_v41 = vmul.f32 %v3616_v25, %v3608_v8  ;;  %v3437_v25 = vld [vmem:[%s5238_s10 + $0xd0] sm:$0xff] }
 0xe4a   :  { %3491 = vmatmul.msk.f32.vlgmr.msra.gmra.mxu0 %vm533_vm9, %v2812_v41 }
 0xe4b   :  { %3083 = vmatpush.msra.mxu0 %v3425_v42 }
 0xe4d   :  { %3084 = vmatpush.msra.mxu0 %v3424_v3  ;;  %v3428_v3 = vld [vmem:[%s5238_s10 + $0x88] sm:$0xff] }
 0xe4e   :  { %v2807_v1 = vpop.xlane.xlu1 %2806 }
 0xe4f   :  { %v2804_v27 = vpop.xlane.xlu0 %2803  ;;  %3617 = vrcp.f32 %v2807_v1  ;;  %3085 = vmatpush.msra.mxu0 %v3423_v10  ;;  %v3436_v1 = vld [vmem:[%s5238_s10 + $0xc8] sm:$0xff]  ;;  %v3427_v10 = vld [vmem:[%s5238_s10 + $0x80] sm:$0xff] }
 0xe50   :  { %3619 = vrcp.f32 %v2804_v27 }
 0xe51   :  { %3086 = vmatpush.msra.mxu0 %v3422_v37 }
 0xe55   :  { %v3618_v21 = vpop.eup %3617 }
 0xe56   :  { %v3620_v63 = vpop.eup %3619  ;;  %v2815_v18 = vmul.f32 %v3618_v21, %v3610_v38  ;;  %v3014_v20 = vpop.xlane.xlu1 %3013  ;;  %v3435_v21 = vld [vmem:[%s5238_s10 + $0xc0] sm:$0xff] }
 0xe57   :  { %v2814_v34 = vmul.f32 %v3620_v63, %v3612_v11  ;;  %v2801_v53 = vpop.xlane.xlu0 %2800  ;;  %v3018_v9 = vmul.f32 %v3014_v20, %v3766_v30  ;;  %v3442_v11 = vld [vmem:[%s5238_s10 + $0xf8] sm:$0xff]  ;;  %v3433_v20 = vld [vmem:[%s5238_s10 + $0xb0] sm:$0xff] }
 0xe58   :  { %3621 = vrcp.f32 %v2801_v53  ;;  %3494 = vmatmul.msk.f32.vlgmr.msra.gmra.mxu3 %vm533_vm9, %v2815_v18  ;;  %v3434_v18 = vld [vmem:[%s5238_s10 + $0xb8] sm:$0xff]  ;;  %v3431_v53 = vld [vmem:[%s5238_s10 + $0xa0] sm:$0xff] }
 0xe59   :  { %v3020_v40 = vsub.f32 %v3010_v54, %v3018_v9  ;;  %3493 = vmatmul.msk.f32.vlgmr.msrb.gmra.mxu2 %vm533_vm9, %v2814_v34  ;;  %v3440_v54 = vld [vmem:[%s5238_s10 + $0xe8] sm:$0xff] }
 0xe5a   :  { %v3432_v34 = vld [vmem:[%s5238_s10 + $0xa8] sm:$0xff] }
 0xe5b   :  { %v3022_v43 = vmul.f32 %v3020_v40, %v3020_v40 }
 0xe5d   :  { %v3024_v14 = vsel %vm110_vm3, %v3022_v43, 0.0  ;;  %v3430_v43 = vld [vmem:[%s5238_s10 + $0x98] sm:$0xff] }
 0xe5e   :  { %v3622_v44 = vpop.eup %3621  ;;  %3025 = vadd.xlane.f32.xlu0 %v3024_v14 }
 0xe5f   :  { %v2813_v15 = vmul.f32 %v3622_v44, %v3614_v48  ;;  %v3429_v44 = vld [vmem:[%s5238_s10 + $0x90] sm:$0xff] }
 0xe61   :  { %3492 = vmatmul.msk.f32.vlgmr.msra.gmra.mxu1 %vm533_vm9, %v2813_v15 }
 0xe62   :  { %3175 = vmatpush.msra.mxu1 %v3442_v11 }
 0xe64   :  { %3176 = vmatpush.msra.mxu1 %v3441_v16  ;;  %v3174_v16 = vperm.slane %v5055_v28, 3 }
 0xe66   :  { %3177 = vmatpush.msra.mxu1 %v3440_v54 }
 0xec7   :  { %v2836_v58 = vpop.f32.mrf.mxu0 }
 0xec8   :  { %3495 = vmatmul.msk.f32.vlgmr.msrb.gmra.mxu0 %vm533_vm9, %v2836_v58 }
 0xed1   :  { %v3026_v45 = vpop.xlane.xlu0 %3025 }
 0xed2   :  { %v3030_v39 = vmul.f32 %v3026_v45, %v3766_v30 }
 0xed4   :  { %v3032_v46 = vadd.f32 1e-12, %v3030_v39 }
 0xed6   :  { %3623 = vrsqrt.f32 %v3032_v46  ;;  %vm3040_vm7 = vweird.f32 %v3032_v46 }
 0xedb   :  { %v2905_v36 = vpop.f32.mrf.mxu3 }
 0xedc   :  { %v3624_v50 = vpop.eup %3623  ;;  %v2882_v47 = vpop.f32.mrf.mxu2  ;;  %3498 = vmatmul.msk.f32.vlgmr.msrb.gmra.mxu3 %vm533_vm9, %v2905_v36 }
 0xedd   :  { %v3035_v32 = vmul.f32 %v3624_v50, %v3032_v46  ;;  %3497 = vmatmul.msk.f32.vlgmr.msra.gmra.mxu2 %vm533_vm9, %v2882_v47  ;;  %vm3041_vm6 = vweird.f32 %v3624_v50 }
 0xede   :  { %v2859_v52 = vpop.f32.mrf.mxu1  ;;  %vm3042_vm8 = vmor %vm3040_vm7, %vm3041_vm6 }
 0xedf   :  { %v3036_v5 = vmul.f32 %v3624_v50, %v3035_v32  ;;  %3496 = vmatmul.msk.f32.vlgmr.msrb.gmra.mxu1 %vm533_vm9, %v2859_v52 }
 0xee1   :  { %v3037_v57 = vmul.f32 0.5, %v3036_v5 }
 0xee3   :  { %v3038_v59 = vsub.f32 1.5, %v3037_v57 }
 0xee5   :  { %v3039_v62 = vmul.f32 %v3624_v50, %v3038_v59 }
 0xee7   :  { %v3043_v19 = vsel %vm3042_vm8, %v3624_v50, %v3039_v62 }
 0xee8   :  { %v3054_v60 = vmul.f32 %v3043_v19, %v3020_v40 }
 0xeea   :  { %v3057_v7 = vmul.f32 %v3056_v29, %v3054_v60 }
 0xeec   :  { %v5095_v8 = vadd.f32 %v3059_v13, %v3057_v7 }
 0xeee   :  { %3499 = vmatmul.msk.f32.vlgmr.msra.gmra.mxu0 %vm110_vm3, %v5095_v8 }
 0xf45   :  { %v2928_v6 = vpop.f32.mrf.mxu0 }
 0xf46   :  { %v3000_v33 = vsel %vm110_vm3, %v2928_v6, 0.0 }
 0xf5c   :  { %v2951_v23 = vpop.f32.mrf.mxu1 }
 0xf5d   :  { %v3001_v51 = vsel %vm110_vm3, %v2951_v23, 0.0 }
 0xf5e   :  { %v3002_v0 = vadd.f32 %v3001_v51, %v3000_v33 }
 0xf5f   :  { %v2997_v31 = vpop.f32.mrf.mxu3 }
 0xf60   :  { %v2974_v4 = vpop.f32.mrf.mxu2  ;;  %v3005_v38 = vsel %vm110_vm3, %v2997_v31, 0.0 }
 0xf61   :  { %v3003_v49 = vsel %vm110_vm3, %v2974_v4, 0.0 }
 0xf62   :  { %v3004_v12 = vadd.f32 %v3003_v49, %v3002_v0 }
 0xf64   :  { %v3006_v17 = vadd.f32 %v3005_v38, %v3004_v12 }
 0xf66   :  { %v3009_v26 = vadd.f32 %v3007_v22, %v3006_v17 }
 0xf68   :  { %v5112_v2 = vadd.f32 %v3009_v26, %v4974_v55  ;;  %v3439_v55 = vld [vmem:[%s5238_s10 + $0xe0] sm:$0xff] }
 0xf69   :  { %3178 = vmatpush.msra.mxu1 %v3439_v55 }
 0xf6a   :  { %v3015_v22 = vsel %vm110_vm3, %v5112_v2, 0.0 }
 0xf6b   :  { %3016 = vadd.xlane.f32.xlu2 %v3015_v22  ;;  %v3088_v48 = vpop.f32.mrf.mxu0  ;;  %3179 = vmatpush.msra.mxu1 %v3438_v35 }
 0xf6c   :  { %v5128_v24 = vadd.f32 %v5117_v61, %v3088_v48 }
 0xf6d   :  { %3180 = vmatpush.msra.mxu1 %v3437_v25 }
 0xf6e   :  { %v3096_v56 = vmul.f32 0.70710677, %v5128_v24  ;;  %v3094_v4 = vmul.f32 0.5, %v5128_v24 }
 0xf6f   :  { %3181 = vmatpush.msra.mxu1 %v3436_v1 }
 0xf70   :  { %v3098_v41 = vand.u32 2147483647, %v3096_v56  ;;  %vm3164_vm13 = vcmp.lt.f32.partialorder %v3096_v56, 0.0 }
 0xf71   :  { %3182 = vmatpush.msra.mxu1 %v3435_v21 }
 0xf72   :  { %v3100_v27 = vmul.f32 0.3275911, %v3098_v41  ;;  %v3152_v36 = vsub.f32 0.0, %v3098_v41 }
 0xf73   :  { %3183 = vmatpush.msra.mxu1 %v3434_v18 }
 0xf74   :  { %v3102_v63 = vadd.f32 1.0, %v3100_v27  ;;  %v3154_v32 = vmul.f32 %v3152_v36, %v3098_v41 }
 0xf75   :  { %3184 = vmatpush.msra.mxu1 %v3433_v20 }
 0xf76   :  { %3625 = vrcp.f32 %v3102_v63  ;;  %v3115_v15 = vand.u32 2147483648, %v3102_v63  ;;  %v3113_v58 = vand.u32 2147483647, %v3102_v63  ;;  %vm3109_vm10 = vweird.f32 %v3102_v63 }
 0xf77   :  { %3185 = vmatpush.msra.mxu1 %v3432_v34  ;;  %v3156_v57 = vmul.f32 1.442695, %v3154_v32 }
 0xf78   :  { %v3116_v45 = vor.u32 1.1754944e-38, %v3115_v15  ;;  %vm3114_vm12 = vcmp.eq.f32.partialorder %v3113_v58, 8.507059e+37 }
 0xf79   :  { %3186 = vmatpush.msra.mxu1 %v3431_v53  ;;  %3627 = vpow2.f32 %v3156_v57  ;;  %v3251_v57 = vld [vmem:[%s5239_s11 + $0x8] sm:$0xff] }
 0xf7b   :  { %3187 = vmatpush.msra.mxu1 %v3430_v43 }
 0xf7c   :  { %v3626_v9 = vpop.eup %3625 }
 0xf7d   :  { %v3105_v40 = vmul.f32 %v3626_v9, %v3102_v63  ;;  %3188 = vmatpush.msra.mxu1 %v3429_v44  ;;  %vm3110_vm9 = vweird.f32 %v3626_v9 }
 0xf7e   :  { %vm3111_vm11 = vmor %vm3109_vm10, %vm3110_vm9  ;;  %vm3287_vm10 = vcmask 15360  }
 0xf7f   :  { %v3106_v14 = vsub.f32 1.0, %v3105_v40  ;;  %3189 = vmatpush.msra.mxu1 %v3428_v3  ;;  %v3628_v6 = vpop.eup %3627 }
 0xf81   :  { %v3107_v42 = vmul.f32 %v3626_v9, %v3106_v14  ;;  %3190 = vmatpush.msra.mxu1 %v3427_v10 }
 0xf83   :  { %v3108_v37 = vadd.f32 %v3626_v9, %v3107_v42 }
 0xf85   :  { %v3112_v39 = vsel %vm3111_vm11, %v3626_v9, %v3108_v37 }
 0xf86   :  { %v3117_v46 = vsel %vm3114_vm12, %v3116_v45, %v3112_v39 }
 0xf87   :  { %v3134_v50 = vmul.f32 1.0614054, %v3117_v46 }
 0xf89   :  { %v3136_v47 = vadd.f32 -1.4531521, %v3134_v50 }
 0xf8b   :  { %v3138_v52 = vmul.f32 %v3136_v47, %v3117_v46 }
 0xf8d   :  { %v3140_v5 = vadd.f32 1.4214138, %v3138_v52  ;;  %v3252_v52 = vld [vmem:[%s5239_s11 + $0x10] sm:$0xff] }
 0xf8f   :  { %v3142_v59 = vmul.f32 %v3140_v5, %v3117_v46 }
 0xf91   :  { %v3144_v62 = vadd.f32 -0.28449672, %v3142_v59  ;;  %v3250_v59 = vld [vmem:[%s5239_s11] sm:$0xff] }
 0xf93   :  { %v3146_v19 = vmul.f32 %v3144_v62, %v3117_v46 }
 0xf95   :  { %v3148_v60 = vadd.f32 0.2548296, %v3146_v19 }
 0xf97   :  { %v3150_v7 = vmul.f32 %v3148_v60, %v3117_v46 }
 0xf99   :  { %v3160_v23 = vmul.f32 %v3628_v6, %v3150_v7 }
 0xf9b   :  { %v3162_v51 = vsub.f32 1.0, %v3160_v23 }
 0xf9d   :  { %v3166_v33 = vsub.f32 0.0, %v3162_v51 }
 0xf9f   :  { %v3168_v0 = vsel %vm3164_vm13, %v3166_v33, %v3162_v51 }
 0xfa0   :  { %v3170_v31 = vadd.f32 1.0, %v3168_v0 }
 0xfa2   :  { %v3172_v49 = vmul.f32 %v3170_v31, %v3094_v4 }
 0xfa4   :  { %3191 = vmatmul.f32.vlgmr.msra.gmra.mxu1 %v3172_v49 }
 0xfde   :  { %v3017_v12 = vpop.xlane.xlu2 %3016 }
 0xfdf   :  { %v3019_v38 = vmul.f32 %v3017_v12, %v3766_v30 }
 0xfe1   :  { %v3021_v17 = vsub.f32 %v5112_v2, %v3019_v38 }
 0xfe3   :  { %v3023_v11 = vmul.f32 %v3021_v17, %v3021_v17 }
 0xfe5   :  { %v3027_v26 = vsel %vm110_vm3, %v3023_v11, 0.0 }
 0xfe6   :  { %3028 = vadd.xlane.f32.xlu1 %v3027_v26 }
0x1021   :  { %v3192_v54 = vpop.f32.mrf.mxu1 }
0x1022   :  { %v3193_v22 = vadd.f32 %v3192_v54, %v3174_v16 }
0x1024   :  { %v3198_v48 = vadd.f32 %v3193_v22, %v5095_v8 }
0x1026   :  { %v3200_v55 = vsel %vm110_vm3, %v3198_v48, 0.0 }
0x1027   :  { %3201 = vadd.xlane.f32.xlu2 %v3200_v55 }
0x1059   :  { %v3029_v24 = vpop.xlane.xlu1 %3028 }
0x105a   :  { %v3031_v35 = vmul.f32 %v3029_v24, %v3766_v30 }
0x105c   :  { %v3033_v56 = vadd.f32 1e-12, %v3031_v35 }
0x105e   :  { %3629 = vrsqrt.f32 %v3033_v56  ;;  %vm3050_vm15 = vweird.f32 %v3033_v56 }
0x1064   :  { %v3630_v2 = vpop.eup %3629 }
0x1065   :  { %v3045_v25 = vmul.f32 %v3630_v2, %v3033_v56  ;;  %vm3051_vm14 = vweird.f32 %v3630_v2 }
0x1066   :  { %vm3052_vm0 = vmor %vm3050_vm15, %vm3051_vm14 }
0x1067   :  { %v3046_v41 = vmul.f32 %v3630_v2, %v3045_v25 }
0x1069   :  { %v3047_v1 = vmul.f32 0.5, %v3046_v41  ;;  %v3244_v41 = vperm.slane %v5055_v28, 4 }
0x106b   :  { %v3048_v27 = vsub.f32 1.5, %v3047_v1 }
0x106d   :  { %v3049_v21 = vmul.f32 %v3630_v2, %v3048_v27 }
0x106f   :  { %v3053_v63 = vsel %vm3052_vm0, %v3630_v2, %v3049_v21  ;;  %v3247_v21 = vperm.slane %v5055_v28, 5 }
0x1070   :  { %v3055_v18 = vmul.f32 %v3053_v63, %v3021_v17 }
0x1072   :  { %v3058_v8 = vmul.f32 %v3056_v29, %v3055_v18 }
0x1074   :  { %v5181_v20 = vadd.f32 %v3059_v13, %v3058_v8 }
0x1076   :  { %3500 = vmatmul.msk.f32.gmra.mxu0 %vm110_vm3, %v5181_v20 }
0x109a   :  { %v3202_v34 = vpop.xlane.xlu2 %3201 }
0x109b   :  { %v3206_v53 = vmul.f32 %v3202_v34, %v3766_v30 }
0x109d   :  { %v5186_v9 = vsub.f32 %v3198_v48, %v3206_v53 }
0x109f   :  { %v3210_v40 = vmul.f32 %v5186_v9, %v5186_v9 }
0x10a1   :  { %v3212_v43 = vsel %vm110_vm3, %v3210_v40, 0.0 }
0x10a2   :  { %3213 = vadd.xlane.f32.xlu1 %v3212_v43 }
0x10f3   :  { %v3091_v14 = vpop.f32.mrf.mxu0 }
0x10f4   :  { %v3092_v29 = vadd.f32 %v5117_v61, %v3091_v14  ;;  %v3253_v61 = vld [vmem:[%s5239_s11 + $0x18] sm:$0xff]  ;;  %v3536_v14 = vld [vmem:[%s5240_s12] ss:$0 sm:$0xff] }
0x10f5   :  { %3276 = vmatpush.msrb.mxu2 %v3253_v61 }
0x10f6   :  { %v3097_v44 = vmul.f32 0.70710677, %v3092_v29  ;;  %v3095_v56 = vmul.f32 0.5, %v3092_v29 }
0x10f7   :  { %3277 = vmatpush.msrb.mxu2 %v3252_v52 }
0x10f8   :  { %v3099_v13 = vand.u32 2147483647, %v3097_v44  ;;  %vm3165_vm6 = vcmp.lt.f32.partialorder %v3097_v44, 0.0 }
0x10f9   :  { %3278 = vmatpush.msrb.mxu2 %v3251_v57 }
0x10fa   :  { %v3101_v15 = vmul.f32 0.3275911, %v3099_v13  ;;  %v3153_v50 = vsub.f32 0.0, %v3099_v13 }
0x10fb   :  { %3279 = vmatpush.msrb.mxu2 %v3250_v59 }
0x10fc   :  { %v3103_v42 = vadd.f32 1.0, %v3101_v15  ;;  %v3155_v62 = vmul.f32 %v3153_v50, %v3099_v13 }
0x10fe   :  { %3631 = vrcp.f32 %v3103_v42  ;;  %v3130_v37 = vand.u32 2147483648, %v3103_v42  ;;  %v3128_v39 = vand.u32 2147483647, %v3103_v42  ;;  %vm3124_vm2 = vweird.f32 %v3103_v42 }
0x10ff   :  { %v3158_v7 = vmul.f32 1.442695, %v3155_v62 }
0x1100   :  { %v3131_v36 = vor.u32 1.1754944e-38, %v3130_v37  ;;  %vm3129_vm5 = vcmp.eq.f32.partialorder %v3128_v39, 8.507059e+37 }
0x1101   :  { %3633 = vpow2.f32 %v3158_v7 }
0x1104   :  { %v3632_v58 = vpop.eup %3631 }
0x1105   :  { %v3120_v3 = vmul.f32 %v3632_v58, %v3103_v42  ;;  %vm3125_vm1 = vweird.f32 %v3632_v58 }
0x1106   :  { %vm3126_vm4 = vmor %vm3124_vm2, %vm3125_vm1 }
0x1107   :  { %v3121_v10 = vsub.f32 1.0, %v3120_v3  ;;  %v3634_v12 = vpop.eup %3633 }
0x1109   :  { %v3122_v45 = vmul.f32 %v3632_v58, %v3121_v10 }
0x110b   :  { %v3123_v46 = vadd.f32 %v3632_v58, %v3122_v45 }
0x110d   :  { %v3127_v47 = vsel %vm3126_vm4, %v3632_v58, %v3123_v46 }
0x110e   :  { %v3132_v32 = vsel %vm3129_vm5, %v3131_v36, %v3127_v47 }
0x110f   :  { %v3135_v5 = vmul.f32 1.0614054, %v3132_v32 }
0x1111   :  { %v3137_v19 = vadd.f32 -1.4531521, %v3135_v5 }
0x1113   :  { %v3139_v60 = vmul.f32 %v3137_v19, %v3132_v32 }
0x1115   :  { %v3214_v6 = vpop.xlane.xlu1 %3213  ;;  %v3141_v23 = vadd.f32 1.4214138, %v3139_v60 }
0x1116   :  { %v3218_v51 = vmul.f32 %v3214_v6, %v3766_v30 }
0x1117   :  { %v3143_v33 = vmul.f32 %v3141_v23, %v3132_v32 }
0x1118   :  { %v3220_v0 = vadd.f32 1e-12, %v3218_v51 }
0x1119   :  { %v3145_v4 = vadd.f32 -0.28449672, %v3143_v33 }
0x111a   :  { %3635 = vrsqrt.f32 %v3220_v0  ;;  %vm3228_vm8 = vweird.f32 %v3220_v0 }
0x111b   :  { %v3147_v31 = vmul.f32 %v3145_v4, %v3132_v32 }
0x111d   :  { %v3149_v49 = vadd.f32 0.2548296, %v3147_v31 }
0x111f   :  { %v3151_v38 = vmul.f32 %v3149_v49, %v3132_v32 }
0x1120   :  { %v3636_v17 = vpop.eup %3635 }
0x1121   :  { %v3223_v11 = vmul.f32 %v3636_v17, %v3220_v0  ;;  %v3161_v26 = vmul.f32 %v3634_v12, %v3151_v38  ;;  %vm3229_vm7 = vweird.f32 %v3636_v17 }
0x1122   :  { %vm3230_vm9 = vmor %vm3228_vm8, %vm3229_vm7 }
0x1123   :  { %v3224_v54 = vmul.f32 %v3636_v17, %v3223_v11  ;;  %v3163_v22 = vsub.f32 1.0, %v3161_v26 }
0x1125   :  { %v3225_v48 = vmul.f32 0.5, %v3224_v54  ;;  %v3167_v55 = vsub.f32 0.0, %v3163_v22 }
0x1127   :  { %v3226_v24 = vsub.f32 1.5, %v3225_v48  ;;  %v3169_v35 = vsel %vm3165_vm6, %v3167_v55, %v3163_v22 }
0x1128   :  { %v3171_v2 = vadd.f32 1.0, %v3169_v35 }
0x1129   :  { %v3227_v25 = vmul.f32 %v3636_v17, %v3226_v24 }
0x112a   :  { %v3173_v1 = vmul.f32 %v3171_v2, %v3095_v56 }
0x112b   :  { %v3231_v27 = vsel %vm3230_vm9, %v3636_v17, %v3227_v25 }
0x112c   :  { %v3242_v63 = vmul.f32 %v3231_v27, %v5186_v9  ;;  %3194 = vmatmul.f32.gmra.mxu1 %v3173_v1 }
0x112e   :  { %v3245_v18 = vmul.f32 %v3244_v41, %v3242_v63 }
0x1130   :  { %v3248_v8 = vadd.f32 %v3247_v21, %v3245_v18 }
0x1132   :  { %3501 = vmatmul.msk.f32.vlgmr.msrb.gmra.mxu2 %vm110_vm3, %v3248_v8 }
0x11a9   :  { %v3195_v34 = vpop.f32.mrf.mxu1 }
0x11aa   :  { %v3196_v53 = vadd.f32 %v3195_v34, %v3174_v16 }
0x11ac   :  { %v3199_v40 = vadd.f32 %v3196_v53, %v5181_v20 }
0x11ae   :  { %v3203_v43 = vsel %vm110_vm3, %v3199_v40, 0.0 }
0x11af   :  { %3204 = vadd.xlane.f32.xlu0 %v3203_v43 }
0x11b5   :  { %v3281_v29 = vpop.f32.mrf.mxu2 }
0x11b6   :  { %v3282_v9 = vadd.f32 %v3536_v14, %v3281_v29 }
0x11b8   :  { %3288 = vst.msk [vmem:[%s5241_s13] sm:$0xff] %vm3287_vm10, %v3282_v9 }
0x1222   :  { %v3205_v44 = vpop.xlane.xlu0 %3204 }
0x1223   :  { %v3207_v28 = vmul.f32 %v3205_v44, %v3766_v30 }
0x1225   :  { %v3209_v16 = vsub.f32 %v3199_v40, %v3207_v28 }
0x1227   :  { %v3211_v20 = vmul.f32 %v3209_v16, %v3209_v16 }
0x1229   :  { %v3215_v13 = vsel %vm110_vm3, %v3211_v20, 0.0 }
0x122a   :  { %3216 = vadd.xlane.f32.xlu2 %v3215_v13 }
0x129d   :  { %v3217_v15 = vpop.xlane.xlu2 %3216 }
0x129e   :  { %v3219_v42 = vmul.f32 %v3217_v15, %v3766_v30 }
0x12a0   :  { %v3221_v58 = vadd.f32 1e-12, %v3219_v42 }
0x12a2   :  { %3637 = vrsqrt.f32 %v3221_v58  ;;  %vm3238_vm12 = vweird.f32 %v3221_v58 }
0x12a8   :  { %v3638_v3 = vpop.eup %3637 }
0x12a9   :  { %v3233_v10 = vmul.f32 %v3638_v3, %v3221_v58  ;;  %vm3239_vm11 = vweird.f32 %v3638_v3 }
0x12aa   :  { %vm3240_vm13 = vmor %vm3238_vm12, %vm3239_vm11 }
0x12ab   :  { %v3234_v37 = vmul.f32 %v3638_v3, %v3233_v10 }
0x12ad   :  { %v3235_v45 = vmul.f32 0.5, %v3234_v37 }
0x12af   :  { %v3236_v39 = vsub.f32 1.5, %v3235_v45 }
0x12b1   :  { %v3237_v46 = vmul.f32 %v3638_v3, %v3236_v39 }
0x12b3   :  { %v3241_v36 = vsel %vm3240_vm13, %v3638_v3, %v3237_v46 }
0x12b4   :  { %v3243_v61 = vmul.f32 %v3241_v36, %v3209_v16 }
0x12b6   :  { %v3246_v50 = vmul.f32 %v3244_v41, %v3243_v61 }
0x12b8   :  { %v3249_v47 = vadd.f32 %v3247_v21, %v3246_v50 }
0x12ba   :  { %3502 = vmatmul.msk.f32.gmra.mxu2 %vm110_vm3, %v3249_v47 }
0x133d   :  { %v3284_v32 = vpop.f32.mrf.mxu2 }
0x133e   :  { %v3285_v52 = vadd.f32 %v3536_v14, %v3284_v32 }
0x1340   :  { %3289 = vst.msk [vmem:[%s5241_s13 + $0x8] sm:$0xff] %vm3287_vm10, %v3285_v52 }

</bundles_post_ra>
